<compile_context>
chip_gen: v6e
topology: v6e:2x2x1
jax: 0.10.0
libtpu: 0.0.40
codegen_flags: <defaults>
</compile_context>

<pallas_src>
import functools

import jax
import jax.numpy as jnp
from jax.experimental import pallas as pl
from jax.experimental.pallas import tpu as pltpu


# ----------------------------- Pallas kernel -------------------------------

def _encoder_fused_kernel(xcol1_ref, w1_ref, b1_ref, w2_ref, b2_ref,
                          o_ref, h1_ref, *, H, W):
    # xcol1_ref: (bblk, H*W, 9*Cin) bf16   conv1 im2col, interior pixels only
    # w1_ref   : (9*Cin, C1P) bf16         b1_ref: (1, C1P) f32
    # w2_ref   : (9, C1P, C2P) bf16        b2_ref: (1, C2P) f32
    # o_ref    : (1, bblk, C2P) f32        lane-dense per-block embeddings
    # h1_ref   : VMEM scratch (bblk, He, Wp, C1P) bf16 -- fused conv1 output + zero halo
    Bblk, He, Wp, C1P = h1_ref.shape
    C2P = o_ref.shape[-1]
    M = Bblk * H * W

    # ---- conv1: one folded-K (9*Cin) MXU matmul over all interior pixels ----
    xcol1 = xcol1_ref[...].reshape(M, xcol1_ref.shape[-1])           # (M, 9*Cin) bf16
    h1 = jnp.dot(xcol1, w1_ref[...], preferred_element_type=jnp.float32)
    h1 = jnp.maximum(h1 + b1_ref[...], 0.0)                          # f32 bias + ReLU

    # Zero-filled halo ring == conv2's SAME zero padding; interior stored at offset (1,1).
    # bf16 scratch halves VMEM + tap-read traffic; never touches HBM.
    h1_ref[...] = jnp.zeros_like(h1_ref)
    h1_ref[:, 1:1 + H, 1:1 + W, :] = (
        h1.reshape(Bblk, H, W, C1P).astype(h1_ref.dtype))

    # ---- conv2: 9 accumulating per-tap MXU dots on views of h1 (no im2col slab) ----
    acc = None
    for kw in range(3):                           # one sublane-shifted read per kw
        h1s = h1_ref[:, :, kw:kw + W, :]          # (bblk, He, W, C1P) bf16
        for kh in range(3):                       # kh slices an outer dim (layout-free)
            tap = h1s[:, kh:kh + H].reshape(M, C1P)
            d = jnp.dot(tap, w2_ref[3 * kh + kw],
                        preferred_element_type=jnp.float32)
            acc = d if acc is None else acc + d
    h2 = jnp.maximum(acc + b2_ref[...], 0.0)                          # (M, C2P) f32

    # ---- global average pool: in-VMEM reduction; lane-dense (bblk, 128) store ----
    pooled = jnp.sum(h2.reshape(Bblk, H * W, C2P), axis=1) * (1.0 / (H * W))
    o_ref[...] = pooled.reshape(1, Bblk, C2P)


# ------------------------------- JAX glue ----------------------------------

def _im2col3x3_same(x_nhwc):
    """Standard 3x3 SAME-conv im2col: (B, H, W, C) -> (B, H*W, 9*C)."""
    b, h, w, c = x_nhwc.shape
    xp = jnp.pad(x_nhwc, ((0, 0), (1, 1), (1, 1), (0, 0)))
    taps = [xp[:, kh:kh + h, kw:kw + w, :] for kh in range(3) for kw in range(3)]
    xcol = jnp.concatenate(taps, axis=-1)                             # (B, H, W, 9*C)
    return xcol.reshape(b, h * w, 9 * c)


@jax.jit
def encoder_forward(x_nchw, params):
    """Forward of Encoder: image (B, C, H, W) -> embedding (B, embed_dim)."""
    w1, b1, w2, b2 = params["w1"], params["b1"], params["w2"], params["b2"]
    B, Cin, H, W = x_nchw.shape
    C1 = w1.shape[-1]
    C2 = w2.shape[-1]
    K1 = 9 * Cin
    C1P = ((C1 + 127) // 128) * 128            # conv1 channels, lane-dense
    C2P = ((C2 + 127) // 128) * 128            # conv2 channels padded to full MXU columns
    He = H + 2                                 # h1 rows incl. 1-row halo each side
    Wp = ((W + 2 + 7) // 8) * 8                # padded width, sublane(8)-aligned

    # Batch blocking: amortize per-step fixed cost (~0.35us) while keeping the grid
    # length >= 2 when possible so both v7x TensorCores get work.
    bblk = min(8, max(1, (B + 1) // 2))
    nblk = (B + bblk - 1) // bblk
    Bpad = nblk * bblk

    x = jnp.transpose(x_nchw, (0, 2, 3, 1)).astype(jnp.float32)       # NCHW -> NHWC
    if Bpad > B:
        x = jnp.pad(x, ((0, Bpad - B), (0, 0), (0, 0), (0, 0)))       # zero tail images

    # conv1 im2col (glue; input has only Cin channels so this stays tiny). bf16 operands.
    xcol1 = _im2col3x3_same(x).astype(jnp.bfloat16)                   # (Bpad, H*W, 9*Cin)

    # Folded-K conv1 weight; conv2 weights kept per-tap, N padded to 128.
    w1p = jnp.pad(w1.reshape(K1, C1), ((0, 0), (0, C1P - C1))).astype(jnp.bfloat16)
    b1p = jnp.pad(b1, ((0, 0), (0, C1P - C1))).astype(jnp.float32)    # (1, C1P)
    w2p = jnp.pad(w2, ((0, 0), (0, C1P - C1), (0, C2P - C2))).astype(jnp.bfloat16)
    b2p = jnp.pad(b2, ((0, 0), (0, C2P - C2))).astype(jnp.float32)    # (1, C2P)

    kernel = functools.partial(_encoder_fused_kernel, H=H, W=W)
    out = pl.pallas_call(
        kernel,
        out_shape=jax.ShapeDtypeStruct((nblk, bblk, C2P), jnp.float32),
        grid=(nblk,),
        in_specs=[
            pl.BlockSpec((bblk, H * W, K1), lambda i: (i, 0, 0)),     # per-block stream
            pl.BlockSpec((K1, C1P), lambda i: (0, 0)),                # resident constants:
            pl.BlockSpec((1, C1P), lambda i: (0, 0)),                 #   loaded once via
            pl.BlockSpec((9, C1P, C2P), lambda i: (0, 0, 0)),         #   constant index_map
            pl.BlockSpec((1, C2P), lambda i: (0, 0)),
        ],
        out_specs=pl.BlockSpec((1, bblk, C2P), lambda i: (i, 0, 0)),
        scratch_shapes=[pltpu.VMEM((bblk, He, Wp, C1P), jnp.bfloat16)],  # fused h1
        compiler_params=pltpu.CompilerParams(
            dimension_semantics=("parallel",),                        # both TCs on v7x
            vmem_limit_bytes=32 * 1024 * 1024),
    )(xcol1, w1p, b1p, w2p, b2p)
    return out.reshape(Bpad, C2P)[:B, :C2]


# ------------------------- params / reference ------------------------------

def init_params(key, cin=3, c1=32, embed_dim=64):
    k1, k2, k3, k4 = jax.random.split(key, 4)
    w1 = jax.random.normal(k1, (9, cin, c1), jnp.float32) * (2.0 / (9 * cin)) ** 0.5
    b1 = jax.random.normal(k2, (1, c1), jnp.float32) * 0.01
    w2 = jax.random.normal(k3, (9, c1, embed_dim), jnp.float32) * (2.0 / (9 * c1)) ** 0.5
    b2 = jax.random.normal(k4, (1, embed_dim), jnp.float32) * 0.01
    return dict(w1=w1, b1=b1, w2=w2, b2=b2)


def _ref_forward(x_nchw, params):
    """Pure-JAX f32 reference of the same synthetic backbone."""
    x = jnp.transpose(x_nchw, (0, 2, 3, 1)).astype(jnp.float32)

    def conv_relu(x, w_flat, b):
        cin, cout = w_flat.shape[1], w_flat.shape[2]
        w = w_flat.reshape(3, 3, cin, cout)  # HWIO
        y = jax.lax.conv_general_dilated(
            x, w, window_strides=(1, 1), padding="SAME",
            dimension_numbers=("NHWC", "HWIO", "NHWC"))
        return jax.nn.relu(y + b.reshape(1, 1, 1, -1))

    h1 = conv_relu(x, params["w1"], params["b1"])
    h2 = conv_relu(h1, params["w2"], params["b2"])
    return jnp.mean(h2, axis=(1, 2))  # (B, embed_dim)


if __name__ == "__main__":
    key = jax.random.PRNGKey(0)
    kx, kp = jax.random.split(key)

    B, C, H, W = 2, 3, 16, 16
    EMBED_DIM = 64
    x = jax.random.normal(kx, (B, C, H, W), jnp.float32)
    params = init_params(kp, cin=C, c1=32, embed_dim=EMBED_DIM)

    emb = jax.block_until_ready(encoder_forward(x, params))
    ref = _ref_forward(x, params)

    assert emb.shape == (B, EMBED_DIM), emb.shape
    # MXU matmuls use bf16 operands (f32 accumulation), so compare against the f32
    # reference with a bf16-appropriate tolerance.
    max_err = float(jnp.max(jnp.abs(emb - ref)))
    assert jnp.allclose(emb, ref, rtol=2e-2, atol=2e-2), max_err

    print("KERNEL_OK")
</pallas_src>

<mosaic_0001>
module attributes {stable_mosaic.version = 11 : i64} {
  func.func @_encoder_fused_kernel(%arg0: i32, %arg1: memref<1x256x27xbf16, #tpu.memory_space<vmem>>, %arg2: memref<27x128xbf16, #tpu.memory_space<vmem>>, %arg3: memref<1x128xf32, #tpu.memory_space<vmem>>, %arg4: memref<9x128x128xbf16, #tpu.memory_space<vmem>>, %arg5: memref<1x128xf32, #tpu.memory_space<vmem>>, %arg6: memref<1x1x128xf32, #tpu.memory_space<vmem>>, %arg7: memref<1x18x24x128xbf16, #tpu.memory_space<vmem>>) attributes {dimension_semantics = [#tpu.dimension_semantics<parallel>], iteration_bounds = array<i64: 2>, scalar_prefetch = 0 : i64, scratch_operands = 1 : i64, tpu.core_type = #tpu.core_type<tc>, window_params = [{transform_indices = @transform_0, window_bounds = array<i64: 1, 256, 27>}, {pipeline_mode = #tpu.pipeline_mode<synchronous>, transform_indices = @transform_1, window_bounds = array<i64: 27, 128>}, {pipeline_mode = #tpu.pipeline_mode<synchronous>, transform_indices = @transform_2, window_bounds = array<i64: 1, 128>}, {pipeline_mode = #tpu.pipeline_mode<synchronous>, transform_indices = @transform_3, window_bounds = array<i64: 9, 128, 128>}, {pipeline_mode = #tpu.pipeline_mode<synchronous>, transform_indices = @transform_4, window_bounds = array<i64: 1, 128>}, {transform_indices = @transform_5, window_bounds = array<i64: 1, 1, 128>}]} {
    %c0 = arith.constant 0 : index
    %c0_0 = arith.constant 0 : index
    %c0_1 = arith.constant 0 : index
    %0 = vector.load %arg1[%c0, %c0_0, %c0_1] : memref<1x256x27xbf16, #tpu.memory_space<vmem>>, vector<1x256x27xbf16>
    %1 = vector.shape_cast %0 : vector<1x256x27xbf16> to vector<256x27xbf16>
    %c0_2 = arith.constant 0 : index
    %c0_3 = arith.constant 0 : index
    %2 = vector.load %arg2[%c0_2, %c0_3] : memref<27x128xbf16, #tpu.memory_space<vmem>>, vector<27x128xbf16>
    %cst = arith.constant dense<0.000000e+00> : vector<256x128xf32>
    %3 = tpu.matmul %1, %2, %cst {dimension_numbers = #tpu.dot_dimension_numbers<[1], [0], [0], [1], [0, 0, 1, 1], [], []>} : vector<256x27xbf16>, vector<27x128xbf16>, vector<256x128xf32> -> vector<256x128xf32>
    %c0_4 = arith.constant 0 : index
    %c0_5 = arith.constant 0 : index
    %4 = vector.load %arg3[%c0_4, %c0_5] : memref<1x128xf32, #tpu.memory_space<vmem>>, vector<1x128xf32>
    %5 = vector.broadcast %4 : vector<1x128xf32> to vector<256x128xf32>
    %6 = arith.addf %3, %5 : vector<256x128xf32>
    %cst_6 = arith.constant 0.000000e+00 : f32
    %7 = vector.broadcast %cst_6 : f32 to vector<256x128xf32>
    %8 = arith.maximumf %6, %7 : vector<256x128xf32>
    %cst_7 = arith.constant 0.000000e+00 : bf16
    %9 = vector.broadcast %cst_7 : bf16 to vector<1x18x24x128xbf16>
    %c0_8 = arith.constant 0 : index
    %c0_9 = arith.constant 0 : index
    %c0_10 = arith.constant 0 : index
    %c0_11 = arith.constant 0 : index
    %10 = vector.load %arg7[%c0_8, %c0_9, %c0_10, %c0_11] : memref<1x18x24x128xbf16, #tpu.memory_space<vmem>>, vector<1x18x24x128xbf16>
    tpu.vector_store %arg7[%c0_8, %c0_9, %c0_10, %c0_11], %9 {strides = array<i32>} : memref<1x18x24x128xbf16, #tpu.memory_space<vmem>>, vector<1x18x24x128xbf16>,
    %11 = vector.shape_cast %8 : vector<256x128xf32> to vector<1x16x16x128xf32>
    %12 = arith.truncf %11 : vector<1x16x16x128xf32> to vector<1x16x16x128xbf16>
    %c0_12 = arith.constant 0 : index
    %c1 = arith.constant 1 : index
    %c1_13 = arith.constant 1 : index
    %c0_14 = arith.constant 0 : index
    %13 = vector.load %arg7[%c0_12, %c1, %c1_13, %c0_14] : memref<1x18x24x128xbf16, #tpu.memory_space<vmem>>, vector<1x16x16x128xbf16>
    tpu.vector_store %arg7[%c0_12, %c1, %c1_13, %c0_14], %12 {strides = array<i32>} : memref<1x18x24x128xbf16, #tpu.memory_space<vmem>>, vector<1x16x16x128xbf16>,
    %c0_15 = arith.constant 0 : index
    %c0_16 = arith.constant 0 : index
    %c0_17 = arith.constant 0 : index
    %c0_18 = arith.constant 0 : index
    %14 = vector.load %arg7[%c0_15, %c0_16, %c0_17, %c0_18] : memref<1x18x24x128xbf16, #tpu.memory_space<vmem>>, vector<1x18x16x128xbf16>
    %15 = vector.extract_strided_slice %14 {offsets = [0, 0, 0, 0], sizes = [1, 16, 16, 128], strides = [1, 1, 1, 1]} : vector<1x18x16x128xbf16> to vector<1x16x16x128xbf16>
    %16 = vector.shape_cast %15 : vector<1x16x16x128xbf16> to vector<256x128xbf16>
    %c0_19 = arith.constant 0 : index
    %c0_20 = arith.constant 0 : index
    %c0_21 = arith.constant 0 : index
    %17 = vector.load %arg4[%c0_19, %c0_20, %c0_21] : memref<9x128x128xbf16, #tpu.memory_space<vmem>>, vector<1x128x128xbf16>
    %18 = vector.shape_cast %17 : vector<1x128x128xbf16> to vector<128x128xbf16>
    %cst_22 = arith.constant dense<0.000000e+00> : vector<256x128xf32>
    %19 = tpu.matmul %16, %18, %cst_22 {dimension_numbers = #tpu.dot_dimension_numbers<[1], [0], [0], [1], [0, 0, 1, 1], [], []>} : vector<256x128xbf16>, vector<128x128xbf16>, vector<256x128xf32> -> vector<256x128xf32>
    %20 = vector.extract_strided_slice %14 {offsets = [0, 1, 0, 0], sizes = [1, 16, 16, 128], strides = [1, 1, 1, 1]} : vector<1x18x16x128xbf16> to vector<1x16x16x128xbf16>
    %21 = vector.shape_cast %20 : vector<1x16x16x128xbf16> to vector<256x128xbf16>
    %c3 = arith.constant 3 : index
    %c0_23 = arith.constant 0 : index
    %c0_24 = arith.constant 0 : index
    %22 = vector.load %arg4[%c3, %c0_23, %c0_24] : memref<9x128x128xbf16, #tpu.memory_space<vmem>>, vector<1x128x128xbf16>
    %23 = vector.shape_cast %22 : vector<1x128x128xbf16> to vector<128x128xbf16>
    %cst_25 = arith.constant dense<0.000000e+00> : vector<256x128xf32>
    %24 = tpu.matmul %21, %23, %cst_25 {dimension_numbers = #tpu.dot_dimension_numbers<[1], [0], [0], [1], [0, 0, 1, 1], [], []>} : vector<256x128xbf16>, vector<128x128xbf16>, vector<256x128xf32> -> vector<256x128xf32>
    %25 = arith.addf %19, %24 : vector<256x128xf32>
    %26 = vector.extract_strided_slice %14 {offsets = [0, 2, 0, 0], sizes = [1, 16, 16, 128], strides = [1, 1, 1, 1]} : vector<1x18x16x128xbf16> to vector<1x16x16x128xbf16>
    %27 = vector.shape_cast %26 : vector<1x16x16x128xbf16> to vector<256x128xbf16>
    %c6 = arith.constant 6 : index
    %c0_26 = arith.constant 0 : index
    %c0_27 = arith.constant 0 : index
    %28 = vector.load %arg4[%c6, %c0_26, %c0_27] : memref<9x128x128xbf16, #tpu.memory_space<vmem>>, vector<1x128x128xbf16>
    %29 = vector.shape_cast %28 : vector<1x128x128xbf16> to vector<128x128xbf16>
    %cst_28 = arith.constant dense<0.000000e+00> : vector<256x128xf32>
    %30 = tpu.matmul %27, %29, %cst_28 {dimension_numbers = #tpu.dot_dimension_numbers<[1], [0], [0], [1], [0, 0, 1, 1], [], []>} : vector<256x128xbf16>, vector<128x128xbf16>, vector<256x128xf32> -> vector<256x128xf32>
    %31 = arith.addf %25, %30 : vector<256x128xf32>
    %c0_29 = arith.constant 0 : index
    %c0_30 = arith.constant 0 : index
    %c1_31 = arith.constant 1 : index
    %c0_32 = arith.constant 0 : index
    %32 = vector.load %arg7[%c0_29, %c0_30, %c1_31, %c0_32] : memref<1x18x24x128xbf16, #tpu.memory_space<vmem>>, vector<1x18x16x128xbf16>
    %33 = vector.extract_strided_slice %32 {offsets = [0, 0, 0, 0], sizes = [1, 16, 16, 128], strides = [1, 1, 1, 1]} : vector<1x18x16x128xbf16> to vector<1x16x16x128xbf16>
    %34 = vector.shape_cast %33 : vector<1x16x16x128xbf16> to vector<256x128xbf16>
    %c1_33 = arith.constant 1 : index
    %c0_34 = arith.constant 0 : index
    %c0_35 = arith.constant 0 : index
    %35 = vector.load %arg4[%c1_33, %c0_34, %c0_35] : memref<9x128x128xbf16, #tpu.memory_space<vmem>>, vector<1x128x128xbf16>
    %36 = vector.shape_cast %35 : vector<1x128x128xbf16> to vector<128x128xbf16>
    %cst_36 = arith.constant dense<0.000000e+00> : vector<256x128xf32>
    %37 = tpu.matmul %34, %36, %cst_36 {dimension_numbers = #tpu.dot_dimension_numbers<[1], [0], [0], [1], [0, 0, 1, 1], [], []>} : vector<256x128xbf16>, vector<128x128xbf16>, vector<256x128xf32> -> vector<256x128xf32>
    %38 = arith.addf %31, %37 : vector<256x128xf32>
    %39 = vector.extract_strided_slice %32 {offsets = [0, 1, 0, 0], sizes = [1, 16, 16, 128], strides = [1, 1, 1, 1]} : vector<1x18x16x128xbf16> to vector<1x16x16x128xbf16>
    %40 = vector.shape_cast %39 : vector<1x16x16x128xbf16> to vector<256x128xbf16>
    %c4 = arith.constant 4 : index
    %c0_37 = arith.constant 0 : index
    %c0_38 = arith.constant 0 : index
    %41 = vector.load %arg4[%c4, %c0_37, %c0_38] : memref<9x128x128xbf16, #tpu.memory_space<vmem>>, vector<1x128x128xbf16>
    %42 = vector.shape_cast %41 : vector<1x128x128xbf16> to vector<128x128xbf16>
    %cst_39 = arith.constant dense<0.000000e+00> : vector<256x128xf32>
    %43 = tpu.matmul %40, %42, %cst_39 {dimension_numbers = #tpu.dot_dimension_numbers<[1], [0], [0], [1], [0, 0, 1, 1], [], []>} : vector<256x128xbf16>, vector<128x128xbf16>, vector<256x128xf32> -> vector<256x128xf32>
    %44 = arith.addf %38, %43 : vector<256x128xf32>
    %45 = vector.extract_strided_slice %32 {offsets = [0, 2, 0, 0], sizes = [1, 16, 16, 128], strides = [1, 1, 1, 1]} : vector<1x18x16x128xbf16> to vector<1x16x16x128xbf16>
    %46 = vector.shape_cast %45 : vector<1x16x16x128xbf16> to vector<256x128xbf16>
    %c7 = arith.constant 7 : index
    %c0_40 = arith.constant 0 : index
    %c0_41 = arith.constant 0 : index
    %47 = vector.load %arg4[%c7, %c0_40, %c0_41] : memref<9x128x128xbf16, #tpu.memory_space<vmem>>, vector<1x128x128xbf16>
    %48 = vector.shape_cast %47 : vector<1x128x128xbf16> to vector<128x128xbf16>
    %cst_42 = arith.constant dense<0.000000e+00> : vector<256x128xf32>
    %49 = tpu.matmul %46, %48, %cst_42 {dimension_numbers = #tpu.dot_dimension_numbers<[1], [0], [0], [1], [0, 0, 1, 1], [], []>} : vector<256x128xbf16>, vector<128x128xbf16>, vector<256x128xf32> -> vector<256x128xf32>
    %50 = arith.addf %44, %49 : vector<256x128xf32>
    %c0_43 = arith.constant 0 : index
    %c0_44 = arith.constant 0 : index
    %c2 = arith.constant 2 : index
    %c0_45 = arith.constant 0 : index
    %51 = vector.load %arg7[%c0_43, %c0_44, %c2, %c0_45] : memref<1x18x24x128xbf16, #tpu.memory_space<vmem>>, vector<1x18x16x128xbf16>
    %52 = vector.extract_strided_slice %51 {offsets = [0, 0, 0, 0], sizes = [1, 16, 16, 128], strides = [1, 1, 1, 1]} : vector<1x18x16x128xbf16> to vector<1x16x16x128xbf16>
    %53 = vector.shape_cast %52 : vector<1x16x16x128xbf16> to vector<256x128xbf16>
    %c2_46 = arith.constant 2 : index
    %c0_47 = arith.constant 0 : index
    %c0_48 = arith.constant 0 : index
    %54 = vector.load %arg4[%c2_46, %c0_47, %c0_48] : memref<9x128x128xbf16, #tpu.memory_space<vmem>>, vector<1x128x128xbf16>
    %55 = vector.shape_cast %54 : vector<1x128x128xbf16> to vector<128x128xbf16>
    %cst_49 = arith.constant dense<0.000000e+00> : vector<256x128xf32>
    %56 = tpu.matmul %53, %55, %cst_49 {dimension_numbers = #tpu.dot_dimension_numbers<[1], [0], [0], [1], [0, 0, 1, 1], [], []>} : vector<256x128xbf16>, vector<128x128xbf16>, vector<256x128xf32> -> vector<256x128xf32>
    %57 = arith.addf %50, %56 : vector<256x128xf32>
    %58 = vector.extract_strided_slice %51 {offsets = [0, 1, 0, 0], sizes = [1, 16, 16, 128], strides = [1, 1, 1, 1]} : vector<1x18x16x128xbf16> to vector<1x16x16x128xbf16>
    %59 = vector.shape_cast %58 : vector<1x16x16x128xbf16> to vector<256x128xbf16>
    %c5 = arith.constant 5 : index
    %c0_50 = arith.constant 0 : index
    %c0_51 = arith.constant 0 : index
    %60 = vector.load %arg4[%c5, %c0_50, %c0_51] : memref<9x128x128xbf16, #tpu.memory_space<vmem>>, vector<1x128x128xbf16>
    %61 = vector.shape_cast %60 : vector<1x128x128xbf16> to vector<128x128xbf16>
    %cst_52 = arith.constant dense<0.000000e+00> : vector<256x128xf32>
    %62 = tpu.matmul %59, %61, %cst_52 {dimension_numbers = #tpu.dot_dimension_numbers<[1], [0], [0], [1], [0, 0, 1, 1], [], []>} : vector<256x128xbf16>, vector<128x128xbf16>, vector<256x128xf32> -> vector<256x128xf32>
    %63 = arith.addf %57, %62 : vector<256x128xf32>
    %64 = vector.extract_strided_slice %51 {offsets = [0, 2, 0, 0], sizes = [1, 16, 16, 128], strides = [1, 1, 1, 1]} : vector<1x18x16x128xbf16> to vector<1x16x16x128xbf16>
    %65 = vector.shape_cast %64 : vector<1x16x16x128xbf16> to vector<256x128xbf16>
    %c8 = arith.constant 8 : index
    %c0_53 = arith.constant 0 : index
    %c0_54 = arith.constant 0 : index
    %66 = vector.load %arg4[%c8, %c0_53, %c0_54] : memref<9x128x128xbf16, #tpu.memory_space<vmem>>, vector<1x128x128xbf16>
    %67 = vector.shape_cast %66 : vector<1x128x128xbf16> to vector<128x128xbf16>
    %cst_55 = arith.constant dense<0.000000e+00> : vector<256x128xf32>
    %68 = tpu.matmul %65, %67, %cst_55 {dimension_numbers = #tpu.dot_dimension_numbers<[1], [0], [0], [1], [0, 0, 1, 1], [], []>} : vector<256x128xbf16>, vector<128x128xbf16>, vector<256x128xf32> -> vector<256x128xf32>
    %69 = arith.addf %63, %68 : vector<256x128xf32>
    %c0_56 = arith.constant 0 : index
    %c0_57 = arith.constant 0 : index
    %70 = vector.load %arg5[%c0_56, %c0_57] : memref<1x128xf32, #tpu.memory_space<vmem>>, vector<1x128xf32>
    %71 = vector.broadcast %70 : vector<1x128xf32> to vector<256x128xf32>
    %72 = arith.addf %69, %71 : vector<256x128xf32>
    %cst_58 = arith.constant 0.000000e+00 : f32
    %73 = vector.broadcast %cst_58 : f32 to vector<256x128xf32>
    %74 = arith.maximumf %72, %73 : vector<256x128xf32>
    %75 = vector.shape_cast %74 : vector<256x128xf32> to vector<1x256x128xf32>
    %cst_59 = arith.constant dense<0.000000e+00> : vector<1x128xf32>
    %76 = vector.multi_reduction <add>, %75, %cst_59 [1] : vector<1x256x128xf32> to vector<1x128xf32>
    %cst_60 = arith.constant 3.906250e-03 : f32
    %77 = vector.broadcast %cst_60 : f32 to vector<1x128xf32>
    %78 = arith.mulf %76, %77 : vector<1x128xf32>
    %79 = vector.shape_cast %78 : vector<1x128xf32> to vector<1x1x128xf32>
    %c0_61 = arith.constant 0 : index
    %c0_62 = arith.constant 0 : index
    %c0_63 = arith.constant 0 : index
    %80 = vector.load %arg6[%c0_61, %c0_62, %c0_63] : memref<1x1x128xf32, #tpu.memory_space<vmem>>, vector<1x1x128xf32>
    tpu.vector_store %arg6[%c0_61, %c0_62, %c0_63], %79 {strides = array<i32>} : memref<1x1x128xf32, #tpu.memory_space<vmem>>, vector<1x1x128xf32>,
    return
  }
  func.func @transform_0(%arg0: i32) -> (i32, i32, i32) {
    %c0_i32 = arith.constant 0 : i32
    %c0_i32_0 = arith.constant 0 : i32
    %c0_i32_1 = arith.constant 0 : i32
    return %arg0, %c0_i32, %c0_i32_0 : i32, i32, i32
  }
  func.func @transform_1(%arg0: i32) -> (i32, i32) {
    %c0_i32 = arith.constant 0 : i32
    %c0_i32_0 = arith.constant 0 : i32
    %c0_i32_1 = arith.constant 0 : i32
    return %c0_i32, %c0_i32_0 : i32, i32
  }
  func.func @transform_2(%arg0: i32) -> (i32, i32) {
    %c0_i32 = arith.constant 0 : i32
    %c0_i32_0 = arith.constant 0 : i32
    %c0_i32_1 = arith.constant 0 : i32
    return %c0_i32, %c0_i32_0 : i32, i32
  }
  func.func @transform_3(%arg0: i32) -> (i32, i32, i32) {
    %c0_i32 = arith.constant 0 : i32
    %c0_i32_0 = arith.constant 0 : i32
    %c0_i32_1 = arith.constant 0 : i32
    %c0_i32_2 = arith.constant 0 : i32
    return %c0_i32, %c0_i32_0, %c0_i32_1 : i32, i32, i32
  }
  func.func @transform_4(%arg0: i32) -> (i32, i32) {
    %c0_i32 = arith.constant 0 : i32
    %c0_i32_0 = arith.constant 0 : i32
    %c0_i32_1 = arith.constant 0 : i32
    return %c0_i32, %c0_i32_0 : i32, i32
  }
  func.func @transform_5(%arg0: i32) -> (i32, i32, i32) {
    %c0_i32 = arith.constant 0 : i32
    %c0_i32_0 = arith.constant 0 : i32
    %c0_i32_1 = arith.constant 0 : i32
    return %arg0, %c0_i32, %c0_i32_0 : i32, i32, i32
  }
}

</mosaic_0001>

<bundles_post_ra>
// kernel: encoder_forward.1
= control target key start
LH: loop header
LB: loop body
LE: loop exit
PB: predicated region body
PF: predicated region fallthrough
CT: control target
= control target key end

     0   :  { %10 = vsyncpa [#allocation4], 0  ;;  %s7567_s0 = inlined_call_operand.vmem [shape: bf16[2,256,27], index: 0, kind: input, shape index: {}]   ;;  %s7568_s1 = inlined_call_operand.vmem [shape: bf16[27,128], index: 1, kind: input, shape index: {}]   ;;  %s7569_s2 = inlined_call_operand.vmem [shape: f32[1,128], index: 2, kind: input, shape index: {}]   ;;  %s7570_s3 = inlined_call_operand.vmem [shape: bf16[9,128,128], index: 3, kind: input, shape index: {}]   ;;  %s7571_s4 = inlined_call_operand.vmem [shape: f32[1,128], index: 4, kind: input, shape index: {}]   ;;  %s7572_s5 = inlined_call_operand.hbm [shape: f32[2,1,128], index: 5, kind: output, shape index: {}]  }
   0x1   :  { %12 = vsyncpa [#allocation4 + $0x1], 0  ;;  %s5962_s18 = smov 0   ;;  %s5964_s19 = smov 0  }
   0x2   :  { %s5966_s20 = smov 0   ;;  %s5968_s21 = smov 0  }
   0x3 LB: > { %s5983_s22 = sadd.s32 4294967295, %s5927_s21   ;;  %s4610_s23 = sadd.s32 4294967294, %s5927_s21   ;;  %s5927_s21 = sphi %s5968_s21, %s7608_s21   ;;  %s5923_s20 = sphi %s5966_s20, %s7607_s20   ;;  %s5919_s19 = sphi %s5964_s19, %s7606_s19   ;;  %s5915_s18 = sphi %s5962_s18, %s7605_s18  }
   0x4   : > { %s5987_s24 = sadd.s32 1, %s5927_s21   ;;  %s135_s25 = sadd.s32 1, %s5923_s20 }
   0x5   : > { %s132_s26 = ssub.s32 %s5927_s21, %s5987_s24  ;;  %p145_p0 = scmp.ne.s32.totalorder %s5923_s20, %s5919_s19 }
   0x6   : > { %p133_p1 = scmp.eq.s32.totalorder %s132_s26, 0  ;;  %p146_p2 = scmp.eq.s32.totalorder %s5983_s22, 1 }
   0x7   : > { %p151_p3 = scmp.ne.s32.totalorder %s5919_s19, %s5915_s18  ;;  %p152_p4 = scmp.eq.s32.totalorder %s4610_s23, 1 }
   0x8   : > { %s5998_s27 = scalar_select %p133_p1, %s5923_s20, %s135_s25  }
   0x9   : > { %p6000_p5 = por %p146_p2, %p145_p0  ;;  %p6004_p6 = por %p152_p4, %p151_p3 }
   0xa   : > { %p4613_p7 = scmp.ge.s32.totalorder %s5927_s21, 1  ;;  %p190_p8 = scmp.lt.s32.totalorder %s5927_s21, 3 }
   0xc   : > { %p191_p9 = pnand %p4613_p7, %p190_p8 }
   0xe   : > { %194 = sbr.rel (%p191_p9) target bundleno = 815 (0x32f), region = 40 }
  0x13   : > { %v5751_v0 = vld [vmem:[%s7568_s1 + $0x8] sm:$0x3f]   ;;  %vm406_vm0 = vcmask 1044480   ;;  %vm407_vm1 = vcmask 1045504   ;;  %v5929_v1 = vmov 65535   ;;  %p217_p10 = scmp.lt.s32.totalorder %s5983_s22, 1 }
  0x14   : > { %v408_v2 = vsel %vm406_vm0, 4294967295, %v5929_v1  ;;  %v5752_v5 = vld [vmem:[%s7568_s1] sm:$0xff]   ;;  %vm357_vm2 = vcmask 220160   ;;  %v5769_v6 = vld [vmem:[%s7570_s3 + $0x38] sm:$0xff]   ;;  %v5770_v10 = vld [vmem:[%s7570_s3 + $0x30] sm:$0xff]   ;;  %v5930_v29 = vmov 0  }
  0x15   : > { %v409_v3 = vsel %vm407_vm1, %v408_v2, 0  ;;  %s218_s9 = scalar_select %p217_p10, %s5983_s22, 1  ;;  %v5771_v11 = vld [vmem:[%s7570_s3 + $0x28] sm:$0xff]   ;;  %v5772_v14 = vld [vmem:[%s7570_s3 + $0x20] sm:$0xff]   ;;  %v5773_v15 = vld [vmem:[%s7570_s3 + $0x18] sm:$0xff]   ;;  %vm1080_vm3 = vcmask 1043456  }
  0x16   : > { %v411_v4 = vand.u32 %v5751_v0, %v409_v3  ;;  %v5774_v17 = vld [vmem:[%s7570_s3 + $0xf8] sm:$0xff]   ;;  %v5775_v28 = vld [vmem:[%s7570_s3 + $0xf0] sm:$0xff]   ;;  %612 = vst [vmem:[#allocation2 + $0x18] sm:$0xf] %v5930_v29  ;;  %606 = vst [vmem:[#allocation2] sm:$0xf] %v5930_v29 }
  0x17   : > { %s4959_s10 = sshll.u32 %s218_s9, 7  ;;  %5262 = vmatprep.subr.bf16.mxu1 %v5774_v17  ;;  %607 = vst [vmem:[#allocation2 + $0x4] sm:$0xf] %v5930_v29  ;;  %608 = vst [vmem:[#allocation2 + $0x8] sm:$0xf] %v5930_v29  ;;  %v5777_v30 = vld [vmem:[%s7570_s3 + $0xe8] sm:$0xff]  }
  0x18   : > { %5226 = vmatprep.subr.bf16.mxu0 %v411_v4  ;;  %s6021_s13 = scalar_lea.vmem %s7567_s0, %s4959_s10  ;;  %5263 = vmatpush3.bf16.msra.mxu1 %v5774_v17  ;;  %609 = vst [vmem:[#allocation2 + $0xc] sm:$0xf] %v5930_v29  ;;  %610 = vst [vmem:[#allocation2 + $0x10] sm:$0xf] %v5930_v29  ;;  %v5778_v31 = vld [vmem:[%s7570_s3 + $0xe0] sm:$0xff]   ;;  %v5780_v32 = vld [vmem:[%s7570_s3 + $0xd8] sm:$0xff]  }
  0x19   : > { %5227 = vmatpush3.bf16.msra.mxu0 %v411_v4  ;;  %v5753_v7 = vld [vmem:[%s6021_s13] sm:$0xff]   ;;  %v5754_v8 = vld [vmem:[%s6021_s13 + $0x8] sm:$0xff]   ;;  %v5755_v9 = vld [vmem:[%s6021_s13 + $0x10] sm:$0xff]   ;;  %5264 = vmatprep.subr.bf16.mxu1 %v5775_v28  ;;  %611 = vst [vmem:[#allocation2 + $0x14] sm:$0xf] %v5930_v29  ;;  %vm1087_vm7 = vcmask 1040384  }
  0x1a   : > { %5228 = vmatprep.subr.bf16.mxu0 %v5752_v5  ;;  %5230 = vmatprep.mubr.msk.bf16.mxu0 %vm357_vm2, %v5753_v7  ;;  %v5756_v12 = vld [vmem:[%s6021_s13 + $0x18] sm:$0xff]   ;;  %v5757_v13 = vld [vmem:[%s6021_s13 + $0x20] sm:$0xff]   ;;  %v5758_v16 = vld [vmem:[%s6021_s13 + $0x28] sm:$0xff]   ;;  %613 = vst [vmem:[#allocation2 + $0x1c] sm:$0xf] %v5930_v29  ;;  %vm3451_vm13 = vcmask 1042432  }
  0x1b   : > { %v5759_v18 = vld [vmem:[%s6021_s13 + $0x30] sm:$0xff]   ;;  %v5760_v19 = vld [vmem:[%s6021_s13 + $0x38] sm:$0xff]   ;;  %v5761_v20 = vld [vmem:[%s6021_s13 + $0x40] sm:$0xff]   ;;  %614 = vst [vmem:[#allocation2 + $0x20] sm:$0xf] %v5930_v29  ;;  %vm3452_vm15 = vcmask 1046532  }
  0x1c   : > { %v5762_v21 = vld [vmem:[%s6021_s13 + $0x48] sm:$0xff]   ;;  %v5763_v22 = vld [vmem:[%s6021_s13 + $0x50] sm:$0xff]   ;;  %v5764_v23 = vld [vmem:[%s6021_s13 + $0x58] sm:$0xff]   ;;  %5265 = vmatpush3.bf16.msra.mxu1 %v5775_v28  ;;  %615 = vst [vmem:[#allocation2 + $0x24] sm:$0xf] %v5930_v29  ;;  %s215_s23 = sand.u32 1, %s5919_s19  }
  0x1d   : > { %5229 = vmatpush3.bf16.msra.mxu0 %v5752_v5  ;;  %v5765_v24 = vld [vmem:[%s6021_s13 + $0x60] sm:$0xff]   ;;  %v5766_v25 = vld [vmem:[%s6021_s13 + $0x68] sm:$0xff]   ;;  %v5767_v26 = vld [vmem:[%s6021_s13 + $0x70] sm:$0xff]   ;;  %616 = vst [vmem:[#allocation2 + $0x28] sm:$0xf] %v5930_v29  ;;  %5266 = vmatprep.subr.bf16.mxu1 %v5777_v30  ;;  %s4956_s25 = sshll.u32 %s5983_s22, 4 }
  0x1e   : > { %5310 = vmatprep.subr.bf16.mxu0 %v5769_v6  ;;  %v5768_v27 = vld [vmem:[%s6021_s13 + $0x78] sm:$0xff]   ;;  %617 = vst [vmem:[#allocation2 + $0x2c] sm:$0xf] %v5930_v29  ;;  %618 = vst [vmem:[#allocation2 + $0x30] sm:$0xf] %v5930_v29  ;;  %v5776_v33 = vld [vmem:[%s7570_s3 + $0x10] sm:$0xff]   ;;  %s4553_s8 = scalar_lea.hbm %s7572_s5, %s4956_s25 }
  0x1f   : > { %619 = vst [vmem:[#allocation2 + $0x34] sm:$0xf] %v5930_v29  ;;  %620 = vst [vmem:[#allocation2 + $0x38] sm:$0xf] %v5930_v29  ;;  %v5781_v34 = vld [vmem:[%s7570_s3 + $0xd0] sm:$0xff]   ;;  %v5779_v35 = vld [vmem:[%s7570_s3 + $0x8] sm:$0xff]  }
  0x20   : > { %5231 = vmatmul.mubr.msk.bf16.vlgmr.msra.gmra.mxu0 %vm357_vm2, %v5754_v8  ;;  %621 = vst [vmem:[#allocation2 + $0x3c] sm:$0xf] %v5930_v29  ;;  %622 = vst [vmem:[#allocation2 + $0x40] sm:$0xf] %v5930_v29  ;;  %5267 = vmatpush3.bf16.msra.mxu1 %v5777_v30  ;;  %v5782_v36 = vld [vmem:[%s7570_s3] sm:$0xff]   ;;  %v5783_v37 = vld [vmem:[%s7570_s3 + $0xc8] sm:$0xff]  }
  0x21   : > { %5234 = vmatprep.mubr.msk.bf16.mxu0 %vm357_vm2, %v5755_v9  ;;  %5311 = vmatpush3.bf16.msra.mxu0 %v5769_v6  ;;  %623 = vst [vmem:[#allocation2 + $0x44] sm:$0xf] %v5930_v29  ;;  %624 = vst [vmem:[#allocation2 + $0x48] sm:$0xf] %v5930_v29  ;;  %v5784_v38 = vld [vmem:[%s7570_s3 + $0xc0] sm:$0xff]   ;;  %v6106_v40 = vld [vmem:[%s7570_s3 + $0x78] sm:$0xff]  }
  0x22   : > { %5312 = vmatprep.subr.bf16.mxu0 %v5770_v10  ;;  %625 = vst [vmem:[#allocation2 + $0x4c] sm:$0xf] %v5930_v29  ;;  %626 = vst [vmem:[#allocation2 + $0x50] sm:$0xf] %v5930_v29  ;;  %5268 = vmatprep.subr.bf16.mxu1 %v5778_v31  ;;  %v5785_v39 = vld [vmem:[#allocation2] sm:$0xff]   ;;  %v6112_v41 = vld [vmem:[%s7570_s3 + $0x1b8] sm:$0xff]  }
  0x23   : > { %627 = vst [vmem:[#allocation2 + $0x54] sm:$0xf] %v5930_v29  ;;  %628 = vst [vmem:[#allocation2 + $0x58] sm:$0xf] %v5930_v29  ;;  %v6118_v42 = vld [vmem:[%s7569_s2] ss:$0 sm:$0xff] }
  0x24   : > { %629 = vst [vmem:[#allocation2 + $0x5c] sm:$0xf] %v5930_v29  ;;  %630 = vst [vmem:[#allocation2 + $0x60] sm:$0xf] %v5930_v29  ;;  %5269 = vmatpush3.bf16.msra.mxu1 %v5778_v31  ;;  %v2050_v43 = vld [vmem:[#allocation2] sm:$0xf] }
  0x25   : > { %5313 = vmatpush3.bf16.msra.mxu0 %v5770_v10  ;;  %631 = vst [vmem:[#allocation2 + $0x64] sm:$0xf] %v5930_v29  ;;  %632 = vst [vmem:[#allocation2 + $0x68] sm:$0xf] %v5930_v29  ;;  %5270 = vmatprep.subr.bf16.mxu1 %v5780_v32  ;;  %v2051_v46 = vld [vmem:[#allocation2 + $0x4] sm:$0xf] }
  0x26   : > { %5314 = vmatprep.subr.bf16.mxu0 %v5771_v11  ;;  %633 = vst [vmem:[#allocation2 + $0x6c] sm:$0xf] %v5930_v29  ;;  %634 = vst [vmem:[#allocation2 + $0x70] sm:$0xf] %v5930_v29  ;;  %v2108_v48 = vshrl.u32 %v2050_v43, 16  ;;  %v2111_v49 = vshll.u32 %v2050_v43, 16 }
  0x27   : > { %635 = vst [vmem:[#allocation2 + $0x74] sm:$0xf] %v5930_v29  ;;  %636 = vst [vmem:[#allocation2 + $0x78] sm:$0xf] %v5930_v29  ;;  %v2117_v53 = vshll.u32 %v2051_v46, 16  ;;  %v2121_v54 = vshrl.u32 %v2051_v46, 16 }
  0x28   : > { %5235 = vmatmul.mubr.msk.bf16.gmra.mxu0 %vm357_vm2, %v5756_v12  ;;  %637 = vst [vmem:[#allocation2 + $0x7c] sm:$0xf] %v5930_v29  ;;  %638 = vst [vmem:[#allocation2 + $0x80] sm:$0xf] %v5930_v29  ;;  %5271 = vmatpush3.bf16.msra.mxu1 %v5780_v32  ;;  %vm1081_vm4 = vsmask.f32 7938 }
  0x29   : > { %5238 = vmatprep.mubr.msk.bf16.mxu0 %vm357_vm2, %v5757_v13  ;;  %5315 = vmatpush3.bf16.msra.mxu0 %v5771_v11  ;;  %639 = vst [vmem:[#allocation2 + $0x84] sm:$0xf] %v5930_v29  ;;  %640 = vst [vmem:[#allocation2 + $0x88] sm:$0xf] %v5930_v29  ;;  %vm756_vm5 = vsmask.f32 256 }
  0x2a   : > { %5316 = vmatprep.subr.bf16.mxu0 %v5772_v14  ;;  %641 = vst [vmem:[#allocation2 + $0x8c] sm:$0xf] %v5930_v29  ;;  %642 = vst [vmem:[#allocation2 + $0x90] sm:$0xf] %v5930_v29  ;;  %5272 = vmatprep.subr.bf16.mxu1 %v5781_v34  ;;  %v6123_v59 = vrot.slane %v2108_v48, 4  ;;  %v6125_v60 = vrot.slane %v2111_v49, 5 }
  0x2b   : > { %643 = vst [vmem:[#allocation2 + $0x94] sm:$0xf] %v5930_v29  ;;  %644 = vst [vmem:[#allocation2 + $0x98] sm:$0xf] %v5930_v29  ;;  %vm757_vm6 = vsmask.f32 4368 }
  0x2c   : > { %645 = vst [vmem:[#allocation2 + $0x9c] sm:$0xf] %v5930_v29  ;;  %646 = vst [vmem:[#allocation2 + $0xa0] sm:$0xf] %v5930_v29  ;;  %5273 = vmatpush3.bf16.msra.mxu1 %v5781_v34  ;;  %v6128_v2 = vrot.slane %v2117_v53, 5  ;;  %v6130_v3 = vrot.slane %v2121_v54, 4 }
  0x2d   : > { %5317 = vmatpush3.bf16.msra.mxu0 %v5772_v14  ;;  %647 = vst [vmem:[#allocation2 + $0xa4] sm:$0xf] %v5930_v29  ;;  %648 = vst [vmem:[#allocation2 + $0xa8] sm:$0xf] %v5930_v29  ;;  %5274 = vmatprep.subr.bf16.mxu1 %v5783_v37  ;;  %v1092_v9 = vld [vmem:[#allocation2 + $0x18] sm:$0xf]  ;;  %v2114_v14 = vor.u32 %v6125_v60, %v6123_v59 }
  0x2e   : > { %5318 = vmatprep.subr.bf16.mxu0 %v5773_v15  ;;  %649 = vst [vmem:[#allocation2 + $0xac] sm:$0xf] %v5930_v29  ;;  %650 = vst [vmem:[#allocation2 + $0xb0] sm:$0xf] %v5930_v29  ;;  %v1096_v31 = vld [vmem:[#allocation2 + $0x20] sm:$0x1] }
  0x2f   : > { %651 = vst [vmem:[#allocation2 + $0xb4] sm:$0xf] %v5930_v29  ;;  %652 = vst [vmem:[#allocation2 + $0xb8] sm:$0xf] %v5930_v29  ;;  %vm2104_vm11 = vsmask.f32 3328 }
  0x30   : > { %5239 = vmatmul.mubr.msk.bf16.gmra.mxu0 %vm357_vm2, %v5758_v16  ;;  %653 = vst [vmem:[#allocation2 + $0xbc] sm:$0xf] %v5930_v29  ;;  %654 = vst [vmem:[#allocation2 + $0xc0] sm:$0xf] %v5930_v29  ;;  %5275 = vmatpush3.bf16.msra.mxu1 %v5783_v37  ;;  %vm2105_vm12 = vsmask.f32 7440 }
  0x31   : > { %5242 = vmatprep.mubr.msk.bf16.mxu0 %vm357_vm2, %v5759_v18  ;;  %5319 = vmatpush3.bf16.msra.mxu0 %v5773_v15  ;;  %655 = vst [vmem:[#allocation2 + $0xc4] sm:$0xf] %v5930_v29  ;;  %656 = vst [vmem:[#allocation2 + $0xc8] sm:$0xf] %v5930_v29  ;;  %s216_s26 = scalar_lea.vmem [#allocation3], %s215_s23  ;;  %s4543_s9 = scalar_lea.sflag [#allocation4], %s215_s23 }
  0x32   : > { %657 = vst [vmem:[#allocation2 + $0xcc] sm:$0xf] %v5930_v29  ;;  %658 = vst [vmem:[#allocation2 + $0xd0] sm:$0xf] %v5930_v29  ;;  %5320 = vmatprep.subr.bf16.mxu0 %v5776_v33  ;;  %5276 = vmatprep.subr.bf16.mxu1 %v5784_v38  ;;  %s4555_s30 = sshll.u32 %s216_s26, 4  ;;  %s5931_s11 = smov [#allocation3]   ;;  %s4556_s30 = int_to_ptr.vmem [resolvable:$true] %s4555_s30 }
  0x33   : > { %659 = vst [vmem:[#allocation2 + $0xd4] sm:$0xf] %v5930_v29  ;;  %vm6134_vm8 = vmand %vm1080_vm3, %vm1081_vm4  ;;  %s5867_s10 = scalar_lea.vmem %s4556_s30, 16  ;;  %s5871_s12 = sshll.u32 %s5931_s11, 4  ;;  %s5872_s12 = int_to_ptr.vmem [resolvable:$false] %s5871_s12 }
  0x34   : > { %5277 = vmatpush3.bf16.msra.mxu1 %v5784_v38  ;;  %vm6146_vm9 = vmor %vm756_vm5, %vm757_vm6  ;;  %p5868_p11 = scmp.ne.s32.totalorder %s4556_s30, %s5867_s10  ;;  %s5873_s22 = scalar_lea.vmem %s5872_s12, 32 }
  0x35   : > { %5321 = vmatpush3.bf16.msra.mxu0 %v5776_v33  ;;  %5358 = vmatprep.subr.bf16.mxu1 %v6112_v41  ;;  %vm6152_vm10 = vmand %vm1087_vm7, %vm756_vm5  ;;  %p5874_p0 = scmp.lt.s32.totalorder %s4556_s30, %s5872_s12  ;;  %p5875_p1 = scmp.lt.s32.totalorder %s5873_s22, %s5867_s10 }
  0x36   : > { %5322 = vmatprep.subr.bf16.mxu0 %v5779_v35  ;;  %v1183_v60 = vld [vmem:[#allocation2 + $0xb4] sm:$0xf]  ;;  %vm6451_vm14 = vmor %vm2104_vm11, %vm2105_vm12  ;;  %p5869_p12 = pnand %p5868_p11, %p6000_p5 }
  0x37   : > { %vm6472_vm0 = vmor %vm3451_vm13, %vm3452_vm15  ;;  %p5876_p2 = por %p5875_p1, %p5874_p0 }
  0x38   : > { %5243 = vmatmul.mubr.msk.bf16.gmra.mxu0 %vm357_vm2, %v5760_v19  ;;  %v1083_v19 = vld [vmem:[#allocation2 + $0xc] sm:$0xf]  ;;  %p5870_p13 = pneg %p5869_p12 }
  0x39   : > { %5246 = vmatprep.mubr.msk.bf16.mxu0 %vm357_vm2, %v5761_v20  ;;  %5323 = vmatpush3.bf16.msra.mxu0 %v5779_v35 }
  0x3a   : > { %5324 = vmatprep.subr.bf16.mxu0 %v5782_v36  ;;  %p5877_p3 = pnand %p5876_p2, %p5870_p13 }
  0x3d   : > { %5325 = vmatpush3.bf16.msra.mxu0 %v5782_v36 }
  0x3e   : > { %5406 = vmatprep.subr.bf16.mxu0 %v6106_v40 }
  0x40   : > { %5247 = vmatmul.mubr.msk.bf16.gmra.mxu0 %vm357_vm2, %v5762_v21 }
  0x41   : > { %5250 = vmatprep.mubr.msk.bf16.mxu0 %vm357_vm2, %v5763_v22 }
  0x48   : > { %5251 = vmatmul.mubr.msk.bf16.gmra.mxu0 %vm357_vm2, %v5764_v23 }
  0x49   : > { %5254 = vmatprep.mubr.msk.bf16.mxu0 %vm357_vm2, %v5765_v24 }
  0x50   : > { %5255 = vmatmul.mubr.msk.bf16.gmra.mxu0 %vm357_vm2, %v5766_v25 }
  0x51   : > { %5258 = vmatprep.mubr.msk.bf16.mxu0 %vm357_vm2, %v5767_v26 }
  0x58   : > { %5259 = vmatmul.mubr.msk.bf16.gmra.mxu0 %vm357_vm2, %v5768_v27 }
  0x59   : > { %5326 = vmatprep.mubr.bf16.mxu0 %v5785_v39 }
  0xe0   : > { %v5232_v44 = vpop.f32.mrf.mxu0 }
  0xe1   : > { %v456_v45 = vadd.f32 %v5232_v44, %v6118_v42 }
  0xe2   : > { %v447_v47 = vpop.f32.mrf.mxu0 }
  0xe3   : > { %v576_v50 = vmax.f32 %v456_v45, 0.0  ;;  %v448_v51 = vadd.f32 %v6118_v42, %v447_v47 }
  0xe4   : > { %v5233_v52 = vpop.f32.mrf.mxu0 }
  0xe5   : > { %v4962_v55 = vpack.c.bf16 %v576_v50, %v576_v50  ;;  %v574_v56 = vmax.f32 %v448_v51, 0.0  ;;  %v459_v57 = vadd.f32 %v5233_v52, %v6118_v42  ;;  %v1089_v51 = vld [vmem:[#allocation2 + $0x14] sm:$0x1] }
  0xe6   : > { %v450_v58 = vpop.f32.mrf.mxu0 }
  0xe7   : > { %v777_v61 = vshrl.u32 %v4962_v55, 16  ;;  %v4960_v62 = vpack.c.bf16 %v574_v56, %v574_v56  ;;  %v577_v63 = vmax.f32 %v459_v57, 0.0  ;;  %v451_v0 = vadd.f32 %v6118_v42, %v450_v58 }
  0xe8   : > { %v5236_v1 = vpop.f32.mrf.mxu0  ;;  %v780_v5 = vshll.u32 %v4962_v55, 16 }
  0xe9   : > { %v779_v4 = vrot.slane %v777_v61, 7  ;;  %v760_v6 = vshrl.u32 %v4960_v62, 16  ;;  %v4963_v7 = vpack.c.bf16 %v577_v63, %v577_v63  ;;  %v763_v10 = vshll.u32 %v4960_v62, 16  ;;  %v1106_v61 = vld [vmem:[#allocation2 + $0x30] sm:$0xf] }
  0xea   : > { %v575_v11 = vmax.f32 %v451_v0, 0.0  ;;  %v472_v12 = vadd.f32 %v5236_v1, %v6118_v42  ;;  %v463_v13 = vpop.f32.mrf.mxu0 }
  0xeb   : > { %v782_v15 = vor.u32 %v780_v5, %v779_v4  ;;  %v783_v16 = vrot.slane %v779_v4, 4  ;;  %v762_v17 = vrot.slane %v760_v6, 7  ;;  %v785_v18 = vshrl.u32 %v4963_v7, 16 }
  0xec   : > { %v788_v20 = vshll.u32 %v4963_v7, 16  ;;  %v4961_v21 = vpack.c.bf16 %v575_v11, %v575_v11  ;;  %v580_v22 = vmax.f32 %v472_v12, 0.0  ;;  %v464_v23 = vadd.f32 %v6118_v42, %v463_v13  ;;  %v5237_v24 = vpop.f32.mrf.mxu0 }
  0xed   : > { %v1093_v25 = vsel %vm6134_vm8, %v782_v15, %v1092_v9  ;;  %v765_v26 = vor.u32 %v763_v10, %v762_v17  ;;  %v766_v27 = vrot.slane %v762_v17, 4  ;;  %v787_v29 = vrot.slane %v785_v18, 7 }
  0xee   : > { %1094 = vst [vmem:[#allocation2 + $0x18] sm:$0xf] %v1093_v25  ;;  %v768_v32 = vshrl.u32 %v4961_v21, 16  ;;  %v771_v33 = vshll.u32 %v4961_v21, 16  ;;  %v4966_v34 = vpack.c.bf16 %v580_v22, %v580_v22  ;;  %v578_v35 = vmax.f32 %v464_v23, 0.0  ;;  %v466_v36 = vpop.f32.mrf.mxu0 }
  0xef   : > { %v1084_v37 = vsel %vm6134_vm8, %v765_v26, %v1083_v19  ;;  %v790_v38 = vor.u32 %v788_v20, %v787_v29  ;;  %v792_v39 = vrot.slane %v787_v29, 4  ;;  %v475_v43 = vadd.f32 %v5237_v24, %v6118_v42  ;;  %v1110_v25 = vld [vmem:[#allocation2 + $0x38] sm:$0x1] }
  0xf0   : > { %1085 = vst [vmem:[#allocation2 + $0xc] sm:$0xf] %v1084_v37  ;;  %v770_v44 = vrot.slane %v768_v32, 7  ;;  %v811_v45 = vshrl.u32 %v4966_v34, 16  ;;  %v814_v46 = vshll.u32 %v4966_v34, 16  ;;  %v4964_v47 = vpack.c.bf16 %v578_v35, %v578_v35  ;;  %v5240_v48 = vpop.f32.mrf.mxu0 }
  0xf1   : > { %v791_v49 = vsel %vm6146_vm9, %v783_v16, %v790_v38  ;;  %v1097_v50 = vsel %vm6152_vm10, %v792_v39, %v1096_v31  ;;  %v581_v52 = vmax.f32 %v475_v43, 0.0  ;;  %v467_v53 = vadd.f32 %v6118_v42, %v466_v36  ;;  %v1099_v16 = vld [vmem:[#allocation2 + $0x24] sm:$0xf]  ;;  %v1103_v37 = vld [vmem:[#allocation2 + $0x2c] sm:$0x1] }
  0xf2   : > { %1095 = vst [vmem:[#allocation2 + $0x1c] sm:$0xf] %v791_v49  ;;  %1098 = vst [vmem:[#allocation2 + $0x20] sm:$0x1] %v1097_v50  ;;  %v773_v54 = vor.u32 %v771_v33, %v770_v44  ;;  %v775_v55 = vrot.slane %v770_v44, 4  ;;  %v813_v56 = vrot.slane %v811_v45, 7  ;;  %v479_v58 = vpop.f32.mrf.mxu0  ;;  %v488_v1 = vadd.f32 %v5240_v48, %v6118_v42 }
  0xf3   : > { %v794_v57 = vshrl.u32 %v4964_v47, 16  ;;  %v797_v62 = vshll.u32 %v4964_v47, 16  ;;  %v4967_v63 = vpack.c.bf16 %v581_v52, %v581_v52  ;;  %v579_v0 = vmax.f32 %v467_v53, 0.0 }
  0xf4   : > { %v774_v4 = vsel %vm6146_vm9, %v766_v27, %v773_v54  ;;  %v1090_v5 = vsel %vm6152_vm10, %v775_v55, %v1089_v51  ;;  %v816_v6 = vor.u32 %v814_v46, %v813_v56  ;;  %v817_v7 = vrot.slane %v813_v56, 4  ;;  %v5241_v9 = vpop.f32.mrf.mxu0 }
  0xf5   : > { %1086 = vst [vmem:[#allocation2 + $0x10] sm:$0xf] %v774_v4  ;;  %1091 = vst [vmem:[#allocation2 + $0x14] sm:$0x1] %v1090_v5  ;;  %v796_v10 = vrot.slane %v794_v57, 7  ;;  %v819_v11 = vshrl.u32 %v4967_v63, 16  ;;  %v4965_v13 = vpack.c.bf16 %v579_v0, %v579_v0  ;;  %v480_v18 = vadd.f32 %v6118_v42, %v479_v58 }
  0xf6   : > { %v822_v12 = vshll.u32 %v4967_v63, 16  ;;  %v1107_v15 = vsel %vm6134_vm8, %v816_v6, %v1106_v61  ;;  %v584_v17 = vmax.f32 %v488_v1, 0.0  ;;  %v491_v19 = vadd.f32 %v5241_v9, %v6118_v42  ;;  %v482_v20 = vpop.f32.mrf.mxu0  ;;  %v1120_v57 = vld [vmem:[#allocation2 + $0x48] sm:$0xf]  ;;  %v5790_v63 = vld [vmem:[%s7570_s3 + $0x70] sm:$0xff]  }
  0xf7   : > { %1108 = vst [vmem:[#allocation2 + $0x30] sm:$0xf] %v1107_v15  ;;  %v799_v21 = vor.u32 %v797_v62, %v796_v10  ;;  %v800_v22 = vrot.slane %v796_v10, 4  ;;  %v821_v23 = vrot.slane %v819_v11, 7  ;;  %v802_v24 = vshrl.u32 %v4965_v13, 16  ;;  %v5793_v15 = vld [vmem:[%s7570_s3 + $0x1b0] sm:$0xff]  }
  0xf8   : > { %v805_v26 = vshll.u32 %v4965_v13, 16  ;;  %v4970_v27 = vpack.c.bf16 %v584_v17, %v584_v17  ;;  %v582_v29 = vmax.f32 %v480_v18, 0.0  ;;  %v585_v31 = vmax.f32 %v491_v19, 0.0  ;;  %v5244_v32 = vpop.f32.mrf.mxu0  ;;  %v1113_v9 = vld [vmem:[#allocation2 + $0x3c] sm:$0xf] }
  0xf9   : > { %v1100_v33 = vsel %vm6134_vm8, %v799_v21, %v1099_v16  ;;  %v824_v34 = vor.u32 %v822_v12, %v821_v23  ;;  %v826_v35 = vrot.slane %v821_v23, 4  ;;  %v804_v36 = vrot.slane %v802_v24, 7 }
  0xfa   : > { %1101 = vst [vmem:[#allocation2 + $0x24] sm:$0xf] %v1100_v33  ;;  %v845_v38 = vshrl.u32 %v4970_v27, 16  ;;  %v848_v39 = vshll.u32 %v4970_v27, 16  ;;  %v4968_v43 = vpack.c.bf16 %v582_v29, %v582_v29  ;;  %v4971_v44 = vpack.c.bf16 %v585_v31, %v585_v31  ;;  %v495_v45 = vpop.f32.mrf.mxu0 }
  0xfb   : > { %v825_v46 = vsel %vm6146_vm9, %v817_v7, %v824_v34  ;;  %v1111_v47 = vsel %vm6152_vm10, %v826_v35, %v1110_v25  ;;  %v807_v48 = vor.u32 %v805_v26, %v804_v36  ;;  %v809_v49 = vrot.slane %v804_v36, 4  ;;  %v6189_v7 = vld [vmem:[#allocation2 + $0x18] sm:$0xff]   ;;  %v5794_v26 = vld [vmem:[%s7570_s3 + $0x68] sm:$0xff]  }
  0xfc   : > { %1109 = vst [vmem:[#allocation2 + $0x34] sm:$0xf] %v825_v46  ;;  %1112 = vst [vmem:[#allocation2 + $0x38] sm:$0x1] %v1111_v47  ;;  %v847_v50 = vrot.slane %v845_v38, 7  ;;  %v828_v51 = vshrl.u32 %v4968_v43, 16  ;;  %v5245_v54 = vpop.f32.mrf.mxu0  ;;  %v483_v61 = vadd.f32 %v6118_v42, %v482_v20  ;;  %v504_v11 = vadd.f32 %v5244_v32, %v6118_v42 }
  0xfd   : > { %v831_v52 = vshll.u32 %v4968_v43, 16  ;;  %v853_v53 = vshrl.u32 %v4971_v44, 16  ;;  %v808_v55 = vsel %vm6146_vm9, %v800_v22, %v807_v48  ;;  %v1104_v56 = vsel %vm6152_vm10, %v809_v49, %v1103_v37  ;;  %v5787_v62 = vld [vmem:[#allocation2 + $0xc] sm:$0xff]   ;;  %v1117_v37 = vld [vmem:[#allocation2 + $0x44] sm:$0x1] }
  0xfe   : > { %v856_v58 = vshll.u32 %v4971_v44, 16  ;;  %1102 = vst [vmem:[#allocation2 + $0x28] sm:$0xf] %v808_v55  ;;  %1105 = vst [vmem:[#allocation2 + $0x2c] sm:$0x1] %v1104_v56  ;;  %v850_v0 = vor.u32 %v848_v39, %v847_v50  ;;  %v851_v1 = vrot.slane %v847_v50, 4  ;;  %v498_v6 = vpop.f32.mrf.mxu0  ;;  %v496_v12 = vadd.f32 %v6118_v42, %v495_v45  ;;  %5278 = vmatprep.mubr.bf16.mxu1 %v5787_v62 }
  0xff   : > { %v6187_v4 = vrot.slane %v828_v51, 7  ;;  %v855_v5 = vrot.slane %v853_v53, 7  ;;  %v583_v10 = vmax.f32 %v483_v61, 0.0  ;;  %v507_v13 = vadd.f32 %v5245_v54, %v6118_v42  ;;  %5327 = vmatmul.mubr.bf16.vlgmr.msra.gmra.mxu0 %v5787_v62  ;;  %v1124_v20 = vld [vmem:[#allocation2 + $0x50] sm:$0x1]  ;;  %5279 = vmatmul.mubr.bf16.vlgmr.msra.gmra.mxu1 %v6189_v7 }
 0x100   : > { %v1121_v16 = vsel %vm6134_vm8, %v850_v0, %v1120_v57  ;;  %5407 = vmatpush3.bf16.msra.mxu0 %v6106_v40  ;;  %v5248_v21 = vpop.f32.mrf.mxu0  ;;  %v588_v24 = vmax.f32 %v504_v11, 0.0  ;;  %v586_v25 = vmax.f32 %v496_v12, 0.0  ;;  %5330 = vmatprep.mubr.bf16.mxu0 %v6189_v7  ;;  %v499_v31 = vadd.f32 %v6118_v42, %v498_v6  ;;  %v5798_v57 = vld [vmem:[%s7570_s3 + $0x60] sm:$0xff]  }
 0x101   : > { %v833_v17 = vor.u32 %v831_v52, %v6187_v4  ;;  %v834_v18 = vrot.slane %v6187_v4, 4  ;;  %v858_v19 = vor.u32 %v856_v58, %v855_v5  ;;  %1122 = vst [vmem:[#allocation2 + $0x48] sm:$0xf] %v1121_v16  ;;  %v860_v22 = vrot.slane %v855_v5, 4  ;;  %5408 = vmatprep.subr.bf16.mxu0 %v5790_v63  ;;  %5359 = vmatpush3.bf16.msra.mxu1 %v6112_v41  ;;  %v5797_v41 = vld [vmem:[%s7570_s3 + $0x1a8] sm:$0xff]  }
 0x102   : > { %v4969_v23 = vpack.c.bf16 %v583_v10, %v583_v10  ;;  %v589_v29 = vmax.f32 %v507_v13, 0.0  ;;  %v511_v32 = vpop.f32.mrf.mxu0  ;;  %v4974_v36 = vpack.c.bf16 %v588_v24, %v588_v24  ;;  %5360 = vmatprep.subr.bf16.mxu1 %v5793_v15  ;;  %v4972_v38 = vpack.c.bf16 %v586_v25, %v586_v25 }
 0x103   : > { %v1114_v27 = vsel %vm6134_vm8, %v833_v17, %v1113_v9  ;;  %v859_v40 = vsel %vm6146_vm9, %v851_v1, %v858_v19  ;;  %v1125_v33 = vsel %vm6152_vm10, %v860_v22, %v1124_v20  ;;  %v587_v43 = vmax.f32 %v499_v31, 0.0  ;;  %v6224_v56 = vld [vmem:[#allocation2 + $0x30] sm:$0xff]   ;;  %v5801_v1 = vld [vmem:[%s7570_s3 + $0x1a0] sm:$0xff]   ;;  %v1138_v19 = vld [vmem:[#allocation2 + $0x68] sm:$0x1] }
 0x104   : > { %1115 = vst [vmem:[#allocation2 + $0x3c] sm:$0xf] %v1114_v27  ;;  %1123 = vst [vmem:[#allocation2 + $0x4c] sm:$0xf] %v859_v40  ;;  %v836_v34 = vshrl.u32 %v4969_v23, 16  ;;  %v839_v35 = vshll.u32 %v4969_v23, 16  ;;  %v4975_v39 = vpack.c.bf16 %v589_v29, %v589_v29  ;;  %v520_v44 = vadd.f32 %v5248_v21, %v6118_v42  ;;  %v6216_v45 = vpop.f32.mrf.mxu0  ;;  %5409 = vmatpush3.bf16.msra.mxu0 %v5790_v63 }
 0x105   : > { %1126 = vst [vmem:[#allocation2 + $0x50] sm:$0x1] %v1125_v33  ;;  %v879_v47 = vshrl.u32 %v4974_v36, 16  ;;  %v882_v48 = vshll.u32 %v4974_v36, 16  ;;  %v512_v49 = vadd.f32 %v6118_v42, %v511_v32  ;;  %v6222_v50 = vld [vmem:[#allocation2 + $0x24] sm:$0xff]   ;;  %5410 = vmatprep.subr.bf16.mxu0 %v5794_v26  ;;  %v862_v51 = vshrl.u32 %v4972_v38, 16  ;;  %5361 = vmatpush3.bf16.msra.mxu1 %v5793_v15 }
 0x106   : > { %v838_v46 = vrot.slane %v836_v34, 7  ;;  %v865_v52 = vshll.u32 %v4972_v38, 16  ;;  %v887_v53 = vshrl.u32 %v4975_v39, 16  ;;  %v890_v54 = vshll.u32 %v4975_v39, 16  ;;  %v514_v55 = vpop.f32.mrf.mxu0  ;;  %v1134_v63 = vld [vmem:[#allocation2 + $0x60] sm:$0xf]  ;;  %5282 = vmatprep.mubr.bf16.mxu1 %v6222_v50  ;;  %5362 = vmatprep.subr.bf16.mxu1 %v5797_v41 }
 0x107   : > { %v881_v62 = vrot.slane %v879_v47, 7  ;;  %v4973_v0 = vpack.c.bf16 %v587_v43, %v587_v43  ;;  %5331 = vmatmul.mubr.bf16.gmra.mxu0 %v6222_v50  ;;  %v6234_v5 = vrot.slane %v862_v51, 7  ;;  %v592_v9 = vmax.f32 %v520_v44, 0.0  ;;  %5283 = vmatmul.mubr.bf16.gmra.mxu1 %v6224_v56  ;;  %v1127_v17 = vld [vmem:[#allocation2 + $0x54] sm:$0xf]  ;;  %v5802_v20 = vld [vmem:[%s7570_s3 + $0x58] sm:$0xff]  }
 0x108   : > { %v841_v58 = vor.u32 %v839_v35, %v838_v46  ;;  %v843_v61 = vrot.slane %v838_v46, 4  ;;  %v889_v6 = vrot.slane %v887_v53, 7  ;;  %v590_v10 = vmax.f32 %v512_v49, 0.0  ;;  %5334 = vmatprep.mubr.bf16.mxu0 %v6224_v56  ;;  %v5252_v11 = vpop.f32.mrf.mxu0  ;;  %5411 = vmatpush3.bf16.msra.mxu0 %v5794_v26  ;;  %v5805_v40 = vld [vmem:[%s7570_s3 + $0x198] sm:$0xff]  }
 0x109   : > { %v884_v15 = vor.u32 %v882_v48, %v881_v62  ;;  %v885_v16 = vrot.slane %v881_v62, 4  ;;  %v867_v4 = vor.u32 %v865_v52, %v6234_v5  ;;  %v868_v21 = vrot.slane %v6234_v5, 4  ;;  %5412 = vmatprep.subr.bf16.mxu0 %v5798_v57  ;;  %5363 = vmatpush3.bf16.msra.mxu1 %v5797_v41  ;;  %v1131_v39 = vld [vmem:[#allocation2 + $0x5c] sm:$0x1]  ;;  %v5806_v48 = vld [vmem:[%s7570_s3 + $0x50] sm:$0xff]  }
 0x10a   : > { %v842_v12 = vsel %vm6146_vm9, %v834_v18, %v841_v58  ;;  %v1118_v13 = vsel %vm6152_vm10, %v843_v61, %v1117_v37  ;;  %v892_v18 = vor.u32 %v890_v54, %v889_v6  ;;  %v894_v22 = vrot.slane %v889_v6, 4  ;;  %v527_v23 = vpop.f32.mrf.mxu0  ;;  %5364 = vmatprep.subr.bf16.mxu1 %v5801_v1 }
 0x10b   : > { %1116 = vst [vmem:[#allocation2 + $0x40] sm:$0xf] %v842_v12  ;;  %1119 = vst [vmem:[#allocation2 + $0x44] sm:$0x1] %v1118_v13  ;;  %v1135_v24 = vsel %vm6134_vm8, %v884_v15, %v1134_v63  ;;  %v870_v25 = vshrl.u32 %v4973_v0, 16  ;;  %v873_v26 = vshll.u32 %v4973_v0, 16  ;;  %v4978_v27 = vpack.c.bf16 %v592_v9, %v592_v9 }
 0x10c   : > { %1136 = vst [vmem:[#allocation2 + $0x60] sm:$0xf] %v1135_v24  ;;  %v1128_v29 = vsel %vm6134_vm8, %v867_v4, %v1127_v17  ;;  %v893_v31 = vsel %vm6146_vm9, %v885_v16, %v892_v18  ;;  %v1139_v32 = vsel %vm6152_vm10, %v894_v22, %v1138_v19  ;;  %v4976_v33 = vpack.c.bf16 %v590_v10, %v590_v10  ;;  %v5253_v34 = vpop.f32.mrf.mxu0  ;;  %v5809_v9 = vld [vmem:[%s7570_s3 + $0x190] sm:$0xff]   ;;  %v6285_v15 = vld [vmem:[#allocation2 + $0x48] sm:$0xff]  }
 0x10d   : > { %1129 = vst [vmem:[#allocation2 + $0x54] sm:$0xf] %v1128_v29  ;;  %1137 = vst [vmem:[#allocation2 + $0x64] sm:$0xf] %v893_v31  ;;  %v872_v35 = vrot.slane %v870_v25, 7  ;;  %v913_v36 = vshrl.u32 %v4978_v27, 16  ;;  %v523_v38 = vadd.f32 %v6216_v45, %v6118_v42  ;;  %5413 = vmatpush3.bf16.msra.mxu0 %v5798_v57  ;;  %v515_v41 = vadd.f32 %v6118_v42, %v514_v55 }
 0x10e   : > { %1140 = vst [vmem:[#allocation2 + $0x68] sm:$0x1] %v1139_v32  ;;  %v916_v37 = vshll.u32 %v4978_v27, 16  ;;  %v896_v43 = vshrl.u32 %v4976_v33, 16  ;;  %v899_v44 = vshll.u32 %v4976_v33, 16  ;;  %v536_v46 = vadd.f32 %v5252_v11, %v6118_v42  ;;  %v530_v47 = vpop.f32.mrf.mxu0  ;;  %5414 = vmatprep.subr.bf16.mxu0 %v5802_v20  ;;  %5365 = vmatpush3.bf16.msra.mxu1 %v5801_v1  ;;  %v5810_v17 = vld [vmem:[%s7570_s3 + $0x48] sm:$0xff]  }
 0x10f   : > { %v875_v49 = vor.u32 %v873_v26, %v872_v35  ;;  %v877_v51 = vrot.slane %v872_v35, 4  ;;  %v6267_v52 = vrot.slane %v913_v36, 7  ;;  %v1148_v45 = vld [vmem:[#allocation2 + $0x78] sm:$0xf]  ;;  %v593_v53 = vmax.f32 %v523_v38, 0.0  ;;  %5366 = vmatprep.subr.bf16.mxu1 %v5805_v40  ;;  %v6300_v18 = vld [vmem:[%s7570_s3 + $0x188] sm:$0xff]  }
 0x110   : > { %v6269_v54 = vrot.slane %v896_v43, 7  ;;  %v1141_v57 = vld [vmem:[#allocation2 + $0x6c] sm:$0xf]  ;;  %v591_v55 = vmax.f32 %v515_v41, 0.0  ;;  %v596_v58 = vmax.f32 %v536_v46, 0.0  ;;  %v528_v61 = vadd.f32 %v6118_v42, %v527_v23  ;;  %v5256_v62 = vpop.f32.mrf.mxu0 }
 0x111   : > { %v876_v63 = vsel %vm6146_vm9, %v868_v21, %v875_v49  ;;  %v1132_v0 = vsel %vm6152_vm10, %v877_v51, %v1131_v39  ;;  %v918_v1 = vor.u32 %v916_v37, %v6267_v52  ;;  %v919_v5 = vrot.slane %v6267_v52, 4  ;;  %5415 = vmatpush3.bf16.msra.mxu0 %v5802_v20  ;;  %v1152_v33 = vld [vmem:[#allocation2 + $0x80] sm:$0x1]  ;;  %v1145_v38 = vld [vmem:[#allocation2 + $0x74] sm:$0x1]  ;;  %v6340_v52 = vld [vmem:[%s7570_s3 + $0x1f8] sm:$0xff]  }
 0x112   : > { %v6278_v6 = vld [vmem:[#allocation2 + $0x3c] sm:$0xff]   ;;  %1130 = vst [vmem:[#allocation2 + $0x58] sm:$0xf] %v876_v63  ;;  %1133 = vst [vmem:[#allocation2 + $0x5c] sm:$0x1] %v1132_v0  ;;  %v901_v10 = vor.u32 %v899_v44, %v6269_v54  ;;  %v902_v11 = vrot.slane %v6269_v54, 4  ;;  %v4979_v12 = vpack.c.bf16 %v593_v53, %v593_v53  ;;  %v4977_v13 = vpack.c.bf16 %v591_v55, %v591_v55  ;;  %v6287_v16 = vpop.f32.mrf.mxu0 }
 0x113   : > { %5416 = vmatprep.subr.bf16.mxu0 %v5806_v48  ;;  %5367 = vmatpush3.bf16.msra.mxu1 %v5805_v40  ;;  %v1149_v19 = vsel %vm6134_vm8, %v918_v1, %v1148_v45  ;;  %v4982_v20 = vpack.c.bf16 %v596_v58, %v596_v58  ;;  %v594_v4 = vmax.f32 %v528_v61, 0.0  ;;  %v539_v21 = vadd.f32 %v5253_v34, %v6118_v42  ;;  %v5814_v37 = vld [vmem:[%s7570_s3 + $0x40] sm:$0xff]   ;;  %v1162_v45 = vld [vmem:[#allocation2 + $0x90] sm:$0xf] }
 0x114   : > { %5286 = vmatprep.mubr.bf16.mxu1 %v6278_v6  ;;  %5335 = vmatmul.mubr.bf16.gmra.mxu0 %v6278_v6  ;;  %1150 = vst [vmem:[#allocation2 + $0x78] sm:$0xf] %v1149_v19  ;;  %v1142_v22 = vsel %vm6134_vm8, %v901_v10, %v1141_v57  ;;  %v921_v23 = vshrl.u32 %v4979_v12, 16  ;;  %v924_v24 = vshll.u32 %v4979_v12, 16  ;;  %v904_v25 = vshrl.u32 %v4977_v13, 16  ;;  %v6306_v26 = vpop.f32.mrf.mxu0  ;;  %v5817_v10 = vld [vmem:[%s7570_s3 + $0x180] sm:$0xff]  }
 0x115   : > { %5287 = vmatmul.mubr.bf16.gmra.mxu1 %v6285_v15  ;;  %5338 = vmatprep.mubr.bf16.mxu0 %v6285_v15  ;;  %1143 = vst [vmem:[#allocation2 + $0x6c] sm:$0xf] %v1142_v22  ;;  %v907_v27 = vshll.u32 %v4977_v13, 16  ;;  %v947_v40 = vshrl.u32 %v4982_v20, 16  ;;  %v950_v29 = vshll.u32 %v4982_v20, 16  ;;  %v4980_v31 = vpack.c.bf16 %v594_v4, %v594_v4 }
 0x116   : > { %5417 = vmatpush3.bf16.msra.mxu0 %v5806_v48  ;;  %5368 = vmatprep.subr.bf16.mxu1 %v5809_v9  ;;  %v923_v32 = vrot.slane %v921_v23, 7  ;;  %v906_v34 = vrot.slane %v904_v25, 7  ;;  %v597_v35 = vmax.f32 %v539_v21, 0.0  ;;  %v531_v36 = vadd.f32 %v6118_v42, %v530_v47  ;;  %v546_v46 = vpop.f32.mrf.mxu0  ;;  %v1155_v53 = vld [vmem:[#allocation2 + $0x84] sm:$0xf] }
 0x117   : > { %5418 = vmatprep.subr.bf16.mxu0 %v5810_v17  ;;  %5369 = vmatpush3.bf16.msra.mxu1 %v5809_v9  ;;  %v6312_v39 = vrot.slane %v947_v40, 7  ;;  %v930_v43 = vshrl.u32 %v4980_v31, 16  ;;  %v933_v44 = vshll.u32 %v4980_v31, 16  ;;  %v552_v41 = vadd.f32 %v5256_v62, %v6118_v42  ;;  %v6332_v9 = vld [vmem:[#allocation2 + $0x60] sm:$0xff]  }
 0x118   : > { %5370 = vmatprep.subr.bf16.mxu1 %v6300_v18  ;;  %v926_v48 = vor.u32 %v924_v24, %v923_v32  ;;  %v928_v49 = vrot.slane %v923_v32, 4  ;;  %v909_v51 = vor.u32 %v907_v27, %v906_v34  ;;  %v911_v47 = vrot.slane %v906_v34, 4  ;;  %v1166_v27 = vld [vmem:[#allocation2 + $0x98] sm:$0x1] }
 0x119   : > { %v952_v54 = vor.u32 %v950_v29, %v6312_v39  ;;  %v953_v57 = vrot.slane %v6312_v39, 4  ;;  %v6318_v55 = vrot.slane %v930_v43, 7  ;;  %v4983_v58 = vpack.c.bf16 %v597_v35, %v597_v35  ;;  %v6320_v61 = vld [vmem:[#allocation2 + $0x54] sm:$0xff]  }
 0x11a   : > { %5419 = vmatpush3.bf16.msra.mxu0 %v5810_v17  ;;  %v927_v62 = vsel %vm6146_vm9, %v919_v5, %v926_v48  ;;  %v1153_v63 = vsel %vm6152_vm10, %v928_v49, %v1152_v33  ;;  %v910_v0 = vsel %vm6146_vm9, %v902_v11, %v909_v51  ;;  %v1146_v1 = vsel %vm6152_vm10, %v911_v47, %v1145_v38  ;;  %v5260_v17 = vpop.f32.mrf.mxu0  ;;  %v6363_v32 = vld [vmem:[%s7570_s3 + $0x138] sm:$0xff]  }
 0x11b   : > { %5420 = vmatprep.subr.bf16.mxu0 %v5814_v37  ;;  %1151 = vst [vmem:[#allocation2 + $0x7c] sm:$0xf] %v927_v62  ;;  %1154 = vst [vmem:[#allocation2 + $0x80] sm:$0x1] %v1153_v63  ;;  %v1163_v5 = vsel %vm6134_vm8, %v952_v54, %v1162_v45  ;;  %v935_v11 = vor.u32 %v933_v44, %v6318_v55  ;;  %v936_v12 = vrot.slane %v6318_v55, 4  ;;  %v955_v13 = vshrl.u32 %v4983_v58, 16 }
 0x11c   : > { %1144 = vst [vmem:[#allocation2 + $0x70] sm:$0xf] %v910_v0  ;;  %1147 = vst [vmem:[#allocation2 + $0x74] sm:$0x1] %v1146_v1  ;;  %5290 = vmatprep.mubr.bf16.mxu1 %v6320_v61  ;;  %5339 = vmatmul.mubr.bf16.gmra.mxu0 %v6320_v61  ;;  %v958_v19 = vshll.u32 %v4983_v58, 16  ;;  %v595_v20 = vmax.f32 %v531_v36, 0.0  ;;  %v544_v21 = vadd.f32 %v6118_v42, %v6287_v16  ;;  %v559_v39 = vpop.f32.mrf.mxu0 }
 0x11d   : > { %1164 = vst [vmem:[#allocation2 + $0x90] sm:$0xf] %v1163_v5  ;;  %v600_v4 = vmax.f32 %v552_v41, 0.0  ;;  %5291 = vmatmul.mubr.bf16.gmra.mxu1 %v6332_v9  ;;  %5342 = vmatprep.mubr.bf16.mxu0 %v6332_v9  ;;  %v1156_v22 = vsel %vm6134_vm8, %v935_v11, %v1155_v53  ;;  %v957_v23 = vrot.slane %v955_v13, 7  ;;  %v555_v24 = vadd.f32 %v6306_v26, %v6118_v42  ;;  %v1159_v41 = vld [vmem:[#allocation2 + $0x8c] sm:$0x1] }
 0x11e   : > { %v547_v25 = vadd.f32 %v6118_v42, %v546_v46  ;;  %5371 = vmatpush3.bf16.msra.mxu1 %v6300_v18  ;;  %5421 = vmatpush3.bf16.msra.mxu0 %v5814_v37  ;;  %1157 = vst [vmem:[#allocation2 + $0x84] sm:$0xf] %v1156_v22  ;;  %v4981_v40 = vpack.c.bf16 %v595_v20, %v595_v20  ;;  %v598_v29 = vmax.f32 %v544_v21, 0.0  ;;  %v1176_v46 = vld [vmem:[#allocation2 + $0xa8] sm:$0xf]  ;;  %v5261_v13 = vpop.f32.mrf.mxu0 }
 0x11f   : > { %v4986_v16 = vpack.c.bf16 %v600_v4, %v600_v4  ;;  %v568_v31 = vadd.f32 %v5260_v17, %v6118_v42  ;;  %5372 = vmatprep.subr.bf16.mxu1 %v5817_v10  ;;  %5502 = vmatprep.subr.bf16.mxu0 %v6340_v52  ;;  %v960_v26 = vor.u32 %v958_v19, %v957_v23  ;;  %v962_v33 = vrot.slane %v957_v23, 4 }
 0x120   : > { %v601_v34 = vmax.f32 %v555_v24, 0.0  ;;  %v599_v18 = vmax.f32 %v547_v25, 0.0  ;;  %v938_v35 = vshrl.u32 %v4981_v40, 16  ;;  %v941_v36 = vshll.u32 %v4981_v40, 16  ;;  %v1169_v24 = vld [vmem:[#allocation2 + $0x9c] sm:$0xf] }
 0x121   : > { %v981_v37 = vshrl.u32 %v4986_v16, 16  ;;  %v984_v38 = vshll.u32 %v4986_v16, 16  ;;  %v961_v43 = vsel %vm6146_vm9, %v953_v57, %v960_v26  ;;  %v1167_v44 = vsel %vm6152_vm10, %v962_v33, %v1166_v27  ;;  %v1180_v25 = vld [vmem:[#allocation2 + $0xb0] sm:$0x1] }
 0x122   : > { %v4984_v48 = vpack.c.bf16 %v598_v29, %v598_v29  ;;  %v4987_v49 = vpack.c.bf16 %v601_v34, %v601_v34  ;;  %5373 = vmatpush3.bf16.msra.mxu1 %v5817_v10  ;;  %1165 = vst [vmem:[#allocation2 + $0x94] sm:$0xf] %v961_v43  ;;  %1168 = vst [vmem:[#allocation2 + $0x98] sm:$0x1] %v1167_v44  ;;  %v940_v51 = vrot.slane %v938_v35, 7  ;;  %v604_v53 = vmax.f32 %v568_v31, 0.0  ;;  %v562_v34 = vpop.f32.mrf.mxu0 }
 0x123   : > { %v983_v47 = vrot.slane %v981_v37, 7  ;;  %v4985_v45 = vpack.c.bf16 %v599_v18, %v599_v18  ;;  %v6369_v54 = vld [vmem:[#allocation2 + $0x6c] sm:$0xff]   ;;  %5454 = vmatprep.subr.bf16.mxu1 %v6363_v32  ;;  %v6374_v10 = vld [vmem:[#allocation2 + $0x78] sm:$0xff]   ;;  %v560_v33 = vadd.f32 %v6118_v42, %v559_v39  ;;  %v571_v43 = vadd.f32 %v5261_v13, %v6118_v42  ;;  %v2052_v44 = vld [vmem:[#allocation2 + $0x8] sm:$0x1] }
 0x124   : > { %v964_v58 = vshrl.u32 %v4984_v48, 16  ;;  %v967_v57 = vshll.u32 %v4984_v48, 16  ;;  %v989_v62 = vshrl.u32 %v4987_v49, 16  ;;  %v992_v63 = vshll.u32 %v4987_v49, 16  ;;  %5294 = vmatprep.mubr.bf16.mxu1 %v6369_v54  ;;  %5343 = vmatmul.mubr.bf16.gmra.mxu0 %v6369_v54  ;;  %v2053_v18 = vld [vmem:[#allocation2 + $0xc] sm:$0xf] }
 0x125   : > { %v943_v0 = vor.u32 %v941_v36, %v940_v51  ;;  %v945_v1 = vrot.slane %v940_v51, 4  ;;  %v986_v5 = vor.u32 %v984_v38, %v983_v47  ;;  %v987_v11 = vrot.slane %v983_v47, 4  ;;  %5295 = vmatmul.mubr.bf16.gmra.mxu1 %v6374_v10  ;;  %5346 = vmatprep.mubr.bf16.mxu0 %v6374_v10  ;;  %v1173_v38 = vld [vmem:[#allocation2 + $0xa4] sm:$0x1]  ;;  %v1190_v49 = vld [vmem:[#allocation2 + $0xc0] sm:$0xf] }
 0x126   : > { %v966_v17 = vrot.slane %v964_v58, 7  ;;  %v991_v19 = vrot.slane %v989_v62, 7  ;;  %v972_v20 = vshrl.u32 %v4985_v45, 16  ;;  %v975_v4 = vshll.u32 %v4985_v45, 16 }
 0x127   : > { %v944_v21 = vsel %vm6146_vm9, %v936_v12, %v943_v0  ;;  %v1160_v22 = vsel %vm6152_vm10, %v945_v1, %v1159_v41  ;;  %v1177_v23 = vsel %vm6134_vm8, %v986_v5, %v1176_v46  ;;  %v4990_v27 = vpack.c.bf16 %v604_v53, %v604_v53 }
 0x128   : > { %1158 = vst [vmem:[#allocation2 + $0x88] sm:$0xf] %v944_v21  ;;  %1161 = vst [vmem:[#allocation2 + $0x8c] sm:$0x1] %v1160_v22  ;;  %v969_v40 = vor.u32 %v967_v57, %v966_v17  ;;  %v970_v16 = vrot.slane %v966_v17, 4  ;;  %v994_v55 = vor.u32 %v992_v63, %v991_v19  ;;  %v996_v29 = vrot.slane %v991_v19, 4 }
 0x129   : > { %1178 = vst [vmem:[#allocation2 + $0xa8] sm:$0xf] %v1177_v23  ;;  %v974_v12 = vrot.slane %v972_v20, 7  ;;  %v1015_v31 = vshrl.u32 %v4990_v27, 16  ;;  %v1018_v26 = vshll.u32 %v4990_v27, 16  ;;  %v602_v48 = vmax.f32 %v560_v33, 0.0 }
 0x12a   : > { %v1170_v35 = vsel %vm6134_vm8, %v969_v40, %v1169_v24  ;;  %v995_v36 = vsel %vm6146_vm9, %v987_v11, %v994_v55  ;;  %v1181_v37 = vsel %vm6152_vm10, %v996_v29, %v1180_v25  ;;  %v605_v51 = vmax.f32 %v571_v43, 0.0  ;;  %v2054_v11 = vld [vmem:[#allocation2 + $0x10] sm:$0xf]  ;;  %v1194_v24 = vld [vmem:[#allocation2 + $0xc8] sm:$0x1] }
 0x12b   : > { %1171 = vst [vmem:[#allocation2 + $0x9c] sm:$0xf] %v1170_v35  ;;  %1179 = vst [vmem:[#allocation2 + $0xac] sm:$0xf] %v995_v36  ;;  %v977_v41 = vor.u32 %v975_v4, %v974_v12  ;;  %v979_v39 = vrot.slane %v974_v12, 4  ;;  %v1017_v46 = vrot.slane %v1015_v31, 7  ;;  %v563_v47 = vadd.f32 %v6118_v42, %v562_v34 }
 0x12c   : > { %1182 = vst [vmem:[#allocation2 + $0xb0] sm:$0x1] %v1181_v37  ;;  %v2132_v45 = vshrl.u32 %v2053_v18, 16  ;;  %v2135_v53 = vshll.u32 %v2053_v18, 16  ;;  %v2127_v63 = vshll.u32 %v2052_v44, 16  ;;  %v4988_v0 = vpack.c.bf16 %v602_v48, %v602_v48  ;;  %v6412_v23 = vld [vmem:[#allocation2 + $0x90] sm:$0xff]  }
 0x12d   : > { %v978_v58 = vsel %vm6146_vm9, %v970_v16, %v977_v41  ;;  %v1174_v57 = vsel %vm6152_vm10, %v979_v39, %v1173_v38  ;;  %v1020_v62 = vor.u32 %v1018_v26, %v1017_v46  ;;  %v4991_v1 = vpack.c.bf16 %v605_v51, %v605_v51  ;;  %v2056_v26 = vld [vmem:[#allocation2 + $0x18] sm:$0xf]  ;;  %v6426_v36 = vld [vmem:[#allocation2 + $0x1c] sm:$0xf] }
 0x12e   : > { %1172 = vst [vmem:[#allocation2 + $0xa0] sm:$0xf] %v978_v58  ;;  %1175 = vst [vmem:[#allocation2 + $0xa4] sm:$0x1] %v1174_v57  ;;  %v603_v5 = vmax.f32 %v563_v47, 0.0  ;;  %v6402_v42 = vrot.slane %v2114_v14, 4  ;;  %v2124_v19 = vor.u32 %v6130_v3, %v6128_v2 }
 0x12f   : > { %v1191_v13 = vsel %vm6134_vm8, %v1020_v62, %v1190_v49  ;;  %v6406_v17 = vld [vmem:[#allocation2 + $0x84] sm:$0xff]   ;;  %v6410_v20 = vrot.slane %v2132_v45, 4  ;;  %v998_v4 = vshrl.u32 %v4988_v0, 16  ;;  %v1001_v21 = vshll.u32 %v4988_v0, 16  ;;  %v1187_v49 = vld [vmem:[#allocation2 + $0xbc] sm:$0x1] }
 0x130   : > { %1192 = vst [vmem:[#allocation2 + $0xc0] sm:$0xf] %v1191_v13  ;;  %v1023_v22 = vshrl.u32 %v4991_v1, 16  ;;  %v6414_v59 = vrot.slane %v2135_v53, 5  ;;  %v1026_v14 = vshll.u32 %v4991_v1, 16  ;;  %v4989_v25 = vpack.c.bf16 %v603_v5, %v603_v5  ;;  %5298 = vmatprep.mubr.bf16.mxu1 %v6406_v17  ;;  %5347 = vmatmul.mubr.bf16.gmra.mxu0 %v6406_v17 }
 0x131   : > { %v2141_v27 = vshll.u32 %v2054_v11, 16  ;;  %v2145_v3 = vshrl.u32 %v2054_v11, 16  ;;  %v1000_v40 = vrot.slane %v998_v4, 7  ;;  %5299 = vmatmul.mubr.bf16.gmra.mxu1 %v6412_v23  ;;  %5350 = vmatprep.mubr.bf16.mxu0 %v6412_v23  ;;  %v6420_v29 = vrot.slane %v2124_v19, 4  ;;  %v2055_v58 = vld [vmem:[#allocation2 + $0x14] sm:$0x1] }
 0x132   : > { %v1025_v16 = vrot.slane %v1023_v22, 7  ;;  %v1006_v55 = vshrl.u32 %v4989_v25, 16  ;;  %v6422_v12 = vrot.slane %v2127_v63, 5  ;;  %v1021_v33 = vrot.slane %v1017_v46, 4  ;;  %v6440_v57 = vld [vmem:[#allocation2 + $0xa8] sm:$0xff]  }
 0x133   : > { %v6424_v31 = vrot.slane %v2141_v27, 5  ;;  %v1003_v34 = vor.u32 %v1001_v21, %v1000_v40  ;;  %v1009_v38 = vshll.u32 %v4989_v25, 16  ;;  %v2138_v44 = vor.u32 %v6414_v59, %v6410_v20  ;;  %v2059_v1 = vld [vmem:[#allocation2 + $0x24] sm:$0xf]  ;;  %v2058_v19 = vld [vmem:[#allocation2 + $0x20] sm:$0x1] }
 0x134   : > { %v1028_v18 = vor.u32 %v1026_v14, %v1025_v16  ;;  %v1030_v35 = vrot.slane %v1025_v16, 4  ;;  %v1008_v37 = vrot.slane %v1006_v55, 7  ;;  %v2147_v41 = vrot.slane %v2145_v3, 4  ;;  %v2060_v22 = vld [vmem:[#allocation2 + $0x28] sm:$0xf] }
 0x135   : > { %v6428_v43 = vld [vmem:[#allocation2 + $0x9c] sm:$0xff]   ;;  %v1184_v39 = vsel %vm6134_vm8, %v1003_v34, %v1183_v60  ;;  %v2156_v51 = vshrl.u32 %v2056_v26, 16  ;;  %v1004_v47 = vrot.slane %v1000_v40, 4  ;;  %v2159_v62 = vshll.u32 %v2056_v26, 16  ;;  %v2063_v26 = vld [vmem:[#allocation2 + $0x34] sm:$0xf] }
 0x136   : > { %v1029_v48 = vsel %vm6146_vm9, %v1021_v33, %v1028_v18  ;;  %v1195_v46 = vsel %vm6152_vm10, %v1030_v35, %v1194_v24  ;;  %1185 = vst [vmem:[#allocation2 + $0xb4] sm:$0xf] %v1184_v39  ;;  %v1011_v45 = vor.u32 %v1009_v38, %v1008_v37  ;;  %v1013_v53 = vrot.slane %v1008_v37, 4  ;;  %5302 = vmatprep.mubr.bf16.mxu1 %v6428_v43  ;;  %v2061_v37 = vld [vmem:[#allocation2 + $0x2c] sm:$0x1] }
 0x137   : > { %1193 = vst [vmem:[#allocation2 + $0xc4] sm:$0xf] %v1029_v48  ;;  %1196 = vst [vmem:[#allocation2 + $0xc8] sm:$0x1] %v1195_v46  ;;  %v2148_v8 = vor.u32 %v2147_v41, %v6424_v31  ;;  %v2165_v63 = vshll.u32 %v6426_v36, 16  ;;  %v2169_v0 = vshrl.u32 %v6426_v36, 16  ;;  %v2120_v28 = vsel %vm6451_vm14, %v6402_v42, %v6128_v2 }
 0x138   : > { %v1012_v5 = vsel %vm6146_vm9, %v1004_v47, %v1011_v45  ;;  %v1188_v11 = vsel %vm6152_vm10, %v1013_v53, %v1187_v49  ;;  %5351 = vmatmul.mubr.bf16.gmra.mxu0 %v6428_v43  ;;  %v2158_v20 = vrot.slane %v2156_v51, 4  ;;  %v2151_v30 = vshll.u32 %v2055_v58, 16  ;;  %v2062_v42 = vld [vmem:[#allocation2 + $0x30] sm:$0xf]  ;;  %v2065_v51 = vld [vmem:[#allocation2 + $0x3c] sm:$0xf] }
 0x139   : > { %1186 = vst [vmem:[#allocation2 + $0xb8] sm:$0xf] %v1012_v5  ;;  %1189 = vst [vmem:[#allocation2 + $0xbc] sm:$0x1] %v1188_v11  ;;  %5303 = vmatmul.mubr.bf16.gmra.mxu1 %v6440_v57  ;;  %5354 = vmatprep.mubr.bf16.mxu0 %v6440_v57  ;;  %v2161_v4 = vrot.slane %v2159_v62, 5  ;;  %v7573_v21 = vrot.slane %v6426_v36, 5  ;;  %v2130_v59 = vsel %vm6451_vm14, %v6420_v29, %v6422_v12 }
 0x13a   : > { %v2139_v60 = vrot.slane %v2138_v44, 4  ;;  %v2149_v14 = vrot.slane %v2148_v8, 4  ;;  %v2180_v24 = vshrl.u32 %v2059_v1, 16  ;;  %v6466_v25 = vrot.slane %v2165_v63, 5 }
 0x13b   : > { %v2171_v27 = vrot.slane %v2169_v0, 4  ;;  %v3472_v3 = vrot.slane %v7573_v21, 4  ;;  %v3473_v2 = vrot.slane %v2058_v19, 5  ;;  %v2162_v40 = vor.u32 %v2161_v4, %v2158_v20  ;;  %v2064_v20 = vld [vmem:[#allocation2 + $0x38] sm:$0x1] }
 0x13c   : > { %v2183_v55 = vshll.u32 %v2059_v1, 16  ;;  %v2189_v29 = vshll.u32 %v2060_v22, 16  ;;  %v2193_v12 = vshrl.u32 %v2060_v22, 16  ;;  %v2153_v33 = vrot.slane %v2151_v30, 5  ;;  %v6697_v21 = vld [vmem:[#allocation2 + $0xa0] sm:$0xf] }
 0x13d   : > { %v6478_v34 = vsel %vm6472_vm0, %v3472_v3, %v3473_v2  ;;  %v2182_v18 = vrot.slane %v2180_v24, 4  ;;  %v2175_v35 = vshll.u32 %v2058_v19, 16  ;;  %v4773_v39 = vcombine.low %v2120_v28, %v2130_v59  ;;  %v2068_v2 = vld [vmem:[#allocation2 + $0x48] sm:$0xf] }
 0x13e   : > { %v2185_v38 = vrot.slane %v2183_v55, 5  ;;  %v6480_v44 = vrot.slane %v2189_v29, 5  ;;  %v2195_v41 = vrot.slane %v2193_v12, 4  ;;  %v2172_v48 = vor.u32 %v2171_v27, %v6466_v25  ;;  %v6488_v62 = vld [vmem:[#allocation2 + $0xc0] sm:$0xff]  }
 0x13f   : > { %v2204_v46 = vshrl.u32 %v2062_v42, 16  ;;  %v2207_v49 = vshll.u32 %v2062_v42, 16  ;;  %v2154_v45 = vsel %vm6451_vm14, %v2149_v14, %v2153_v33  ;;  %v2163_v53 = vrot.slane %v2162_v40, 4  ;;  %v6500_v14 = vld [vmem:[#allocation2 + $0x40] sm:$0xf] }
 0x140   : > { %v6483_v47 = vld [vmem:[#allocation2 + $0xb4] sm:$0xff]   ;;  %v2196_v58 = vor.u32 %v2195_v41, %v6480_v44  ;;  %v2213_v8 = vshll.u32 %v2063_v26, 16  ;;  %v2186_v63 = vor.u32 %v2185_v38, %v2182_v18  ;;  %v2199_v0 = vshll.u32 %v2061_v37, 16 }
 0x141   : > { %v2206_v1 = vrot.slane %v2204_v46, 4  ;;  %v2209_v5 = vrot.slane %v2207_v49, 5  ;;  %5306 = vmatprep.mubr.bf16.mxu1 %v6483_v47  ;;  %5355 = vmatmul.mubr.bf16.gmra.mxu0 %v6483_v47  ;;  %v2144_v11 = vsel %vm6451_vm14, %v2139_v60, %v6424_v31  ;;  %v2177_v19 = vrot.slane %v2175_v35, 5  ;;  %v5820_v49 = vld [vmem:[%s7570_s3 + $0x1f0] sm:$0xff]  }
 0x142   : > { %v6495_v28 = vrot.slane %v2213_v8, 5  ;;  %v2217_v30 = vshrl.u32 %v2063_v26, 16  ;;  %5307 = vmatmul.mubr.bf16.gmra.mxu1 %v6488_v62  ;;  %5422 = vmatprep.mubr.bf16.mxu0 %v4773_v39  ;;  %v6498_v4 = vcombine.low %v2144_v11, %v2154_v45  ;;  %v2173_v22 = vrot.slane %v2172_v48, 4 }
 0x143   : > { %v2197_v59 = vrot.slane %v2196_v58, 4  ;;  %v2228_v24 = vshrl.u32 %v2065_v51, 16  ;;  %5374 = vmatprep.mubr.bf16.mxu1 %v6189_v7  ;;  %v2168_v31 = vsel %vm6451_vm14, %v2163_v53, %v6466_v25  ;;  %v2210_v60 = vor.u32 %v2209_v5, %v2206_v1  ;;  %v6509_v7 = vld [vmem:[#allocation2 + $0x4c] sm:$0xf]  ;;  %v6530_v5 = vld [vmem:[#allocation2 + $0x44] sm:$0x1] }
 0x144   : > { %v2219_v27 = vrot.slane %v2217_v30, 4  ;;  %v2231_v3 = vshll.u32 %v2065_v51, 16  ;;  %v2187_v42 = vrot.slane %v2186_v63, 4  ;;  %v2201_v40 = vrot.slane %v2199_v0, 5  ;;  %v5821_v51 = vld [vmem:[%s7570_s3 + $0x130] sm:$0xff]  }
 0x145   : > { %v2223_v55 = vshll.u32 %v2064_v20, 16  ;;  %v2230_v29 = vrot.slane %v2228_v24, 4  ;;  %v2237_v33 = vshll.u32 %v6500_v14, 16  ;;  %v2241_v18 = vshrl.u32 %v6500_v14, 16  ;;  %v6542_v24 = vld [vmem:[#allocation2 + $0x58] sm:$0xf] }
 0x146   : > { %v2220_v12 = vor.u32 %v2219_v27, %v6495_v28  ;;  %v2233_v26 = vrot.slane %v2231_v3, 5  ;;  %v2178_v25 = vsel %vm6451_vm14, %v2173_v22, %v2177_v19  ;;  %v2202_v35 = vsel %vm6451_vm14, %v2197_v59, %v2201_v40  ;;  %v2071_v19 = vld [vmem:[#allocation2 + $0x54] sm:$0xf]  ;;  %v6538_v22 = vld [vmem:[#allocation2 + $0x50] sm:$0x1] }
 0x147   : > { %v2252_v37 = vshrl.u32 %v2068_v2, 16  ;;  %v2255_v38 = vshll.u32 %v2068_v2, 16  ;;  %v2211_v41 = vrot.slane %v2210_v60, 4  ;;  %v6515_v48 = vrot.slane %v2237_v33, 5 }
 0x148   : > { %v2221_v39 = vrot.slane %v2220_v12, 4  ;;  %v2243_v46 = vrot.slane %v2241_v18, 4  ;;  %v2234_v45 = vor.u32 %v2233_v26, %v2230_v29  ;;  %v2261_v8 = vshll.u32 %v6509_v7, 16  ;;  %v6565_v12 = vld [vmem:[#allocation2 + $0x64] sm:$0xf] }
 0x149   : > { %v2254_v53 = vrot.slane %v2252_v37, 4  ;;  %v2257_v58 = vrot.slane %v2255_v38, 5  ;;  %5423 = vmatmul.mubr.bf16.vlgmr.msra.gmra.mxu0 %v6498_v4  ;;  %v6525_v63 = vcombine.low %v2168_v31, %v2178_v25  ;;  %v2192_v0 = vsel %vm6451_vm14, %v2187_v42, %v6480_v44  ;;  %v5822_v44 = vld [vmem:[%s7570_s3 + $0x1e8] sm:$0xff]   ;;  %v2074_v42 = vld [vmem:[#allocation2 + $0x60] sm:$0xf] }
 0x14a   : > { %v2225_v1 = vrot.slane %v2223_v55, 5  ;;  %v2265_v11 = vshrl.u32 %v6509_v7, 16  ;;  %5503 = vmatpush3.bf16.msra.mxu0 %v6340_v52  ;;  %5375 = vmatmul.mubr.bf16.vlgmr.msra.gmra.mxu1 %v6222_v50  ;;  %v6535_v20 = vcombine.low %v2192_v0, %v2202_v35  ;;  %v2244_v30 = vor.u32 %v2243_v46, %v6515_v48  ;;  %v5823_v55 = vld [vmem:[%s7570_s3 + $0x128] sm:$0xff]   ;;  %v6569_v38 = vld [vmem:[#allocation2 + $0x5c] sm:$0x1]  ;;  %v5824_v46 = vld [vmem:[%s7570_s3 + $0x1e0] sm:$0xff]  }
 0x14b   : > { %v6540_v59 = vrot.slane %v2261_v8, 5  ;;  %5426 = vmatprep.mubr.bf16.mxu0 %v6525_v63  ;;  %5378 = vmatprep.mubr.bf16.mxu1 %v6224_v56  ;;  %v2216_v52 = vsel %vm6451_vm14, %v2211_v41, %v6495_v28  ;;  %v2258_v31 = vor.u32 %v2257_v58, %v2254_v53  ;;  %v6555_v27 = vrot.slane %v2234_v45, 4 }
 0x14c   : > { %v2226_v50 = vsel %vm6451_vm14, %v2221_v39, %v2225_v1  ;;  %v2267_v60 = vrot.slane %v2265_v11, 4  ;;  %5504 = vmatprep.subr.bf16.mxu0 %v5820_v49  ;;  %5455 = vmatpush3.bf16.msra.mxu1 %v6363_v32  ;;  %v2247_v56 = vshll.u32 %v6530_v5, 16  ;;  %v2276_v3 = vshrl.u32 %v2071_v19, 16 }
 0x14d   : > { %v2279_v2 = vshll.u32 %v2071_v19, 16  ;;  %5456 = vmatprep.subr.bf16.mxu1 %v5821_v51  ;;  %v2271_v40 = vshll.u32 %v6538_v22, 16  ;;  %v2285_v29 = vshll.u32 %v6542_v24, 16  ;;  %v2289_v32 = vshrl.u32 %v6542_v24, 16  ;;  %v2077_v19 = vld [vmem:[#allocation2 + $0x6c] sm:$0xf] }
 0x14e   : > { %v2268_v28 = vor.u32 %v2267_v60, %v6540_v59  ;;  %5505 = vmatpush3.bf16.msra.mxu0 %v5820_v49  ;;  %v6567_v26 = vcombine.low %v2216_v52, %v2226_v50  ;;  %v2245_v33 = vrot.slane %v2244_v30, 4  ;;  %v2278_v18 = vrot.slane %v2276_v3, 4 }
 0x14f   : > { %v2281_v25 = vrot.slane %v2279_v2, 5  ;;  %5506 = vmatprep.subr.bf16.mxu0 %v5822_v44  ;;  %v2259_v35 = vrot.slane %v2258_v31, 4  ;;  %v6571_v41 = vrot.slane %v2285_v29, 5  ;;  %v2291_v39 = vrot.slane %v2289_v32, 4  ;;  %v6593_v2 = vld [vmem:[#allocation2 + $0x70] sm:$0xf] }
 0x150   : > { %v2269_v37 = vrot.slane %v2268_v28, 4  ;;  %5457 = vmatpush3.bf16.msra.mxu1 %v5821_v51  ;;  %v2300_v49 = vshrl.u32 %v2074_v42, 16  ;;  %v2303_v53 = vshll.u32 %v2074_v42, 16  ;;  %v2309_v58 = vshll.u32 %v6565_v12, 16  ;;  %v5825_v51 = vld [vmem:[%s7570_s3 + $0x120] sm:$0xff]   ;;  %v5826_v28 = vld [vmem:[%s7570_s3 + $0x1d8] sm:$0xff]  }
 0x151   : > { %v2282_v45 = vor.u32 %v2281_v25, %v2278_v18  ;;  %5427 = vmatmul.mubr.bf16.gmra.mxu0 %v6535_v20  ;;  %v2249_v8 = vrot.slane %v2247_v56, 5  ;;  %v2273_v0 = vrot.slane %v2271_v40, 5  ;;  %5458 = vmatprep.subr.bf16.mxu1 %v5823_v55  ;;  %v2292_v1 = vor.u32 %v2291_v39, %v6571_v41 }
 0x152   : > { %v2313_v11 = vshrl.u32 %v6565_v12, 16  ;;  %5379 = vmatmul.mubr.bf16.gmra.mxu1 %v6278_v6  ;;  %5430 = vmatprep.mubr.bf16.mxu0 %v6567_v26  ;;  %v2295_v30 = vshll.u32 %v6569_v38, 16  ;;  %v2302_v52 = vrot.slane %v2300_v49, 4  ;;  %v2305_v50 = vrot.slane %v2303_v53, 5 }
 0x153   : > { %5382 = vmatprep.mubr.bf16.mxu1 %v6285_v15  ;;  %v2250_v31 = vsel %vm6451_vm14, %v2245_v33, %v2249_v8  ;;  %5507 = vmatpush3.bf16.msra.mxu0 %v5822_v44  ;;  %v2274_v60 = vsel %vm6451_vm14, %v2269_v37, %v2273_v0  ;;  %v6591_v56 = vrot.slane %v2309_v58, 5  ;;  %v2240_v6 = vsel %vm6451_vm14, %v6555_v27, %v6515_v48  ;;  %v6602_v44 = vld [vmem:[#allocation2 + $0x68] sm:$0x1]  ;;  %v2080_v27 = vld [vmem:[#allocation2 + $0x78] sm:$0xf] }
 0x154   : > { %v2315_v3 = vrot.slane %v2313_v11, 4  ;;  %v2264_v15 = vsel %vm6451_vm14, %v2259_v35, %v6540_v59  ;;  %5508 = vmatprep.subr.bf16.mxu0 %v5824_v46  ;;  %v2283_v42 = vrot.slane %v2282_v45, 4  ;;  %5459 = vmatpush3.bf16.msra.mxu1 %v5823_v55  ;;  %v2324_v40 = vshrl.u32 %v2077_v19, 16  ;;  %v5827_v59 = vld [vmem:[%s7570_s3 + $0x118] sm:$0xff]   ;;  %v6615_v35 = vld [vmem:[#allocation2 + $0x74] sm:$0x1] }
 0x155   : > { %v2293_v29 = vrot.slane %v2292_v1, 4  ;;  %v2306_v32 = vor.u32 %v2305_v50, %v2302_v52  ;;  %5460 = vmatprep.subr.bf16.mxu1 %v5825_v51  ;;  %v2327_v48 = vshll.u32 %v2077_v19, 16  ;;  %v6611_v18 = vcombine.low %v2240_v6, %v2250_v31  ;;  %v6620_v58 = vld [vmem:[#allocation2 + $0x7c] sm:$0xf] }
 0x156   : > { %v2316_v33 = vor.u32 %v2315_v3, %v6591_v56  ;;  %v6613_v55 = vcombine.low %v2264_v15, %v2274_v60  ;;  %v2297_v25 = vrot.slane %v2295_v30, 5  ;;  %v2333_v37 = vshll.u32 %v6593_v2, 16 }
 0x157   : > { %5509 = vmatpush3.bf16.msra.mxu0 %v5824_v46  ;;  %v2319_v39 = vshll.u32 %v6602_v44, 16  ;;  %v2326_v45 = vrot.slane %v2324_v40, 4  ;;  %v2329_v49 = vrot.slane %v2327_v48, 5  ;;  %v2337_v53 = vshrl.u32 %v6593_v2, 16  ;;  %v5828_v46 = vld [vmem:[%s7570_s3 + $0x1d0] sm:$0xff]  }
 0x158   : > { %v2288_v8 = vsel %vm6451_vm14, %v2283_v42, %v6571_v41  ;;  %5510 = vmatprep.subr.bf16.mxu0 %v5826_v28  ;;  %v6625_v0 = vrot.slane %v2333_v37, 5  ;;  %5461 = vmatpush3.bf16.msra.mxu1 %v5825_v51  ;;  %v2348_v1 = vshrl.u32 %v2080_v27, 16  ;;  %v2351_v11 = vshll.u32 %v2080_v27, 16  ;;  %v2083_v41 = vld [vmem:[#allocation2 + $0x84] sm:$0xf]  ;;  %v5829_v51 = vld [vmem:[%s7570_s3 + $0x110] sm:$0xff]  }
 0x159   : > { %5431 = vmatmul.mubr.bf16.gmra.mxu0 %v6611_v18  ;;  %v2298_v19 = vsel %vm6451_vm14, %v2293_v29, %v2297_v25  ;;  %v2307_v30 = vrot.slane %v2306_v32, 4  ;;  %v2317_v52 = vrot.slane %v2316_v33, 4  ;;  %v2339_v50 = vrot.slane %v2337_v53, 4  ;;  %5462 = vmatprep.subr.bf16.mxu1 %v5827_v59  ;;  %v6643_v32 = vld [vmem:[#allocation2 + $0x88] sm:$0xf] }
 0x15a   : > { %5383 = vmatmul.mubr.bf16.gmra.mxu1 %v6320_v61  ;;  %5434 = vmatprep.mubr.bf16.mxu0 %v6613_v55  ;;  %v2343_v31 = vshll.u32 %v6615_v35, 16  ;;  %v2350_v60 = vrot.slane %v2348_v1, 4  ;;  %v2353_v3 = vrot.slane %v2351_v11, 5  ;;  %v2357_v6 = vshll.u32 %v6620_v58, 16  ;;  %v6647_v33 = vld [vmem:[#allocation2 + $0x80] sm:$0x1] }
 0x15b   : > { %5386 = vmatprep.mubr.bf16.mxu1 %v6332_v9  ;;  %v2321_v15 = vrot.slane %v2319_v39, 5  ;;  %v2330_v42 = vor.u32 %v2329_v49, %v2326_v45  ;;  %v2340_v40 = vor.u32 %v2339_v50, %v6625_v0  ;;  %5511 = vmatpush3.bf16.msra.mxu0 %v5826_v28  ;;  %v2361_v29 = vshrl.u32 %v6620_v58, 16  ;;  %v5830_v9 = vld [vmem:[%s7570_s3 + $0x1c8] sm:$0xff]   ;;  %v2086_v1 = vld [vmem:[#allocation2 + $0x90] sm:$0xf] }
 0x15c   : > { %v6645_v61 = vcombine.low %v2288_v8, %v2298_v19  ;;  %v6649_v48 = vrot.slane %v2357_v6, 5  ;;  %5512 = vmatprep.subr.bf16.mxu0 %v5828_v46  ;;  %v2372_v27 = vshrl.u32 %v2083_v41, 16  ;;  %5463 = vmatpush3.bf16.msra.mxu1 %v5827_v59  ;;  %v2312_v28 = vsel %vm6451_vm14, %v2307_v30, %v6591_v56  ;;  %v5831_v45 = vld [vmem:[%s7570_s3 + $0x108] sm:$0xff]  }
 0x15d   : > { %v2322_v25 = vsel %vm6451_vm14, %v2317_v52, %v2321_v15  ;;  %v2354_v37 = vor.u32 %v2353_v3, %v2350_v60  ;;  %v2363_v39 = vrot.slane %v2361_v29, 4  ;;  %5464 = vmatprep.subr.bf16.mxu1 %v5829_v51  ;;  %v2341_v49 = vrot.slane %v2340_v40, 4  ;;  %v6666_v52 = vld [vmem:[#allocation2 + $0x94] sm:$0xf] }
 0x15e   : > { %7594 = vst [vmem:[#allocation6_spill] sm:$0xff] %v6645_v61  ;;  %v2345_v59 = vrot.slane %v2343_v31, 5  ;;  %v2375_v53 = vshll.u32 %v2083_v41, 16  ;;  %v2381_v8 = vshll.u32 %v6643_v32, 16  ;;  %v2331_v11 = vrot.slane %v2330_v42, 4  ;;  %v5832_v41 = vld [vmem:[%s7570_s3 + $0x1c0] sm:$0xff]  }
 0x15f   : > { %v2364_v19 = vor.u32 %v2363_v39, %v6649_v48  ;;  %v2367_v56 = vshll.u32 %v6647_v33, 16  ;;  %v2385_v30 = vshrl.u32 %v6643_v32, 16  ;;  %5513 = vmatpush3.bf16.msra.mxu0 %v5828_v46  ;;  %v6668_v50 = vcombine.low %v2312_v28, %v2322_v25  ;;  %v5834_v31 = vld [vmem:[%s7570_s3 + $0x100] sm:$0xff]   ;;  %v6679_v42 = vld [vmem:[#allocation2 + $0x8c] sm:$0x1] }
 0x160   : > { %v2374_v60 = vrot.slane %v2372_v27, 4  ;;  %v2377_v3 = vrot.slane %v2375_v53, 5  ;;  %v6670_v6 = vrot.slane %v2381_v8, 5  ;;  %5514 = vmatprep.subr.bf16.mxu0 %v5830_v9  ;;  %5465 = vmatpush3.bf16.msra.mxu1 %v5829_v51  ;;  %v2355_v46 = vrot.slane %v2354_v37, 4 }
 0x161   : > { %7595 = vst [vmem:[#allocation7_spill] sm:$0xff] %v6668_v50  ;;  %5435 = vmatmul.mubr.bf16.gmra.mxu0 %v6645_v61  ;;  %v2365_v15 = vrot.slane %v2364_v19, 4  ;;  %v2387_v40 = vrot.slane %v2385_v30, 4  ;;  %v2396_v29 = vshrl.u32 %v2086_v1, 16  ;;  %5466 = vmatprep.subr.bf16.mxu1 %v5831_v45  ;;  %v2346_v51 = vsel %vm6451_vm14, %v2341_v49, %v2345_v59  ;;  %v2089_v19 = vld [vmem:[#allocation2 + $0x9c] sm:$0xf] }
 0x162   : > { %5387 = vmatmul.mubr.bf16.gmra.mxu1 %v6369_v54  ;;  %5438 = vmatprep.mubr.bf16.mxu0 %v6668_v50  ;;  %v2399_v27 = vshll.u32 %v2086_v1, 16  ;;  %v2405_v28 = vshll.u32 %v6666_v52, 16  ;;  %v2409_v25 = vshrl.u32 %v6666_v52, 16  ;;  %v2336_v37 = vsel %vm6451_vm14, %v2331_v11, %v6625_v0  ;;  %v6692_v54 = vld [vmem:[#allocation2 + $0x98] sm:$0x1] }
 0x163   : > { %5390 = vmatprep.mubr.bf16.mxu1 %v6374_v10  ;;  %v2369_v39 = vrot.slane %v2367_v56, 5  ;;  %v2388_v53 = vor.u32 %v2387_v40, %v6670_v6  ;;  %v2398_v8 = vrot.slane %v2396_v29, 4  ;;  %5515 = vmatpush3.bf16.msra.mxu0 %v5830_v9  ;;  %v2378_v49 = vor.u32 %v2377_v3, %v2374_v60  ;;  %v6702_v10 = vld [vmem:[%s7570_s3 + $0x178] sm:$0xff]  }
 0x164   : > { %v2391_v59 = vshll.u32 %v6679_v42, 16  ;;  %v2401_v1 = vrot.slane %v2399_v27, 5  ;;  %v6695_v30 = vrot.slane %v2405_v28, 5  ;;  %5516 = vmatprep.subr.bf16.mxu0 %v5832_v41  ;;  %5467 = vmatpush3.bf16.msra.mxu1 %v5831_v45  ;;  %v6704_v0 = vcombine.low %v2336_v37, %v2346_v51  ;;  %v6714_v45 = vld [vmem:[%s7570_s3 + $0xb8] sm:$0xff]  }
 0x165   : > { %v2360_v9 = vsel %vm6451_vm14, %v2355_v46, %v6649_v48  ;;  %v2370_v11 = vsel %vm6451_vm14, %v2365_v15, %v2369_v39  ;;  %v2411_v56 = vrot.slane %v2409_v25, 4  ;;  %5468 = vmatprep.subr.bf16.mxu1 %v5834_v31  ;;  %v2415_v3 = vshll.u32 %v6692_v54, 16  ;;  %v2092_v15 = vld [vmem:[#allocation2 + $0xa8] sm:$0xf]  ;;  %v6722_v39 = vld [vmem:[#allocation2 + $0xac] sm:$0xf] }
 0x166   : > { %7596 = vst [vmem:[#allocation8_spill] sm:$0xff] %v6704_v0  ;;  %v2402_v60 = vor.u32 %v2401_v1, %v2398_v8  ;;  %v2420_v40 = vshrl.u32 %v2089_v19, 16  ;;  %v2423_v29 = vshll.u32 %v2089_v19, 16  ;;  %v2389_v51 = vrot.slane %v2388_v53, 4 }
 0x167   : > { %v2412_v27 = vor.u32 %v2411_v56, %v6695_v30  ;;  %v2429_v48 = vshll.u32 %v6697_v21, 16  ;;  %v2433_v46 = vshrl.u32 %v6697_v21, 16  ;;  %5517 = vmatpush3.bf16.msra.mxu0 %v5832_v41  ;;  %v6720_v28 = vcombine.low %v2360_v9, %v2370_v11  ;;  %v6729_v41 = vld [vmem:[#allocation2 + $0xa4] sm:$0x1] }
 0x168   : > { %v2379_v25 = vrot.slane %v2378_v49, 4  ;;  %v2393_v37 = vrot.slane %v2391_v59, 5  ;;  %5469 = vmatpush3.bf16.msra.mxu1 %v5834_v31  ;;  %5598 = vmatprep.subr.bf16.mxu0 %v6702_v10  ;;  %v2403_v53 = vrot.slane %v2402_v60, 4  ;;  %v2422_v49 = vrot.slane %v2420_v40, 4 }
 0x169   : > { %7597 = vst [vmem:[#allocation9_spill] sm:$0xff] %v6720_v28  ;;  %5439 = vmatmul.mubr.bf16.gmra.mxu0 %v6704_v0  ;;  %v2413_v8 = vrot.slane %v2412_v27, 4  ;;  %v2431_v19 = vrot.slane %v2429_v48, 5  ;;  %v2435_v1 = vrot.slane %v2433_v46, 4  ;;  %5550 = vmatprep.subr.bf16.mxu1 %v6714_v45  ;;  %v2425_v59 = vrot.slane %v2423_v29, 5 }
 0x16a   : > { %5391 = vmatmul.mubr.bf16.gmra.mxu1 %v6406_v17  ;;  %5442 = vmatprep.mubr.bf16.mxu0 %v6720_v28  ;;  %v2444_v9 = vshrl.u32 %v2092_v15, 16  ;;  %v2447_v31 = vshll.u32 %v2092_v15, 16  ;;  %v2394_v11 = vsel %vm6451_vm14, %v2389_v51, %v2393_v37  ;;  %v2417_v56 = vrot.slane %v2415_v3, 5  ;;  %v2095_v27 = vld [vmem:[#allocation2 + $0xb4] sm:$0xf] }
 0x16b   : > { %5394 = vmatprep.mubr.bf16.mxu1 %v6412_v23  ;;  %v2453_v60 = vshll.u32 %v6722_v39, 16  ;;  %v2384_v17 = vsel %vm6451_vm14, %v2379_v25, %v6670_v6  ;;  %v2436_v48 = vor.u32 %v2435_v1, %v2431_v19  ;;  %v6738_v46 = vld [vmem:[#allocation2 + $0xb0] sm:$0x1]  ;;  %v2439_v23 = vshll.u32 %v6729_v41, 16  ;;  %v6744_v51 = vld [vmem:[#allocation2 + $0xb8] sm:$0xf] }
 0x16c   : > { %v2446_v40 = vrot.slane %v2444_v9, 4  ;;  %v2449_v29 = vrot.slane %v2447_v31, 5  ;;  %v2418_v15 = vsel %vm6451_vm14, %v2413_v8, %v2417_v56  ;;  %v2457_v3 = vshrl.u32 %v6722_v39, 16 }
 0x16d   : > { %v2455_v28 = vrot.slane %v2453_v60, 5  ;;  %v6746_v37 = vcombine.low %v2384_v17, %v2394_v11  ;;  %v2408_v6 = vsel %vm6451_vm14, %v2403_v53, %v6695_v30  ;;  %v2426_v25 = vor.u32 %v2425_v59, %v2422_v49 }
 0x16e   : > { %v2468_v1 = vshrl.u32 %v2095_v27, 16  ;;  %v2450_v9 = vor.u32 %v2449_v29, %v2446_v40  ;;  %v2459_v31 = vrot.slane %v2457_v3, 4  ;;  %v2463_v0 = vshll.u32 %v6738_v46, 16  ;;  %v6760_v29 = vld [vmem:[#allocation2 + $0xbc] sm:$0x1] }
 0x16f   : > { %v2471_v8 = vshll.u32 %v2095_v27, 16  ;;  %v6752_v56 = vcombine.low %v2408_v6, %v2418_v15  ;;  %v2437_v60 = vrot.slane %v2436_v48, 4  ;;  %v2477_v50 = vshll.u32 %v6744_v51, 16 }
 0x170   : > { %v2441_v11 = vrot.slane %v2439_v23, 5  ;;  %v2460_v17 = vor.u32 %v2459_v31, %v2455_v28  ;;  %v2481_v61 = vshrl.u32 %v6744_v51, 16  ;;  %v2427_v30 = vrot.slane %v2426_v25, 4 }
 0x171   : > { %5443 = vmatmul.mubr.bf16.gmra.mxu0 %v6746_v37  ;;  %v2470_v53 = vrot.slane %v2468_v1, 4  ;;  %v2473_v49 = vrot.slane %v2471_v8, 5  ;;  %v2479_v59 = vrot.slane %v2477_v50, 5  ;;  %v2451_v27 = vrot.slane %v2450_v9, 4  ;;  %v3387_v8 = vld [vmem:[#allocation2 + $0x18] sm:$0xe] }
 0x172   : > { %5395 = vmatmul.mubr.bf16.gmra.mxu1 %v6428_v43  ;;  %5446 = vmatprep.mubr.bf16.mxu0 %v6752_v56  ;;  %v2461_v48 = vrot.slane %v2460_v17, 4  ;;  %v2465_v40 = vrot.slane %v2463_v0, 5  ;;  %v2483_v15 = vrot.slane %v2481_v61, 4  ;;  %v2442_v23 = vsel %vm6451_vm14, %v2437_v60, %v2441_v11  ;;  %v5833_v60 = vld [vmem:[#allocation2 + $0xcc] sm:$0xff]  }
 0x173   : > { %5398 = vmatprep.mubr.bf16.mxu1 %v6440_v57  ;;  %v2432_v6 = vsel %vm6451_vm14, %v2427_v30, %v2431_v19  ;;  %v2474_v25 = vor.u32 %v2473_v49, %v2470_v53  ;;  %v2487_v50 = vshll.u32 %v6760_v29, 16  ;;  %v2456_v0 = vsel %vm6451_vm14, %v2451_v27, %v2455_v28  ;;  %v3390_v53 = vld [vmem:[#allocation2 + $0x3c] sm:$0xe]  ;;  %v3391_v49 = vld [vmem:[#allocation2 + $0x48] sm:$0xe] }
 0x174   : > { %v2466_v43 = vsel %vm6451_vm14, %v2461_v48, %v2465_v40  ;;  %v2484_v3 = vor.u32 %v2483_v15, %v2479_v59  ;;  %v6769_v57 = vcombine.low %v2432_v6, %v2442_v23  ;;  %v4849_v17 = vrot.slane %v3387_v8, 9  ;;  %v3392_v40 = vld [vmem:[#allocation2 + $0x54] sm:$0xe]  ;;  %v3395_v8 = vld [vmem:[#allocation2 + $0x78] sm:$0xe] }
 0x175   : > { %v6773_v1 = vcombine.low %v2456_v0, %v2466_v43  ;;  %v2475_v9 = vrot.slane %v2474_v25, 4  ;;  %v2489_v31 = vrot.slane %v2487_v50, 5  ;;  %v3501_v27 = vrot.slane %v6538_v22, 5  ;;  %v5837_v22 = vld [vmem:[%s7570_s3 + $0x170] sm:$0xff]  }
 0x176   : > { %v2485_v61 = vrot.slane %v2484_v3, 4  ;;  %v3515_v48 = vrot.slane %v6602_v44, 5  ;;  %v3529_v15 = vrot.slane %v6647_v33, 5  ;;  %v3543_v23 = vrot.slane %v6692_v54, 5  ;;  %v3393_v3 = vld [vmem:[#allocation2 + $0x60] sm:$0xe] }
 0x177   : > { %v2480_v28 = vsel %vm6451_vm14, %v2475_v9, %v2479_v59  ;;  %v3491_v59 = vrot.slane %v6500_v14, 5  ;;  %v4852_v43 = vrot.slane %v3390_v53, 9  ;;  %v3505_v14 = vrot.slane %v6542_v24, 5  ;;  %v3401_v54 = vld [vmem:[#allocation2 + $0xc0] sm:$0xe] }
 0x178   : > { %v2490_v19 = vsel %vm6451_vm14, %v2485_v61, %v2489_v31  ;;  %v4854_v50 = vrot.slane %v3392_v40, 9  ;;  %v3512_v0 = vrot.slane %v6565_v12, 5  ;;  %v3394_v61 = vld [vmem:[#allocation2 + $0x6c] sm:$0xe]  ;;  %v3508_v31 = vrot.slane %v6569_v38, 5 }
 0x179   : > { %5447 = vmatmul.mubr.bf16.gmra.mxu0 %v6769_v57  ;;  %v6783_v11 = vcombine.low %v2480_v28, %v2490_v19  ;;  %v3493_v6 = vrot.slane %v3491_v59, 4  ;;  %v4855_v19 = vrot.slane %v3393_v3, 9  ;;  %v5839_v38 = vld [vmem:[%s7570_s3 + $0x168] sm:$0xff]   ;;  %v3519_v53 = vrot.slane %v6593_v2, 5 }
 0x17a   : > { %5399 = vmatmul.mubr.bf16.gmra.mxu1 %v6483_v47  ;;  %5450 = vmatprep.mubr.bf16.mxu0 %v6773_v1  ;;  %v7598_v47 = vrot.slane %v6426_v36, 5  ;;  %v3498_v36 = vrot.slane %v6509_v7, 5  ;;  %v3492_v7 = vsel %vm6472_vm0, %v4852_v43, %v3491_v59  ;;  %v3522_v59 = vrot.slane %v6615_v35, 5  ;;  %v6848_v3 = vld [vmem:[#allocation2 + $0xc8] sm:$0x1] }
 0x17b   : > { %5402 = vmatprep.mubr.bf16.mxu1 %v6488_v62  ;;  %v3521_v43 = vrot.slane %v3519_v53, 4 }
 0x17c   : > { %v3471_v30 = vsel %vm6472_vm0, %v4849_v17, %v7598_v47  ;;  %v3500_v25 = vrot.slane %v3498_v36, 4  ;;  %v3507_v17 = vrot.slane %v3505_v14, 4  ;;  %v3396_v47 = vld [vmem:[#allocation2 + $0x84] sm:$0xe] }
 0x17d   : > { %v6792_v62 = vcombine.low %v3471_v30, %v6478_v34  ;;  %v4853_v34 = vrot.slane %v3391_v49, 9  ;;  %v4856_v30 = vrot.slane %v3394_v61, 9  ;;  %v3398_v61 = vld [vmem:[#allocation2 + $0x9c] sm:$0xe] }
 0x17e   : > { %v3502_v9 = vsel %vm6472_vm0, %v3500_v25, %v3501_v27  ;;  %v3509_v49 = vsel %vm6472_vm0, %v3507_v17, %v3508_v31  ;;  %v3526_v27 = vrot.slane %v6620_v58, 5  ;;  %v3523_v25 = vsel %vm6472_vm0, %v3521_v43, %v3522_v59 }
 0x17f   : > { %v3499_v44 = vsel %vm6472_vm0, %v4853_v34, %v3498_v36  ;;  %v5840_v36 = vld [vmem:[%s7570_s3 + $0xa8] sm:$0xff]   ;;  %v3397_v34 = vld [vmem:[#allocation2 + $0x90] sm:$0xe]  ;;  %v3520_v58 = vsel %vm6472_vm0, %v4856_v30, %v3519_v53  ;;  %v3547_v31 = vrot.slane %v6697_v21, 5  ;;  %v5843_v21 = vld [vmem:[%s7570_s3 + $0x158] sm:$0xff]   ;;  %v3561_v30 = vrot.slane %v6744_v51, 5 }
 0x180   : > { %v6824_v28 = vcombine.low %v3499_v44, %v3502_v9  ;;  %v6864_v44 = vcombine.low %v3520_v58, %v3523_v25  ;;  %v7599_v25 = vld [vmem:[#allocation6_spill] sm:$0xff] }
 0x181   : > { %5451 = vmatmul.mubr.bf16.gmra.mxu0 %v6783_v11 }
 0x182   : > { %5403 = vmatmul.mubr.bf16.gmra.mxu1 %v5833_v60  ;;  %5518 = vmatprep.mubr.bf16.mxu0 %v6525_v63  ;;  %v3506_v60 = vsel %vm6472_vm0, %v4854_v50, %v3505_v14  ;;  %v3536_v14 = vrot.slane %v6679_v42, 5  ;;  %v3896_v42 = vrot.slane %v6848_v3, 5 }
 0x183   : > { %5470 = vmatprep.mubr.bf16.mxu1 %v6498_v4  ;;  %v3494_v4 = vrot.slane %v6530_v5, 5  ;;  %v5838_v5 = vld [vmem:[%s7570_s3 + $0xb0] sm:$0xff]   ;;  %v6844_v40 = vcombine.low %v3506_v60, %v3509_v49  ;;  %v6888_v60 = vld [vmem:[#allocation2 + $0xc4] sm:$0xf] }
 0x184   : > { %v3893_v51 = vrot.slane %v6888_v60, 5 }
 0x185   : > { %v3495_v24 = vsel %vm6472_vm0, %v3493_v6, %v3494_v4  ;;  %v3528_v6 = vrot.slane %v3526_v27, 4  ;;  %v3533_v4 = vrot.slane %v6643_v32, 5 }
 0x186   : > { %v6822_v12 = vcombine.low %v3492_v7, %v3495_v24  ;;  %v5841_v7 = vld [vmem:[%s7570_s3 + $0x160] sm:$0xff]   ;;  %v3557_v24 = vrot.slane %v6738_v46, 5 }
 0x187   : > { %v3530_v32 = vsel %vm6472_vm0, %v3528_v6, %v3529_v15  ;;  %v3535_v50 = vrot.slane %v3533_v4, 4 }
 0x189   : > { %5519 = vmatmul.mubr.bf16.vlgmr.msra.gmra.mxu0 %v6535_v20  ;;  %v3537_v46 = vsel %vm6472_vm0, %v3535_v50, %v3536_v14 }
 0x18a   : > { %5599 = vmatpush3.bf16.msra.mxu0 %v6702_v10  ;;  %5471 = vmatmul.mubr.bf16.vlgmr.msra.gmra.mxu1 %v6525_v63  ;;  %v3513_v63 = vsel %vm6472_vm0, %v4855_v19, %v3512_v0  ;;  %v3514_v10 = vrot.slane %v3512_v0, 4  ;;  %v4859_v0 = vrot.slane %v3397_v34, 9  ;;  %v3399_v19 = vld [vmem:[#allocation2 + $0xa8] sm:$0xe]  ;;  %v5845_v34 = vld [vmem:[%s7570_s3 + $0x150] sm:$0xff]  }
 0x18b   : > { %5522 = vmatprep.mubr.bf16.mxu0 %v6567_v26  ;;  %5474 = vmatprep.mubr.bf16.mxu1 %v6535_v20  ;;  %v4857_v20 = vrot.slane %v3395_v8, 9  ;;  %v3400_v8 = vld [vmem:[#allocation2 + $0xb4] sm:$0xe]  ;;  %v4861_v53 = vrot.slane %v3399_v19, 9 }
 0x18c   : > { %5600 = vmatprep.subr.bf16.mxu0 %v5837_v22  ;;  %5551 = vmatpush3.bf16.msra.mxu1 %v6714_v45  ;;  %v3516_v2 = vsel %vm6472_vm0, %v3514_v10, %v3515_v48  ;;  %v4858_v45 = vrot.slane %v3396_v47, 9  ;;  %v4860_v47 = vrot.slane %v3398_v61, 9  ;;  %v3550_v10 = vrot.slane %v6729_v41, 5  ;;  %v5849_v61 = vld [vmem:[%s7570_s3 + $0x140] sm:$0xff]  }
 0x18d   : > { %5552 = vmatprep.subr.bf16.mxu1 %v5838_v5  ;;  %v6850_v35 = vcombine.low %v3513_v63, %v3516_v2  ;;  %v3527_v48 = vsel %vm6472_vm0, %v4857_v20, %v3526_v27  ;;  %v3554_v63 = vrot.slane %v6722_v39, 5  ;;  %v4862_v59 = vrot.slane %v3400_v8, 9  ;;  %v2101_v8 = vld [vmem:[#allocation2 + $0xcc] sm:$0xf] }
 0x18e   : > { %5601 = vmatpush3.bf16.msra.mxu0 %v5837_v22  ;;  %v3540_v22 = vrot.slane %v6666_v52, 5  ;;  %v5842_v52 = vld [vmem:[%s7570_s3 + $0xa0] sm:$0xff]   ;;  %v3534_v15 = vsel %vm6472_vm0, %v4858_v45, %v3533_v4  ;;  %v3548_v39 = vsel %vm6472_vm0, %v4860_v47, %v3547_v31  ;;  %v3563_v27 = vrot.slane %v3561_v30, 4 }
 0x18f   : > { %5602 = vmatprep.subr.bf16.mxu0 %v5839_v38  ;;  %v3556_v49 = vrot.slane %v3554_v63, 4  ;;  %v3564_v41 = vrot.slane %v6760_v29, 5  ;;  %v3555_v2 = vsel %vm6472_vm0, %v4861_v53, %v3554_v63  ;;  %v4903_v45 = vrot.slane %v3401_v54, 9 }
 0x190   : > { %5553 = vmatpush3.bf16.msra.mxu1 %v5838_v5  ;;  %v6876_v5 = vcombine.low %v3527_v48, %v3530_v32  ;;  %v3542_v33 = vrot.slane %v3540_v22, 4  ;;  %v3541_v9 = vsel %vm6472_vm0, %v4859_v0, %v3540_v22  ;;  %v3562_v29 = vsel %vm6472_vm0, %v4862_v59, %v3561_v30  ;;  %v5846_v48 = vld [vmem:[%s7570_s3 + $0x90] sm:$0xff]   ;;  %v7600_v22 = vld [vmem:[#allocation7_spill] sm:$0xff] }
 0x191   : > { %5523 = vmatmul.mubr.bf16.gmra.mxu0 %v6611_v18  ;;  %5554 = vmatprep.subr.bf16.mxu1 %v5840_v36  ;;  %v3558_v43 = vsel %vm6472_vm0, %v3556_v49, %v3557_v24  ;;  %v3565_v6 = vsel %vm6472_vm0, %v3563_v27, %v3564_v41  ;;  %v3895_v4 = vrot.slane %v3893_v51, 4  ;;  %v5847_v0 = vld [vmem:[%s7570_s3 + $0x148] sm:$0xff]   ;;  %v2833_v27 = vshll.u32 %v6848_v3, 16  ;;  %v6977_v41 = vld [vmem:[#allocation2 + $0xd4] sm:$0x1] }
 0x192   : > { %5475 = vmatmul.mubr.bf16.gmra.mxu1 %v6567_v26  ;;  %5526 = vmatprep.mubr.bf16.mxu0 %v6613_v55  ;;  %v6890_v26 = vcombine.low %v3534_v15, %v3537_v46  ;;  %v3544_v17 = vsel %vm6472_vm0, %v3542_v33, %v3543_v23  ;;  %v5844_v23 = vld [vmem:[%s7570_s3 + $0x98] sm:$0xff]   ;;  %v6922_v58 = vcombine.low %v3555_v2, %v3558_v43  ;;  %v7601_v24 = vld [vmem:[#allocation8_spill] sm:$0xff]  ;;  %v2098_v33 = vld [vmem:[#allocation2 + $0xc0] sm:$0xf]  ;;  %v2823_v46 = vshll.u32 %v6888_v60, 16 }
 0x193   : > { %5478 = vmatprep.mubr.bf16.mxu1 %v6611_v18  ;;  %5603 = vmatpush3.bf16.msra.mxu0 %v5839_v38  ;;  %v6900_v18 = vcombine.low %v3541_v9, %v3544_v17  ;;  %v3549_v38 = vrot.slane %v3547_v31, 4  ;;  %v6932_v14 = vcombine.low %v3562_v29, %v3565_v6  ;;  %v3897_v32 = vsel %vm6472_vm0, %v3895_v4, %v3896_v42  ;;  %v7602_v42 = vld [vmem:[#allocation9_spill] sm:$0xff]  ;;  %v5859_v29 = vld [vmem:[#allocation2 + $0x4] sm:$0xf] }
 0x194   : > { %5604 = vmatprep.subr.bf16.mxu0 %v5841_v7  ;;  %5555 = vmatpush3.bf16.msra.mxu1 %v5840_v36  ;;  %v6962_v15 = vld [vmem:[%s7570_s3 + $0x238] sm:$0xff]   ;;  %v2827_v9 = vshrl.u32 %v6888_v60, 16  ;;  %v2814_v31 = vshrl.u32 %v2098_v33, 16  ;;  %v2817_v19 = vshll.u32 %v2098_v33, 16  ;;  %v6966_v17 = vld [vmem:[#allocation2 + $0xd0] sm:$0xf] }
 0x195   : > { %5556 = vmatprep.subr.bf16.mxu1 %v5842_v52  ;;  %v3551_v20 = vsel %vm6472_vm0, %v3549_v38, %v3550_v10  ;;  %v2825_v47 = vrot.slane %v2823_v46, 5  ;;  %v3100_v60 = vshrl.u32 %v2101_v8, 16  ;;  %v3109_v38 = vshll.u32 %v6966_v17, 16  ;;  %v5860_v4 = vld [vmem:[#allocation2 + $0x10] sm:$0xf] }
 0x196   : > { %v6913_v36 = vcombine.low %v3548_v39, %v3551_v20  ;;  %v2829_v63 = vrot.slane %v2827_v9, 4  ;;  %v3113_v10 = vshrl.u32 %v6966_v17, 16  ;;  %v2816_v30 = vrot.slane %v2814_v31, 4  ;;  %v3386_v46 = vld [vmem:[#allocation2 + $0xc] sm:$0xe] }
 0x197   : > { %5605 = vmatpush3.bf16.msra.mxu0 %v5841_v7  ;;  %v3894_v7 = vsel %vm6472_vm0, %v4903_v45, %v3893_v51  ;;  %v2819_v54 = vrot.slane %v2817_v19, 5  ;;  %v3102_v39 = vrot.slane %v3100_v60, 4  ;;  %v3111_v49 = vrot.slane %v3109_v38, 5  ;;  %v5862_v9 = vld [vmem:[#allocation2 + $0x14] sm:$0x1] }
 0x198   : > { %5606 = vmatprep.subr.bf16.mxu0 %v5843_v21  ;;  %5557 = vmatpush3.bf16.msra.mxu1 %v5842_v52  ;;  %v6941_v50 = vcombine.low %v3894_v7, %v3897_v32  ;;  %v5850_v52 = vld [vmem:[%s7570_s3 + $0x80] sm:$0xff]   ;;  %v3115_v59 = vrot.slane %v3113_v10, 4  ;;  %v3119_v43 = vshll.u32 %v6977_v41, 16  ;;  %v3456_v6 = vrot.slane %v5859_v29, 5 }
 0x199   : > { %5527 = vmatmul.mubr.bf16.gmra.mxu0 %v7599_v25  ;;  %5558 = vmatprep.subr.bf16.mxu1 %v5844_v23  ;;  %v2820_v20 = vor.u32 %v2819_v54, %v2816_v30  ;;  %v3466_v31 = vrot.slane %v5862_v9, 5  ;;  %v5853_v9 = vld [vmem:[%s7570_s3 + $0x228] sm:$0xff]  }
 0x19a   : > { %5479 = vmatmul.mubr.bf16.gmra.mxu1 %v6613_v55  ;;  %5530 = vmatprep.mubr.bf16.mxu0 %v7600_v22  ;;  %v5848_v55 = vld [vmem:[%s7570_s3 + $0x88] sm:$0xff]   ;;  %v3116_v2 = vor.u32 %v3115_v59, %v3111_v49  ;;  %v3121_v7 = vrot.slane %v3119_v43, 5 }
 0x19b   : > { %5482 = vmatprep.mubr.bf16.mxu1 %v7599_v25  ;;  %5607 = vmatpush3.bf16.msra.mxu0 %v5843_v21  ;;  %v3103_v21 = vshll.u32 %v2101_v8, 16  ;;  %v2821_v45 = vrot.slane %v2820_v20, 4  ;;  %v3463_v25 = vrot.slane %v5860_v4, 5  ;;  %v3388_v20 = vld [vmem:[#allocation2 + $0x24] sm:$0xe] }
 0x19c   : > { %5608 = vmatprep.subr.bf16.mxu0 %v5845_v34  ;;  %5559 = vmatpush3.bf16.msra.mxu1 %v5844_v23  ;;  %v2830_v23 = vor.u32 %v2829_v63, %v2825_v47 }
 0x19d   : > { %5560 = vmatprep.subr.bf16.mxu1 %v5846_v48  ;;  %v3105_v53 = vrot.slane %v3103_v21, 5  ;;  %v2826_v32 = vsel %vm6451_vm14, %v2821_v45, %v2825_v47  ;;  %v5863_v21 = vld [vmem:[#allocation2 + $0x28] sm:$0xf]  ;;  %v5865_v45 = vld [vmem:[#allocation2 + $0x34] sm:$0xf] }
 0x19e   : > { %v2831_v51 = vrot.slane %v2830_v23, 4  ;;  %v3477_v13 = vrot.slane %v5863_v21, 5 }
 0x19f   : > { %5609 = vmatpush3.bf16.msra.mxu0 %v5845_v34  ;;  %v2835_v34 = vrot.slane %v2833_v27, 5 }
 0x1a0   : > { %5610 = vmatprep.subr.bf16.mxu0 %v5847_v0  ;;  %5561 = vmatpush3.bf16.msra.mxu1 %v5846_v48  ;;  %v3385_v48 = vld [vmem:[#allocation2] sm:$0xe] }
 0x1a1   : > { %5531 = vmatmul.mubr.bf16.gmra.mxu0 %v7601_v24  ;;  %5562 = vmatprep.subr.bf16.mxu1 %v5848_v55  ;;  %v2836_v3 = vsel %vm6451_vm14, %v2831_v51, %v2835_v34  ;;  %v5864_v51 = vld [vmem:[#allocation2 + $0x2c] sm:$0x1]  ;;  %v3484_v34 = vrot.slane %v5865_v45, 5 }
 0x1a2   : > { %5483 = vmatmul.mubr.bf16.gmra.mxu1 %v7600_v22  ;;  %5534 = vmatprep.mubr.bf16.mxu0 %v7602_v42 }
 0x1a3   : > { %5486 = vmatprep.mubr.bf16.mxu1 %v7601_v24  ;;  %5611 = vmatpush3.bf16.msra.mxu0 %v5847_v0  ;;  %v4813_v0 = vcombine.low %v2826_v32, %v2836_v3 }
 0x1a4   : > { %5612 = vmatprep.subr.bf16.mxu0 %v5849_v61  ;;  %5563 = vmatpush3.bf16.msra.mxu1 %v5848_v55  ;;  %v4847_v55 = vrot.slane %v3385_v48, 9 }
 0x1a5   : > { %5564 = vmatprep.subr.bf16.mxu1 %v5850_v52 }
 0x1a6   : > { %v3457_v19 = vsel %vm6472_vm0, %v4847_v55, %v3456_v6 }
 0x1a7   : > { %5613 = vmatpush3.bf16.msra.mxu0 %v5849_v61  ;;  %v3458_v61 = vrot.slane %v3456_v6, 4  ;;  %v4850_v6 = vrot.slane %v3388_v20, 9 }
 0x1a8   : > { %5565 = vmatpush3.bf16.msra.mxu1 %v5850_v52  ;;  %5646 = vmatprep.subr.bf16.mxu0 %v6962_v15  ;;  %v3465_v52 = vrot.slane %v3463_v25, 4 }
 0x1a9   : > { %5535 = vmatmul.mubr.bf16.gmra.mxu0 %v6746_v37  ;;  %5694 = vmatprep.subr.bf16.mxu1 %v6962_v15 }
 0x1aa   : > { %5487 = vmatmul.mubr.bf16.gmra.mxu1 %v7602_v42  ;;  %5538 = vmatprep.mubr.bf16.mxu0 %v6752_v56  ;;  %v3467_v63 = vsel %vm6472_vm0, %v3465_v52, %v3466_v31 }
 0x1ab   : > { %5490 = vmatprep.mubr.bf16.mxu1 %v6746_v37  ;;  %v3106_v37 = vor.u32 %v3105_v53, %v3102_v39  ;;  %v3479_v53 = vrot.slane %v3477_v13, 4 }
 0x1ad   : > { %v3107_v22 = vrot.slane %v3106_v37, 4  ;;  %v3480_v37 = vrot.slane %v5864_v51, 5  ;;  %v5856_v51 = vld [vmem:[%s7570_s3 + $0x210] sm:$0xff]  }
 0x1af   : > { %v3112_v42 = vsel %vm6451_vm14, %v3107_v22, %v3111_v49  ;;  %v3481_v3 = vsel %vm6472_vm0, %v3479_v53, %v3480_v37  ;;  %v3478_v22 = vsel %vm6472_vm0, %v4850_v6, %v3477_v13  ;;  %v5854_v13 = vld [vmem:[%s7570_s3 + $0x220] sm:$0xff]  }
 0x1b0   : > { %v7021_v55 = vcombine.low %v3478_v22, %v3481_v3  ;;  %v5857_v3 = vld [vmem:[%s7570_s3 + $0x208] sm:$0xff]  }
 0x1b1   : > { %5539 = vmatmul.mubr.bf16.gmra.mxu0 %v6769_v57 }
 0x1b2   : > { %5491 = vmatmul.mubr.bf16.gmra.mxu1 %v6752_v56  ;;  %5542 = vmatprep.mubr.bf16.mxu0 %v6773_v1  ;;  %v3117_v56 = vrot.slane %v3116_v2, 4 }
 0x1b3   : > { %5494 = vmatprep.mubr.bf16.mxu1 %v6769_v57  ;;  %v5861_v57 = vld [vmem:[#allocation2 + $0x8] sm:$0x1] }
 0x1b4   : > { %v3459_v24 = vrot.slane %v5861_v57, 5  ;;  %v3122_v33 = vsel %vm6451_vm14, %v3117_v56, %v3121_v7  ;;  %v5852_v56 = vld [vmem:[%s7570_s3 + $0x230] sm:$0xff]   ;;  %v3486_v7 = vrot.slane %v3484_v34, 4 }
 0x1b5   : > { %v4838_v47 = vcombine.low %v3112_v42, %v3122_v33 }
 0x1b6   : > { %v3460_v8 = vsel %vm6472_vm0, %v3458_v61, %v3459_v24  ;;  %v3389_v61 = vld [vmem:[#allocation2 + $0x30] sm:$0xe]  ;;  %v5866_v24 = vld [vmem:[#allocation2 + $0x38] sm:$0x1] }
 0x1b7   : > { %v3487_v52 = vrot.slane %v5866_v24, 5  ;;  %v4851_v31 = vrot.slane %v3389_v61, 9  ;;  %v5858_v61 = vld [vmem:[%s7570_s3 + $0x200] sm:$0xff]  }
 0x1b9   : > { %5543 = vmatmul.mubr.bf16.gmra.mxu0 %v6783_v11 }
 0x1ba   : > { %5495 = vmatmul.mubr.bf16.gmra.mxu1 %v6773_v1  ;;  %5546 = vmatprep.mubr.bf16.mxu0 %v4813_v0  ;;  %v4848_v1 = vrot.slane %v3386_v46, 9 }
 0x1bb   : > { %5498 = vmatprep.mubr.bf16.mxu1 %v6783_v11  ;;  %v4879_v11 = vcombine.low %v3457_v19, %v3460_v8  ;;  %v3488_v19 = vsel %vm6472_vm0, %v3486_v7, %v3487_v52 }
 0x1bc   : > { %v3464_v38 = vsel %vm6472_vm0, %v4848_v1, %v3463_v25 }
 0x1bd   : > { %v4880_v30 = vcombine.low %v3464_v38, %v3467_v63  ;;  %v3485_v63 = vsel %vm6472_vm0, %v4851_v31, %v3484_v34 }
 0x1be   : > { %v7040_v21 = vcombine.low %v3485_v63, %v3488_v19 }
 0x1bf   : > { %v5328_v60 = vpop.f32.mrf.mxu0  ;;  %v5280_v10 = vpop.f32.mrf.mxu1 }
 0x1c0   : > { %v7003_v54 = vadd.f32 %v5328_v60, %v5280_v10 }
 0x1c1   : > { %v1659_v23 = vpop.f32.mrf.mxu0  ;;  %5547 = vmatmul.mubr.bf16.gmra.mxu0 %v4838_v47  ;;  %v1444_v39 = vpop.f32.mrf.mxu1 }
 0x1c2   : > { %5499 = vmatmul.mubr.bf16.gmra.mxu1 %v4813_v0  ;;  %5614 = vmatprep.mubr.bf16.mxu0 %v4880_v30  ;;  %v7005_v49 = vadd.f32 %v1659_v23, %v1444_v39 }
 0x1c3   : > { %v5329_v59 = vpop.f32.mrf.mxu0  ;;  %5566 = vmatprep.mubr.bf16.mxu1 %v4879_v11  ;;  %v5281_v27 = vpop.f32.mrf.mxu1 }
 0x1c4   : > { %v7007_v2 = vadd.f32 %v5329_v59, %v5281_v27 }
 0x1c5   : > { %v1662_v43 = vpop.f32.mrf.mxu0  ;;  %v1447_v29 = vpop.f32.mrf.mxu1 }
 0x1c6   : > { %v7011_v4 = vadd.f32 %v1662_v43, %v1447_v29 }
 0x1c7   : > { %v5332_v25 = vpop.f32.mrf.mxu0  ;;  %v5284_v48 = vpop.f32.mrf.mxu1 }
 0x1c8   : > { %v7018_v32 = vadd.f32 %v5332_v25, %v5284_v48 }
 0x1c9   : > { %v1675_v0 = vpop.f32.mrf.mxu0  ;;  %5615 = vmatmul.mubr.bf16.vlgmr.msra.gmra.mxu0 %v6792_v62  ;;  %v1460_v57 = vpop.f32.mrf.mxu1 }
 0x1ca   : > { %5647 = vmatpush3.bf16.msra.mxu0 %v6962_v15  ;;  %5567 = vmatmul.mubr.bf16.vlgmr.msra.gmra.mxu1 %v4880_v30  ;;  %v7024_v42 = vadd.f32 %v1675_v0, %v1460_v57  ;;  %v5855_v30 = vld [vmem:[%s7570_s3 + $0x218] sm:$0xff]  }
 0x1cb   : > { %v5333_v33 = vpop.f32.mrf.mxu0  ;;  %5618 = vmatprep.mubr.bf16.mxu0 %v7021_v55  ;;  %5570 = vmatprep.mubr.bf16.mxu1 %v6792_v62  ;;  %v5285_v46 = vpop.f32.mrf.mxu1 }
 0x1cc   : > { %5648 = vmatprep.subr.bf16.mxu0 %v5852_v56  ;;  %5702 = vmatpush3.bf16.msra.mxu1 %v6962_v15  ;;  %v7034_v8 = vadd.f32 %v5333_v33, %v5285_v46 }
 0x1cd   : > { %v1678_v47 = vpop.f32.mrf.mxu0  ;;  %v1463_v1 = vpop.f32.mrf.mxu1  ;;  %5695 = vmatprep.subr.bf16.mxu1 %v5852_v56 }
 0x1ce   : > { %5649 = vmatpush3.bf16.msra.mxu0 %v5852_v56  ;;  %v7038_v60 = vadd.f32 %v1678_v47, %v1463_v1 }
 0x1cf   : > { %5650 = vmatprep.subr.bf16.mxu0 %v5853_v9 }
 0x1d0   : > { %5703 = vmatpush3.bf16.msra.mxu1 %v5852_v56 }
 0x1d1   : > { %5619 = vmatmul.mubr.bf16.gmra.mxu0 %v7040_v21  ;;  %5696 = vmatprep.subr.bf16.mxu1 %v5853_v9 }
 0x1d2   : > { %5571 = vmatmul.mubr.bf16.gmra.mxu1 %v7021_v55  ;;  %5622 = vmatprep.mubr.bf16.mxu0 %v6822_v12 }
 0x1d3   : > { %5574 = vmatprep.mubr.bf16.mxu1 %v7040_v21  ;;  %5651 = vmatpush3.bf16.msra.mxu0 %v5853_v9 }
 0x1d4   : > { %v5336_v15 = vpop.f32.mrf.mxu0  ;;  %5652 = vmatprep.subr.bf16.mxu0 %v5854_v13  ;;  %5704 = vmatpush3.bf16.msra.mxu1 %v5853_v9 }
 0x1d5   : > { %v5288_v38 = vpop.f32.mrf.mxu1  ;;  %5697 = vmatprep.subr.bf16.mxu1 %v5854_v13 }
 0x1d6   : > { %v7049_v11 = vadd.f32 %v5336_v15, %v5288_v38  ;;  %v1691_v10 = vpop.f32.mrf.mxu0 }
 0x1d7   : > { %v1476_v23 = vpop.f32.mrf.mxu1  ;;  %5653 = vmatpush3.bf16.msra.mxu0 %v5854_v13 }
 0x1d8   : > { %v7054_v39 = vadd.f32 %v1691_v10, %v1476_v23  ;;  %v5337_v53 = vpop.f32.mrf.mxu0  ;;  %5654 = vmatprep.subr.bf16.mxu0 %v5855_v30  ;;  %5705 = vmatpush3.bf16.msra.mxu1 %v5854_v13 }
 0x1d9   : > { %v5289_v59 = vpop.f32.mrf.mxu1  ;;  %5623 = vmatmul.mubr.bf16.gmra.mxu0 %v6824_v28  ;;  %5698 = vmatprep.subr.bf16.mxu1 %v5855_v30 }
 0x1da   : > { %v7056_v20 = vadd.f32 %v5337_v53, %v5289_v59  ;;  %v1694_v27 = vpop.f32.mrf.mxu0  ;;  %5575 = vmatmul.mubr.bf16.gmra.mxu1 %v6822_v12  ;;  %5626 = vmatprep.mubr.bf16.mxu0 %v6844_v40 }
 0x1db   : > { %v1479_v37 = vpop.f32.mrf.mxu1  ;;  %5578 = vmatprep.mubr.bf16.mxu1 %v6824_v28  ;;  %5655 = vmatpush3.bf16.msra.mxu0 %v5855_v30 }
 0x1dc   : > { %v7064_v43 = vadd.f32 %v1694_v27, %v1479_v37  ;;  %v5340_v45 = vpop.f32.mrf.mxu0  ;;  %5656 = vmatprep.subr.bf16.mxu0 %v5856_v51  ;;  %5706 = vmatpush3.bf16.msra.mxu1 %v5855_v30 }
 0x1dd   : > { %v5292_v34 = vpop.f32.mrf.mxu1  ;;  %5699 = vmatprep.subr.bf16.mxu1 %v5856_v51 }
 0x1de   : > { %v7067_v29 = vadd.f32 %v5340_v45, %v5292_v34  ;;  %v1707_v6 = vpop.f32.mrf.mxu0 }
 0x1df   : > { %v1492_v25 = vpop.f32.mrf.mxu1  ;;  %5657 = vmatpush3.bf16.msra.mxu0 %v5856_v51 }
 0x1e0   : > { %v7072_v48 = vadd.f32 %v1707_v6, %v1492_v25  ;;  %v5341_v22 = vpop.f32.mrf.mxu0  ;;  %5658 = vmatprep.subr.bf16.mxu0 %v5857_v3  ;;  %5707 = vmatpush3.bf16.msra.mxu1 %v5856_v51 }
 0x1e1   : > { %v5293_v56 = vpop.f32.mrf.mxu1  ;;  %5627 = vmatmul.mubr.bf16.gmra.mxu0 %v6850_v35  ;;  %5700 = vmatprep.subr.bf16.mxu1 %v5857_v3 }
 0x1e2   : > { %v7074_v7 = vadd.f32 %v5341_v22, %v5293_v56  ;;  %v1710_v0 = vpop.f32.mrf.mxu0  ;;  %5579 = vmatmul.mubr.bf16.gmra.mxu1 %v6844_v40  ;;  %5630 = vmatprep.mubr.bf16.mxu0 %v6864_v44 }
 0x1e3   : > { %v1495_v57 = vpop.f32.mrf.mxu1  ;;  %5582 = vmatprep.mubr.bf16.mxu1 %v6850_v35  ;;  %5659 = vmatpush3.bf16.msra.mxu0 %v5857_v3 }
 0x1e4   : > { %v7082_v24 = vadd.f32 %v1710_v0, %v1495_v57  ;;  %v5344_v52 = vpop.f32.mrf.mxu0  ;;  %5660 = vmatprep.subr.bf16.mxu0 %v5858_v61  ;;  %5708 = vmatpush3.bf16.msra.mxu1 %v5857_v3 }
 0x1e5   : > { %v5296_v33 = vpop.f32.mrf.mxu1  ;;  %5701 = vmatprep.subr.bf16.mxu1 %v5858_v61 }
 0x1e6   : > { %v1723_v46 = vpop.f32.mrf.mxu0  ;;  %v7085_v9 = vadd.f32 %v5344_v52, %v5296_v33 }
 0x1e7   : > { %v1508_v31 = vpop.f32.mrf.mxu1  ;;  %5661 = vmatpush3.bf16.msra.mxu0 %v5858_v61 }
 0x1e8   : > { %v5345_v19 = vpop.f32.mrf.mxu0  ;;  %v7087_v47 = vadd.f32 %v1723_v46, %v1508_v31  ;;  %5709 = vmatpush3.bf16.msra.mxu1 %v5858_v61 }
 0x1e9   : > { %5631 = vmatmul.mubr.bf16.gmra.mxu0 %v6876_v5  ;;  %v5297_v1 = vpop.f32.mrf.mxu1 }
 0x1ea   : > { %v1726_v63 = vpop.f32.mrf.mxu0  ;;  %5583 = vmatmul.mubr.bf16.gmra.mxu1 %v6864_v44  ;;  %5634 = vmatprep.mubr.bf16.mxu0 %v6890_v26  ;;  %v7092_v13 = vadd.f32 %v5345_v19, %v5297_v1 }
 0x1eb   : > { %5586 = vmatprep.mubr.bf16.mxu1 %v6876_v5  ;;  %v1511_v15 = vpop.f32.mrf.mxu1 }
 0x1ec   : > { %v7095_v38 = vadd.f32 %v1726_v63, %v1511_v15 }
 0x1f0   : > { %v5348_v10 = vpop.f32.mrf.mxu0 }
 0x1f1   : > { %v5300_v30 = vpop.f32.mrf.mxu1  ;;  %5635 = vmatmul.mubr.bf16.gmra.mxu0 %v6900_v18 }
 0x1f2   : > { %v7098_v23 = vadd.f32 %v5348_v10, %v5300_v30  ;;  %v1739_v53 = vpop.f32.mrf.mxu0  ;;  %5587 = vmatmul.mubr.bf16.gmra.mxu1 %v6890_v26  ;;  %5638 = vmatprep.mubr.bf16.mxu0 %v6913_v36 }
 0x1f3   : > { %v1524_v59 = vpop.f32.mrf.mxu1  ;;  %5590 = vmatprep.mubr.bf16.mxu1 %v6900_v18 }
 0x1f4   : > { %v7103_v27 = vadd.f32 %v1739_v53, %v1524_v59  ;;  %v5349_v51 = vpop.f32.mrf.mxu0 }
 0x1f5   : > { %v5301_v37 = vpop.f32.mrf.mxu1 }
 0x1f6   : > { %v7105_v45 = vadd.f32 %v5349_v51, %v5301_v37  ;;  %v1742_v34 = vpop.f32.mrf.mxu0 }
 0x1f7   : > { %v1527_v6 = vpop.f32.mrf.mxu1 }
 0x1f8   : > { %v7107_v3 = vadd.f32 %v1742_v34, %v1527_v6  ;;  %v5352_v25 = vpop.f32.mrf.mxu0 }
 0x1f9   : > { %v5304_v22 = vpop.f32.mrf.mxu1  ;;  %5639 = vmatmul.mubr.bf16.gmra.mxu0 %v6922_v58 }
 0x1fa   : > { %v7110_v56 = vadd.f32 %v5352_v25, %v5304_v22  ;;  %v1755_v0 = vpop.f32.mrf.mxu0  ;;  %5591 = vmatmul.mubr.bf16.gmra.mxu1 %v6913_v36  ;;  %5642 = vmatprep.mubr.bf16.mxu0 %v6932_v14 }
 0x1fb   : > { %v1540_v61 = vpop.f32.mrf.mxu1  ;;  %5594 = vmatprep.mubr.bf16.mxu1 %v6922_v58 }
 0x1fc   : > { %v7115_v57 = vadd.f32 %v1755_v0, %v1540_v61  ;;  %v5353_v52 = vpop.f32.mrf.mxu0 }
 0x1fd   : > { %v5305_v33 = vpop.f32.mrf.mxu1 }
 0x1fe   : > { %v7117_v46 = vadd.f32 %v5353_v52, %v5305_v33  ;;  %v1758_v31 = vpop.f32.mrf.mxu0 }
 0x1ff   : > { %v1543_v19 = vpop.f32.mrf.mxu1 }
 0x200   : > { %v7119_v1 = vadd.f32 %v1758_v31, %v1543_v19 }
 0x201   : > { %v5356_v63 = vpop.f32.mrf.mxu0  ;;  %5643 = vmatmul.mubr.bf16.gmra.mxu0 %v6941_v50 }
 0x202   : > { %v5308_v15 = vpop.f32.mrf.mxu1  ;;  %5595 = vmatmul.mubr.bf16.gmra.mxu1 %v6932_v14  ;;  %5662 = vmatprep.mubr.bf16.mxu0 %v6792_v62 }
 0x203   : > { %v7124_v10 = vadd.f32 %v5356_v63, %v5308_v15  ;;  %v1771_v30 = vpop.f32.mrf.mxu0  ;;  %5666 = vmatprep.mubr.bf16.mxu1 %v7040_v21 }
 0x204   : > { %v1556_v53 = vpop.f32.mrf.mxu1 }
 0x205   : > { %v7127_v59 = vadd.f32 %v1771_v30, %v1556_v53  ;;  %v5357_v51 = vpop.f32.mrf.mxu0 }
 0x206   : > { %v5309_v37 = vpop.f32.mrf.mxu1 }
 0x207   : > { %v7129_v34 = vadd.f32 %v5357_v51, %v5309_v37  ;;  %v1774_v6 = vpop.f32.mrf.mxu0 }
 0x208   : > { %v1559_v25 = vpop.f32.mrf.mxu1 }
 0x209   : > { %v7131_v22 = vadd.f32 %v1774_v6, %v1559_v25  ;;  %v5424_v0 = vpop.f32.mrf.mxu0  ;;  %5663 = vmatmul.mubr.bf16.vlgmr.msra.gmra.mxu0 %v7021_v55 }
 0x20a   : > { %v5376_v62 = vpop.f32.mrf.mxu1  ;;  %5667 = vmatmul.mubr.bf16.vlgmr.msra.gmra.mxu1 %v6822_v12 }
 0x20b   : > { %v2020_v61 = vadd.f32 %v5376_v62, %v7003_v54  ;;  %v2654_v21 = vpop.f32.mrf.mxu0  ;;  %5670 = vmatprep.mubr.bf16.mxu1 %v6824_v28 }
 0x20c   : > { %v1891_v52 = vpop.f32.mrf.mxu1 }
 0x20d   : > { %v2018_v33 = vadd.f32 %v1891_v52, %v7005_v49  ;;  %v5425_v31 = vpop.f32.mrf.mxu0  ;;  %v7138_v19 = vadd.f32 %v5424_v0, %v2020_v61 }
 0x20e   : > { %v5377_v63 = vpop.f32.mrf.mxu1 }
 0x20f   : > { %v2021_v15 = vadd.f32 %v5377_v63, %v7007_v2  ;;  %v2657_v30 = vpop.f32.mrf.mxu0  ;;  %v7141_v53 = vadd.f32 %v2654_v21, %v2018_v33 }
 0x210   : > { %v1894_v55 = vpop.f32.mrf.mxu1 }
 0x211   : > { %v2019_v12 = vadd.f32 %v1894_v55, %v7011_v4  ;;  %v5428_v51 = vpop.f32.mrf.mxu0  ;;  %v7144_v54 = vadd.f32 %v5425_v31, %v2021_v15 }
 0x212   : > { %v5380_v37 = vpop.f32.mrf.mxu1  ;;  %5671 = vmatmul.mubr.bf16.gmra.mxu1 %v6844_v40 }
 0x213   : > { %v2024_v28 = vadd.f32 %v5380_v37, %v7018_v32  ;;  %v2670_v49 = vpop.f32.mrf.mxu0  ;;  %5674 = vmatprep.mubr.bf16.mxu1 %v6850_v35  ;;  %v7149_v6 = vadd.f32 %v2657_v30, %v2019_v12 }
 0x214   : > { %v1907_v2 = vpop.f32.mrf.mxu1 }
 0x215   : > { %v2022_v25 = vadd.f32 %v1907_v2, %v7024_v42  ;;  %v5429_v0 = vpop.f32.mrf.mxu0  ;;  %v7152_v62 = vadd.f32 %v5428_v51, %v2024_v28 }
 0x216   : > { %v5381_v4 = vpop.f32.mrf.mxu1 }
 0x217   : > { %v2025_v61 = vadd.f32 %v5381_v4, %v7034_v8  ;;  %v2673_v21 = vpop.f32.mrf.mxu0  ;;  %v7155_v52 = vadd.f32 %v2670_v49, %v2022_v25 }
 0x218   : > { %v1910_v40 = vpop.f32.mrf.mxu1 }
 0x219   : > { %v2023_v32 = vadd.f32 %v1910_v40, %v7038_v60  ;;  %v5432_v33 = vpop.f32.mrf.mxu0  ;;  %v7158_v31 = vadd.f32 %v5429_v0, %v2025_v61 }
 0x21a   : > { %v5384_v35 = vpop.f32.mrf.mxu1  ;;  %5675 = vmatmul.mubr.bf16.gmra.mxu1 %v6864_v44 }
 0x21b   : > { %v2028_v42 = vadd.f32 %v5384_v35, %v7049_v11  ;;  %v2686_v63 = vpop.f32.mrf.mxu0  ;;  %5678 = vmatprep.mubr.bf16.mxu1 %v6876_v5  ;;  %v7163_v15 = vadd.f32 %v2673_v21, %v2023_v32 }
 0x21c   : > { %v1923_v8 = vpop.f32.mrf.mxu1 }
 0x21d   : > { %v2026_v30 = vadd.f32 %v1923_v8, %v7054_v39  ;;  %v5433_v55 = vpop.f32.mrf.mxu0  ;;  %v7166_v12 = vadd.f32 %v5432_v33, %v2028_v42  ;;  %v4165_v8 = vrot.slane %v6966_v17, 5 }
 0x21e   : > { %v5385_v60 = vpop.f32.mrf.mxu1 }
 0x21f   : > { %v2029_v51 = vadd.f32 %v5385_v60, %v7056_v20  ;;  %v2689_v37 = vpop.f32.mrf.mxu0  ;;  %v7169_v28 = vadd.f32 %v2686_v63, %v2026_v30 }
 0x220   : > { %v1926_v44 = vpop.f32.mrf.mxu1 }
 0x221   : > { %v2027_v11 = vadd.f32 %v1926_v44, %v7064_v43  ;;  %v5436_v49 = vpop.f32.mrf.mxu0  ;;  %v7172_v2 = vadd.f32 %v5433_v55, %v2029_v51  ;;  %v3402_v55 = vld [vmem:[#allocation2 + $0xcc] sm:$0xe]  ;;  %v4168_v44 = vrot.slane %v6977_v41, 5 }
 0x222   : > { %v5388_v5 = vpop.f32.mrf.mxu1  ;;  %5679 = vmatmul.mubr.bf16.gmra.mxu1 %v6890_v26 }
 0x223   : > { %v2032_v39 = vadd.f32 %v5388_v5, %v7067_v29  ;;  %v2702_v25 = vpop.f32.mrf.mxu0  ;;  %5682 = vmatprep.mubr.bf16.mxu1 %v6900_v18  ;;  %v7177_v0 = vadd.f32 %v2689_v37, %v2027_v11  ;;  %v4929_v11 = vrot.slane %v3402_v55, 9 }
 0x224   : > { %v1939_v20 = vpop.f32.mrf.mxu1 }
 0x225   : > { %v2030_v4 = vadd.f32 %v1939_v20, %v7072_v48  ;;  %v5437_v61 = vpop.f32.mrf.mxu0  ;;  %v7180_v21 = vadd.f32 %v5436_v49, %v2032_v39  ;;  %v4167_v49 = vrot.slane %v4165_v8, 4  ;;  %v4166_v41 = vsel %vm6472_vm0, %v4929_v11, %v4165_v8 }
 0x226   : > { %v5389_v43 = vpop.f32.mrf.mxu1 }
 0x227   : > { %v2033_v40 = vadd.f32 %v5389_v43, %v7074_v7  ;;  %v2705_v32 = vpop.f32.mrf.mxu0  ;;  %v7183_v33 = vadd.f32 %v2702_v25, %v2030_v4 }
 0x228   : > { %v1942_v26 = vpop.f32.mrf.mxu1 }
 0x229   : > { %v2031_v29 = vadd.f32 %v1942_v26, %v7082_v24  ;;  %v5440_v35 = vpop.f32.mrf.mxu0  ;;  %v7186_v42 = vadd.f32 %v5437_v61, %v2033_v40 }
 0x22a   : > { %v5392_v18 = vpop.f32.mrf.mxu1  ;;  %5683 = vmatmul.mubr.bf16.gmra.mxu1 %v6913_v36 }
 0x22b   : > { %v2036_v48 = vadd.f32 %v5392_v18, %v7085_v9  ;;  %v2718_v63 = vpop.f32.mrf.mxu0  ;;  %5686 = vmatprep.mubr.bf16.mxu1 %v6922_v58  ;;  %v7192_v7 = vadd.f32 %v2705_v32, %v2031_v29 }
 0x22c   : > { %v1955_v30 = vpop.f32.mrf.mxu1 }
 0x22d   : > { %v2034_v60 = vadd.f32 %v1955_v30, %v7087_v47  ;;  %v5441_v24 = vpop.f32.mrf.mxu0  ;;  %v7195_v51 = vadd.f32 %v5440_v35, %v2036_v48 }
 0x22e   : > { %v5393_v37 = vpop.f32.mrf.mxu1 }
 0x22f   : > { %v2037_v36 = vadd.f32 %v5393_v37, %v7092_v13  ;;  %v2721_v9 = vpop.f32.mrf.mxu0  ;;  %v7199_v58 = vadd.f32 %v2718_v63, %v2034_v60  ;;  %v4169_v13 = vsel %vm6472_vm0, %v4167_v49, %v4168_v44 }
 0x230   : > { %v1958_v17 = vpop.f32.mrf.mxu1  ;;  %v4946_v26 = vcombine.low %v4166_v41, %v4169_v13 }
 0x231   : > { %v2035_v5 = vadd.f32 %v1958_v17, %v7095_v38  ;;  %v5444_v39 = vpop.f32.mrf.mxu0  ;;  %v7202_v25 = vadd.f32 %v5441_v24, %v2037_v36 }
 0x232   : > { %v5396_v47 = vpop.f32.mrf.mxu1  ;;  %5687 = vmatmul.mubr.bf16.gmra.mxu1 %v6932_v14 }
 0x233   : > { %v2040_v20 = vadd.f32 %v5396_v47, %v7098_v23  ;;  %v2734_v4 = vpop.f32.mrf.mxu0  ;;  %5690 = vmatprep.mubr.bf16.mxu1 %v6941_v50  ;;  %v7211_v61 = vadd.f32 %v2721_v9, %v2035_v5 }
 0x234   : > { %v1971_v38 = vpop.f32.mrf.mxu1 }
 0x235   : > { %v2038_v43 = vadd.f32 %v1971_v38, %v7103_v27  ;;  %v5445_v40 = vpop.f32.mrf.mxu0  ;;  %v7214_v32 = vadd.f32 %v5444_v39, %v2040_v20 }
 0x236   : > { %v5397_v14 = vpop.f32.mrf.mxu1 }
 0x237   : > { %v2041_v23 = vadd.f32 %v5397_v14, %v7105_v45  ;;  %v2737_v29 = vpop.f32.mrf.mxu0  ;;  %v7217_v50 = vadd.f32 %v2734_v4, %v2038_v43 }
 0x238   : > { %v1974_v35 = vpop.f32.mrf.mxu1 }
 0x239   : > { %v2039_v18 = vadd.f32 %v1974_v35, %v7107_v3  ;;  %v5448_v16 = vpop.f32.mrf.mxu0  ;;  %v7220_v48 = vadd.f32 %v5445_v40, %v2041_v23 }
 0x23a   : > { %v5400_v63 = vpop.f32.mrf.mxu1  ;;  %5691 = vmatmul.mubr.bf16.gmra.mxu1 %v4946_v26 }
 0x23b   : > { %v2044_v27 = vadd.f32 %v5400_v63, %v7110_v56  ;;  %v2750_v8 = vpop.f32.mrf.mxu0  ;;  %v7223_v30 = vadd.f32 %v2737_v29, %v2039_v18 }
 0x23c   : > { %v1987_v55 = vpop.f32.mrf.mxu1 }
 0x23d   : > { %v2042_v60 = vadd.f32 %v1987_v55, %v7115_v57  ;;  %v5449_v45 = vpop.f32.mrf.mxu0  ;;  %v7226_v24 = vadd.f32 %v5448_v16, %v2044_v27 }
 0x23e   : > { %v5401_v37 = vpop.f32.mrf.mxu1 }
 0x23f   : > { %v2045_v44 = vadd.f32 %v5401_v37, %v7117_v46  ;;  %v2753_v3 = vpop.f32.mrf.mxu0  ;;  %v7229_v36 = vadd.f32 %v2750_v8, %v2042_v60 }
 0x240   : > { %v1990_v9 = vpop.f32.mrf.mxu1 }
 0x241   : > { %v2043_v11 = vadd.f32 %v1990_v9, %v7119_v1  ;;  %v5452_v49 = vpop.f32.mrf.mxu0  ;;  %v7232_v56 = vadd.f32 %v5449_v45, %v2045_v44 }
 0x242   : > { %v5404_v17 = vpop.f32.mrf.mxu1 }
 0x243   : > { %v2048_v5 = vadd.f32 %v5404_v17, %v7124_v10  ;;  %v2766_v39 = vpop.f32.mrf.mxu0  ;;  %v7235_v57 = vadd.f32 %v2753_v3, %v2043_v11 }
 0x244   : > { %v2003_v47 = vpop.f32.mrf.mxu1 }
 0x245   : > { %v2046_v20 = vadd.f32 %v2003_v47, %v7127_v59  ;;  %v5453_v4 = vpop.f32.mrf.mxu0  ;;  %v7238_v46 = vadd.f32 %v5452_v49, %v2048_v5 }
 0x246   : > { %v5405_v41 = vpop.f32.mrf.mxu1 }
 0x247   : > { %v2049_v13 = vadd.f32 %v5405_v41, %v7129_v34  ;;  %v2769_v38 = vpop.f32.mrf.mxu0  ;;  %v7241_v1 = vadd.f32 %v2766_v39, %v2046_v20 }
 0x248   : > { %v2006_v43 = vpop.f32.mrf.mxu1 }
 0x249   : > { %v2047_v40 = vadd.f32 %v2006_v43, %v7131_v22  ;;  %v5520_v14 = vpop.f32.mrf.mxu0  ;;  %v7244_v10 = vadd.f32 %v5453_v4, %v2049_v13 }
 0x24a   : > { %v5472_v26 = vpop.f32.mrf.mxu1 }
 0x24b   : > { %v3069_v23 = vadd.f32 %v5472_v26, %v7138_v19  ;;  %v3226_v29 = vpop.f32.mrf.mxu0  ;;  %v7247_v59 = vadd.f32 %v2769_v38, %v2047_v40 }
 0x24c   : > { %v2940_v35 = vpop.f32.mrf.mxu1 }
 0x24d   : > { %v3067_v18 = vadd.f32 %v2940_v35, %v7141_v53  ;;  %v5521_v16 = vpop.f32.mrf.mxu0  ;;  %v7250_v34 = vadd.f32 %v5520_v14, %v3069_v23 }
 0x24e   : > { %v5473_v63 = vpop.f32.mrf.mxu1 }
 0x24f   : > { %v3070_v27 = vadd.f32 %v5473_v63, %v7144_v54  ;;  %v3229_v8 = vpop.f32.mrf.mxu0  ;;  %v7253_v22 = vadd.f32 %v3226_v29, %v3067_v18 }
 0x250   : > { %v2943_v55 = vpop.f32.mrf.mxu1 }
 0x251   : > { %v3068_v60 = vadd.f32 %v2943_v55, %v7149_v6  ;;  %v5524_v45 = vpop.f32.mrf.mxu0  ;;  %v7256_v19 = vadd.f32 %v5521_v16, %v3070_v27 }
 0x252   : > { %v5476_v37 = vpop.f32.mrf.mxu1 }
 0x253   : > { %v3073_v44 = vadd.f32 %v5476_v37, %v7152_v62  ;;  %v3242_v3 = vpop.f32.mrf.mxu0  ;;  %v7259_v53 = vadd.f32 %v3229_v8, %v3068_v60 }
 0x254   : > { %v2956_v9 = vpop.f32.mrf.mxu1 }
 0x255   : > { %v3071_v11 = vadd.f32 %v2956_v9, %v7155_v52  ;;  %v5525_v49 = vpop.f32.mrf.mxu0  ;;  %v7262_v54 = vadd.f32 %v5524_v45, %v3073_v44 }
 0x256   : > { %v5477_v17 = vpop.f32.mrf.mxu1 }
 0x257   : > { %v3074_v5 = vadd.f32 %v5477_v17, %v7158_v31  ;;  %v3245_v39 = vpop.f32.mrf.mxu0  ;;  %v7265_v6 = vadd.f32 %v3242_v3, %v3071_v11 }
 0x258   : > { %v2959_v47 = vpop.f32.mrf.mxu1 }
 0x259   : > { %v3072_v20 = vadd.f32 %v2959_v47, %v7163_v15  ;;  %v5528_v4 = vpop.f32.mrf.mxu0  ;;  %v7268_v62 = vadd.f32 %v5525_v49, %v3074_v5 }
 0x25a   : > { %v5480_v41 = vpop.f32.mrf.mxu1 }
 0x25b   : > { %v3077_v13 = vadd.f32 %v5480_v41, %v7166_v12  ;;  %v3258_v38 = vpop.f32.mrf.mxu0  ;;  %v7271_v52 = vadd.f32 %v3245_v39, %v3072_v20 }
 0x25c   : > { %v2972_v43 = vpop.f32.mrf.mxu1 }
 0x25d   : > { %v3075_v40 = vadd.f32 %v2972_v43, %v7169_v28  ;;  %v5529_v14 = vpop.f32.mrf.mxu0  ;;  %v7274_v31 = vadd.f32 %v5528_v4, %v3077_v13 }
 0x25e   : > { %v5481_v26 = vpop.f32.mrf.mxu1 }
 0x25f   : > { %v3078_v23 = vadd.f32 %v5481_v26, %v7172_v2  ;;  %v3261_v29 = vpop.f32.mrf.mxu0  ;;  %v7277_v15 = vadd.f32 %v3258_v38, %v3075_v40 }
 0x260   : > { %v2975_v35 = vpop.f32.mrf.mxu1 }
 0x261   : > { %v3076_v18 = vadd.f32 %v2975_v35, %v7177_v0  ;;  %v5532_v16 = vpop.f32.mrf.mxu0  ;;  %v7280_v12 = vadd.f32 %v5529_v14, %v3078_v23 }
 0x262   : > { %v5484_v63 = vpop.f32.mrf.mxu1 }
 0x263   : > { %v3081_v27 = vadd.f32 %v5484_v63, %v7180_v21  ;;  %v3274_v8 = vpop.f32.mrf.mxu0  ;;  %v7283_v28 = vadd.f32 %v3261_v29, %v3076_v18 }
 0x264   : > { %v2988_v55 = vpop.f32.mrf.mxu1 }
 0x265   : > { %v3079_v60 = vadd.f32 %v2988_v55, %v7183_v33  ;;  %v5533_v45 = vpop.f32.mrf.mxu0  ;;  %v7286_v2 = vadd.f32 %v5532_v16, %v3081_v27 }
 0x266   : > { %v5485_v37 = vpop.f32.mrf.mxu1 }
 0x267   : > { %v3082_v44 = vadd.f32 %v5485_v37, %v7186_v42  ;;  %v3277_v3 = vpop.f32.mrf.mxu0  ;;  %v7289_v0 = vadd.f32 %v3274_v8, %v3079_v60 }
 0x268   : > { %v2991_v9 = vpop.f32.mrf.mxu1 }
 0x269   : > { %v3080_v11 = vadd.f32 %v2991_v9, %v7192_v7  ;;  %v5536_v49 = vpop.f32.mrf.mxu0  ;;  %v7292_v21 = vadd.f32 %v5533_v45, %v3082_v44 }
 0x26a   : > { %v5488_v17 = vpop.f32.mrf.mxu1 }
 0x26b   : > { %v3085_v5 = vadd.f32 %v5488_v17, %v7195_v51  ;;  %v3290_v39 = vpop.f32.mrf.mxu0  ;;  %v7295_v33 = vadd.f32 %v3277_v3, %v3080_v11 }
 0x26c   : > { %v3004_v47 = vpop.f32.mrf.mxu1 }
 0x26d   : > { %v3083_v20 = vadd.f32 %v3004_v47, %v7199_v58  ;;  %v5537_v4 = vpop.f32.mrf.mxu0  ;;  %v7298_v42 = vadd.f32 %v5536_v49, %v3085_v5 }
 0x26e   : > { %v5489_v41 = vpop.f32.mrf.mxu1 }
 0x26f   : > { %v3086_v13 = vadd.f32 %v5489_v41, %v7202_v25  ;;  %v3293_v38 = vpop.f32.mrf.mxu0  ;;  %v7301_v7 = vadd.f32 %v3290_v39, %v3083_v20 }
 0x270   : > { %v3007_v43 = vpop.f32.mrf.mxu1 }
 0x271   : > { %v3084_v40 = vadd.f32 %v3007_v43, %v7211_v61  ;;  %v5540_v14 = vpop.f32.mrf.mxu0  ;;  %v7304_v51 = vadd.f32 %v5537_v4, %v3086_v13 }
 0x272   : > { %v5492_v26 = vpop.f32.mrf.mxu1 }
 0x273   : > { %v3089_v23 = vadd.f32 %v5492_v26, %v7214_v32  ;;  %v3306_v29 = vpop.f32.mrf.mxu0  ;;  %v7307_v58 = vadd.f32 %v3293_v38, %v3084_v40 }
 0x274   : > { %v3020_v35 = vpop.f32.mrf.mxu1 }
 0x275   : > { %v3087_v18 = vadd.f32 %v3020_v35, %v7217_v50  ;;  %v5541_v16 = vpop.f32.mrf.mxu0  ;;  %v7310_v25 = vadd.f32 %v5540_v14, %v3089_v23 }
 0x276   : > { %v5493_v63 = vpop.f32.mrf.mxu1 }
 0x277   : > { %v3090_v27 = vadd.f32 %v5493_v63, %v7220_v48  ;;  %v3309_v8 = vpop.f32.mrf.mxu0  ;;  %v7313_v61 = vadd.f32 %v3306_v29, %v3087_v18 }
 0x278   : > { %v3023_v55 = vpop.f32.mrf.mxu1 }
 0x279   : > { %v3088_v60 = vadd.f32 %v3023_v55, %v7223_v30  ;;  %v5544_v45 = vpop.f32.mrf.mxu0  ;;  %v7316_v32 = vadd.f32 %v5541_v16, %v3090_v27 }
 0x27a   : > { %v5496_v37 = vpop.f32.mrf.mxu1 }
 0x27b   : > { %v3093_v44 = vadd.f32 %v5496_v37, %v7226_v24  ;;  %v3322_v3 = vpop.f32.mrf.mxu0  ;;  %v7319_v50 = vadd.f32 %v3309_v8, %v3088_v60 }
 0x27c   : > { %v3036_v9 = vpop.f32.mrf.mxu1 }
 0x27d   : > { %v3091_v11 = vadd.f32 %v3036_v9, %v7229_v36  ;;  %v5545_v49 = vpop.f32.mrf.mxu0  ;;  %v7322_v48 = vadd.f32 %v5544_v45, %v3093_v44 }
 0x27e   : > { %v5497_v17 = vpop.f32.mrf.mxu1 }
 0x27f   : > { %v3094_v5 = vadd.f32 %v5497_v17, %v7232_v56  ;;  %v3325_v39 = vpop.f32.mrf.mxu0  ;;  %v7325_v30 = vadd.f32 %v3322_v3, %v3091_v11 }
 0x280   : > { %v3039_v47 = vpop.f32.mrf.mxu1 }
 0x281   : > { %v3092_v20 = vadd.f32 %v3039_v47, %v7235_v57  ;;  %v5548_v4 = vpop.f32.mrf.mxu0  ;;  %v7328_v24 = vadd.f32 %v5545_v49, %v3094_v5 }
 0x282   : > { %v5500_v41 = vpop.f32.mrf.mxu1 }
 0x283   : > { %v3097_v13 = vadd.f32 %v5500_v41, %v7238_v46  ;;  %v3338_v38 = vpop.f32.mrf.mxu0  ;;  %v7331_v36 = vadd.f32 %v3325_v39, %v3092_v20 }
 0x284   : > { %v3052_v43 = vpop.f32.mrf.mxu1 }
 0x285   : > { %v3095_v40 = vadd.f32 %v3052_v43, %v7241_v1  ;;  %v5549_v14 = vpop.f32.mrf.mxu0  ;;  %v7334_v56 = vadd.f32 %v5548_v4, %v3097_v13 }
 0x286   : > { %v5501_v26 = vpop.f32.mrf.mxu1 }
 0x287   : > { %v3098_v23 = vadd.f32 %v5501_v26, %v7244_v10  ;;  %v3341_v29 = vpop.f32.mrf.mxu0  ;;  %v7337_v57 = vadd.f32 %v3338_v38, %v3095_v40 }
 0x288   : > { %v3055_v35 = vpop.f32.mrf.mxu1 }
 0x289   : > { %v3096_v18 = vadd.f32 %v3055_v35, %v7247_v59  ;;  %v5616_v16 = vpop.f32.mrf.mxu0  ;;  %v7340_v46 = vadd.f32 %v5549_v14, %v3098_v23 }
 0x28a   : > { %v5568_v63 = vpop.f32.mrf.mxu1 }
 0x28b   : > { %v3858_v27 = vadd.f32 %v5568_v63, %v7250_v34  ;;  %v4001_v8 = vpop.f32.mrf.mxu0  ;;  %v7343_v1 = vadd.f32 %v3341_v29, %v3096_v18 }
 0x28c   : > { %v3729_v55 = vpop.f32.mrf.mxu1 }
 0x28d   : > { %v3856_v60 = vadd.f32 %v3729_v55, %v7253_v22  ;;  %v5617_v45 = vpop.f32.mrf.mxu0  ;;  %v7346_v10 = vadd.f32 %v5616_v16, %v3858_v27 }
 0x28e   : > { %v5569_v37 = vpop.f32.mrf.mxu1 }
 0x28f   : > { %v3859_v44 = vadd.f32 %v5569_v37, %v7256_v19  ;;  %v7349_v3 = vpop.f32.mrf.mxu0  ;;  %v7351_v59 = vadd.f32 %v4001_v8, %v3856_v60 }
 0x290   : > { %v7353_v9 = vpop.f32.mrf.mxu1 }
 0x291   : > { %v5620_v11 = vpop.f32.mrf.mxu0  ;;  %v7355_v34 = vadd.f32 %v5617_v45, %v3859_v44 }
 0x292   : > { %v5572_v49 = vpop.f32.mrf.mxu1 }
 0x293   : > { %v3862_v17 = vadd.f32 %v5572_v49, %v7262_v54  ;;  %v4017_v5 = vpop.f32.mrf.mxu0 }
 0x294   : > { %v3745_v22 = vpop.f32.mrf.mxu1 }
 0x295   : > { %v3860_v39 = vadd.f32 %v3745_v22, %v7265_v6  ;;  %v5621_v47 = vpop.f32.mrf.mxu0  ;;  %v7359_v20 = vadd.f32 %v5620_v11, %v3862_v17 }
 0x296   : > { %v5573_v19 = vpop.f32.mrf.mxu1 }
 0x297   : > { %v3863_v4 = vadd.f32 %v5573_v19, %v7268_v62  ;;  %v7362_v41 = vpop.f32.mrf.mxu0  ;;  %v7364_v13 = vadd.f32 %v4017_v5, %v3860_v39 }
 0x298   : > { %v7366_v38 = vpop.f32.mrf.mxu1 }
 0x299   : > { %v5624_v43 = vpop.f32.mrf.mxu0  ;;  %v7368_v40 = vadd.f32 %v5621_v47, %v3863_v4 }
 0x29a   : > { %v5576_v54 = vpop.f32.mrf.mxu1 }
 0x29b   : > { %v3866_v14 = vadd.f32 %v5576_v54, %v7274_v31  ;;  %v4033_v26 = vpop.f32.mrf.mxu0 }
 0x29c   : > { %v3761_v6 = vpop.f32.mrf.mxu1 }
 0x29d   : > { %v3864_v23 = vadd.f32 %v3761_v6, %v7277_v15  ;;  %v5625_v29 = vpop.f32.mrf.mxu0  ;;  %v7372_v35 = vadd.f32 %v5624_v43, %v3866_v14 }
 0x29e   : > { %v5577_v62 = vpop.f32.mrf.mxu1 }
 0x29f   : > { %v3867_v18 = vadd.f32 %v5577_v62, %v7280_v12  ;;  %v7375_v16 = vpop.f32.mrf.mxu0  ;;  %v7377_v63 = vadd.f32 %v4033_v26, %v3864_v23 }
 0x2a0   : > { %v7379_v27 = vpop.f32.mrf.mxu1 }
 0x2a1   : > { %v5628_v8 = vpop.f32.mrf.mxu0  ;;  %v7381_v55 = vadd.f32 %v5625_v29, %v3867_v18 }
 0x2a2   : > { %v5580_v31 = vpop.f32.mrf.mxu1 }
 0x2a3   : > { %v3870_v60 = vadd.f32 %v5580_v31, %v7286_v2  ;;  %v4049_v45 = vpop.f32.mrf.mxu0 }
 0x2a4   : > { %v3777_v15 = vpop.f32.mrf.mxu1 }
 0x2a5   : > { %v3868_v37 = vadd.f32 %v3777_v15, %v7289_v0  ;;  %v5629_v44 = vpop.f32.mrf.mxu0  ;;  %v7385_v11 = vadd.f32 %v5628_v8, %v3870_v60 }
 0x2a6   : > { %v5581_v12 = vpop.f32.mrf.mxu1 }
 0x2a7   : > { %v3871_v49 = vadd.f32 %v5581_v12, %v7292_v21  ;;  %v7388_v17 = vpop.f32.mrf.mxu0  ;;  %v7390_v5 = vadd.f32 %v4049_v45, %v3868_v37 }
 0x2a8   : > { %v7392_v22 = vpop.f32.mrf.mxu1 }
 0x2a9   : > { %v5632_v39 = vpop.f32.mrf.mxu0  ;;  %v7394_v47 = vadd.f32 %v5629_v44, %v3871_v49 }
 0x2aa   : > { %v5584_v2 = vpop.f32.mrf.mxu1 }
 0x2ab   : > { %v3874_v19 = vadd.f32 %v5584_v2, %v7298_v42  ;;  %v4065_v4 = vpop.f32.mrf.mxu0 }
 0x2ac   : > { %v3793_v0 = vpop.f32.mrf.mxu1 }
 0x2ad   : > { %v3872_v43 = vadd.f32 %v3793_v0, %v7301_v7  ;;  %v5633_v54 = vpop.f32.mrf.mxu0  ;;  %v7398_v14 = vadd.f32 %v5632_v39, %v3874_v19 }
 0x2ae   : > { %v5585_v21 = vpop.f32.mrf.mxu1 }
 0x2af   : > { %v3875_v26 = vadd.f32 %v5585_v21, %v7304_v51  ;;  %v7401_v6 = vpop.f32.mrf.mxu0  ;;  %v7403_v23 = vadd.f32 %v4065_v4, %v3872_v43 }
 0x2b0   : > { %v7405_v29 = vpop.f32.mrf.mxu1 }
 0x2b1   : > { %v5636_v62 = vpop.f32.mrf.mxu0  ;;  %v7407_v18 = vadd.f32 %v5633_v54, %v3875_v26 }
 0x2b2   : > { %v5588_v42 = vpop.f32.mrf.mxu1 }
 0x2b3   : > { %v3878_v8 = vadd.f32 %v5588_v42, %v7310_v25  ;;  %v4081_v31 = vpop.f32.mrf.mxu0 }
 0x2b4   : > { %v3809_v7 = vpop.f32.mrf.mxu1 }
 0x2b5   : > { %v3876_v60 = vadd.f32 %v3809_v7, %v7313_v61  ;;  %v5637_v45 = vpop.f32.mrf.mxu0  ;;  %v7411_v15 = vadd.f32 %v5636_v62, %v3878_v8 }
 0x2b6   : > { %v5589_v51 = vpop.f32.mrf.mxu1 }
 0x2b7   : > { %v3879_v37 = vadd.f32 %v5589_v51, %v7316_v32  ;;  %v7414_v44 = vpop.f32.mrf.mxu0  ;;  %v7416_v12 = vadd.f32 %v4081_v31, %v3876_v60 }
 0x2b8   : > { %v7418_v49 = vpop.f32.mrf.mxu1 }
 0x2b9   : > { %v5640_v39 = vpop.f32.mrf.mxu0  ;;  %v7420_v2 = vadd.f32 %v5637_v45, %v3879_v37 }
 0x2ba   : > { %v5592_v25 = vpop.f32.mrf.mxu1 }
 0x2bb   : > { %v3882_v19 = vadd.f32 %v5592_v25, %v7322_v48  ;;  %v4097_v4 = vpop.f32.mrf.mxu0 }
 0x2bc   : > { %v3825_v61 = vpop.f32.mrf.mxu1 }
 0x2bd   : > { %v3880_v0 = vadd.f32 %v3825_v61, %v7325_v30  ;;  %v5641_v43 = vpop.f32.mrf.mxu0  ;;  %v7424_v54 = vadd.f32 %v5640_v39, %v3882_v19 }
 0x2be   : > { %v5593_v32 = vpop.f32.mrf.mxu1 }
 0x2bf   : > { %v3883_v21 = vadd.f32 %v5593_v32, %v7328_v24  ;;  %v7427_v26 = vpop.f32.mrf.mxu0  ;;  %v7429_v62 = vadd.f32 %v4097_v4, %v3880_v0 }
 0x2c0   : > { %v7431_v42 = vpop.f32.mrf.mxu1 }
 0x2c1   : > { %v5644_v8 = vpop.f32.mrf.mxu0  ;;  %v7433_v31 = vadd.f32 %v5641_v43, %v3883_v21 }
 0x2c2   : > { %v5596_v48 = vpop.f32.mrf.mxu1 }
 0x2c3   : > { %v3886_v7 = vadd.f32 %v5596_v48, %v7334_v56  ;;  %v4113_v60 = vpop.f32.mrf.mxu0  ;;  %v3857_v56 = vadd.f32 %v7353_v9, %v7259_v53 }
 0x2c4   : > { %v3841_v30 = vpop.f32.mrf.mxu1 }
 0x2c5   : > { %v3884_v45 = vadd.f32 %v3841_v30, %v7337_v57  ;;  %v5645_v51 = vpop.f32.mrf.mxu0  ;;  %v7437_v37 = vadd.f32 %v5644_v8, %v3886_v7  ;;  %v7458_v30 = vld [vmem:[%s7571_s4] ss:$0 sm:$0xff] }
 0x2c6   : > { %v5597_v24 = vpop.f32.mrf.mxu1 }
 0x2c7   : > { %v3887_v39 = vadd.f32 %v5597_v24, %v7340_v46  ;;  %v7440_v25 = vpop.f32.mrf.mxu0  ;;  %v7442_v19 = vadd.f32 %v4113_v60, %v3884_v45  ;;  %v3861_v46 = vadd.f32 %v7366_v38, %v7271_v52  ;;  %v4129_v60 = vadd.f32 %v7349_v3, %v3857_v56 }
 0x2c8   : > { %v7444_v4 = vpop.f32.mrf.mxu1 }
 0x2c9   : > { %v5664_v61 = vpop.f32.mrf.mxu0  ;;  %v7446_v0 = vadd.f32 %v5645_v51, %v3887_v39  ;;  %v4133_v3 = vadd.f32 %v7362_v41, %v3861_v46 }
 0x2ca   : > { %v5668_v43 = vpop.f32.mrf.mxu1  ;;  %v4402_v48 = vadd.f32 %v5664_v61, %v7346_v10 }
 0x2cb   : > { %7603 = vst [vmem:[#allocation6_spill] sm:$0xff] %v7446_v0  ;;  %v4273_v57 = vpop.f32.mrf.mxu0 }
 0x2cc   : > { %v4400_v32 = vadd.f32 %v4273_v57, %v7351_v59  ;;  %v4289_v21 = vpop.f32.mrf.mxu1  ;;  %v4441_v24 = vadd.f32 %v7458_v30, %v4402_v48 }
 0x2cd   : > { %v5665_v8 = vpop.f32.mrf.mxu0  ;;  %v4404_v52 = vadd.f32 %v4289_v21, %v7364_v13 }
 0x2ce   : > { %v5669_v7 = vpop.f32.mrf.mxu1  ;;  %v4439_v9 = vadd.f32 %v7458_v30, %v4400_v32  ;;  %v4403_v59 = vadd.f32 %v5665_v8, %v7355_v34  ;;  %v3865_v34 = vadd.f32 %v7379_v27, %v7283_v28  ;;  %v4473_v32 = vmax.f32 %v4441_v24, 0.0 }
 0x2cf   : > { %v4276_v53 = vpop.f32.mrf.mxu0  ;;  %v4406_v8 = vadd.f32 %v5668_v43, %v7359_v20  ;;  %v4443_v48 = vadd.f32 %v7458_v30, %v4404_v52  ;;  %v4407_v41 = vadd.f32 %v5669_v7, %v7368_v40  ;;  %v3869_v40 = vadd.f32 %v7392_v22, %v7295_v33 }
 0x2d0   : > { %v4401_v45 = vadd.f32 %v4276_v53, %v4129_v60  ;;  %v4292_v51 = vpop.f32.mrf.mxu1  ;;  %v4471_v39 = vmax.f32 %v4439_v9, 0.0  ;;  %v4442_v61 = vadd.f32 %v7458_v30, %v4403_v59  ;;  %v4137_v59 = vadd.f32 %v7375_v16, %v3865_v34 }
 0x2d1   : > { %v4405_v57 = vadd.f32 %v4292_v51, %v4133_v3  ;;  %v4475_v51 = vmax.f32 %v4443_v48, 0.0  ;;  %v4446_v43 = vadd.f32 %v7458_v30, %v4407_v41 }
 0x2d2   : > { %v4440_v10 = vadd.f32 %v7458_v30, %v4401_v45  ;;  %v5672_v38 = vpop.f32.mrf.mxu1  ;;  %v4474_v60 = vmax.f32 %v4442_v61, 0.0  ;;  %v4445_v45 = vadd.f32 %v7458_v30, %v4406_v8  ;;  %v4141_v8 = vadd.f32 %v7388_v17, %v3869_v40 }
 0x2d3   : > { %v4444_v53 = vadd.f32 %v7458_v30, %v4405_v57  ;;  %v4410_v16 = vadd.f32 %v5672_v38, %v7372_v35  ;;  %v4478_v57 = vmax.f32 %v4446_v43, 0.0 }
 0x2d4   : > { %v4472_v56 = vmax.f32 %v4440_v10, 0.0  ;;  %v4305_v0 = vpop.f32.mrf.mxu1  ;;  %v4477_v7 = vmax.f32 %v4445_v45, 0.0 }
 0x2d5   : > { %v4408_v27 = vadd.f32 %v4305_v0, %v7377_v63  ;;  %v4476_v24 = vmax.f32 %v4444_v53, 0.0  ;;  %v4449_v48 = vadd.f32 %v7458_v30, %v4410_v16 }
 0x2d6   : > { %v4503_v13 = vadd.f32 %v4472_v56, %v4471_v39  ;;  %v5673_v21 = vpop.f32.mrf.mxu1 }
 0x2d7   : > { %v4447_v61 = vadd.f32 %v7458_v30, %v4408_v27  ;;  %v4411_v63 = vadd.f32 %v5673_v21, %v7381_v55  ;;  %v3873_v55 = vadd.f32 %v7405_v29, %v7307_v58  ;;  %v4481_v21 = vmax.f32 %v4449_v48, 0.0 }
 0x2d8   : > { %v4504_v46 = vadd.f32 %v4503_v13, %v4473_v32  ;;  %v4308_v9 = vpop.f32.mrf.mxu1 }
 0x2d9   : > { %v4409_v10 = vadd.f32 %v4308_v9, %v4137_v59  ;;  %v4479_v13 = vmax.f32 %v4447_v61, 0.0  ;;  %v4450_v38 = vadd.f32 %v7458_v30, %v4411_v63 }
 0x2da   : > { %v4505_v28 = vadd.f32 %v4504_v46, %v4474_v60  ;;  %v5676_v20 = vpop.f32.mrf.mxu1 }
 0x2db   : > { %v4448_v0 = vadd.f32 %v7458_v30, %v4409_v10  ;;  %v4414_v17 = vadd.f32 %v5676_v20, %v7385_v11 }
 0x2dc   : > { %v4506_v52 = vadd.f32 %v4505_v28, %v4475_v51  ;;  %v4321_v3 = vpop.f32.mrf.mxu1  ;;  %v4482_v51 = vmax.f32 %v4450_v38, 0.0 }
 0x2dd   : > { %v4412_v22 = vadd.f32 %v4321_v3, %v7390_v5  ;;  %v4480_v41 = vmax.f32 %v4448_v0, 0.0 }
 0x2de   : > { %v4507_v39 = vadd.f32 %v4506_v52, %v4476_v24  ;;  %v5677_v56 = vpop.f32.mrf.mxu1  ;;  %v4145_v24 = vadd.f32 %v7401_v6, %v3873_v55  ;;  %v4453_v52 = vadd.f32 %v7458_v30, %v4414_v17 }
 0x2df   : > { %v4451_v59 = vadd.f32 %v7458_v30, %v4412_v22  ;;  %v4415_v5 = vadd.f32 %v5677_v56, %v7394_v47  ;;  %v3877_v47 = vadd.f32 %v7418_v49, %v7319_v50 }
 0x2e0   : > { %v4508_v34 = vadd.f32 %v4507_v39, %v4477_v7  ;;  %v4324_v32 = vpop.f32.mrf.mxu1  ;;  %v4485_v16 = vmax.f32 %v4453_v52, 0.0 }
 0x2e1   : > { %v4413_v46 = vadd.f32 %v4324_v32, %v4141_v8  ;;  %v4483_v10 = vmax.f32 %v4451_v59, 0.0  ;;  %v4454_v20 = vadd.f32 %v7458_v30, %v4415_v5  ;;  %v4149_v8 = vadd.f32 %v7414_v44, %v3877_v47 }
 0x2e2   : > { %v4509_v33 = vadd.f32 %v4508_v34, %v4478_v57  ;;  %v5680_v60 = vpop.f32.mrf.mxu1 }
 0x2e3   : > { %v4452_v27 = vadd.f32 %v7458_v30, %v4413_v46  ;;  %v4418_v6 = vadd.f32 %v5680_v60, %v7398_v14  ;;  %v4486_v34 = vmax.f32 %v4454_v20, 0.0 }
 0x2e4   : > { %v4510_v35 = vadd.f32 %v4509_v33, %v4479_v13  ;;  %v4337_v53 = vpop.f32.mrf.mxu1 }
 0x2e5   : > { %v4416_v29 = vadd.f32 %v4337_v53, %v7403_v23  ;;  %v4484_v40 = vmax.f32 %v4452_v27, 0.0  ;;  %v4457_v48 = vadd.f32 %v7458_v30, %v4418_v6 }
 0x2e6   : > { %v4511_v9 = vadd.f32 %v4510_v35, %v4480_v41  ;;  %v5681_v45 = vpop.f32.mrf.mxu1 }
 0x2e7   : > { %v4455_v56 = vadd.f32 %v7458_v30, %v4416_v29  ;;  %v4419_v23 = vadd.f32 %v5681_v45, %v7407_v18  ;;  %v3881_v18 = vadd.f32 %v7431_v42, %v7331_v36  ;;  %v4489_v41 = vmax.f32 %v4457_v48, 0.0 }
 0x2e8   : > { %v4512_v28 = vadd.f32 %v4511_v9, %v4481_v21  ;;  %v4340_v43 = vpop.f32.mrf.mxu1 }
 0x2e9   : > { %v4417_v7 = vadd.f32 %v4340_v43, %v4145_v24  ;;  %v4487_v13 = vmax.f32 %v4455_v56, 0.0  ;;  %v4458_v22 = vadd.f32 %v7458_v30, %v4419_v23  ;;  %v4153_v45 = vadd.f32 %v7427_v26, %v3881_v18 }
 0x2ea   : > { %v4513_v58 = vadd.f32 %v4512_v28, %v4482_v51  ;;  %v5684_v3 = vpop.f32.mrf.mxu1 }
 0x2eb   : > { %v4456_v0 = vadd.f32 %v7458_v30, %v4417_v7  ;;  %v4422_v44 = vadd.f32 %v5684_v3, %v7411_v15  ;;  %v4490_v21 = vmax.f32 %v4458_v22, 0.0 }
 0x2ec   : > { %v4514_v11 = vadd.f32 %v4513_v58, %v4483_v10  ;;  %v4353_v39 = vpop.f32.mrf.mxu1 }
 0x2ed   : > { %v4420_v49 = vadd.f32 %v4353_v39, %v7416_v12  ;;  %v4488_v60 = vmax.f32 %v4456_v0, 0.0  ;;  %v4461_v51 = vadd.f32 %v7458_v30, %v4422_v44  ;;  %v7604_v0 = vld [vmem:[#allocation6_spill] sm:$0xff] }
 0x2ee   : > { %v4515_v61 = vadd.f32 %v4514_v11, %v4484_v40  ;;  %v5685_v57 = vpop.f32.mrf.mxu1 }
 0x2ef   : > { %v4459_v53 = vadd.f32 %v7458_v30, %v4420_v49  ;;  %v4423_v12 = vadd.f32 %v5685_v57, %v7420_v2  ;;  %v3885_v2 = vadd.f32 %v7444_v4, %v7343_v1  ;;  %v4493_v10 = vmax.f32 %v4461_v51, 0.0 }
 0x2f0   : > { %v4516_v63 = vadd.f32 %v4515_v61, %v4485_v16  ;;  %v4356_v32 = vpop.f32.mrf.mxu1 }
 0x2f1   : > { %v4421_v35 = vadd.f32 %v4356_v32, %v4149_v8  ;;  %v4491_v28 = vmax.f32 %v4459_v53, 0.0  ;;  %v4462_v27 = vadd.f32 %v7458_v30, %v4423_v12  ;;  %v4157_v7 = vadd.f32 %v7440_v25, %v3885_v2 }
 0x2f2   : > { %v4517_v50 = vadd.f32 %v4516_v63, %v4486_v34  ;;  %v5688_v33 = vpop.f32.mrf.mxu1 }
 0x2f3   : > { %v4460_v17 = vadd.f32 %v7458_v30, %v4421_v35  ;;  %v4426_v26 = vadd.f32 %v5688_v33, %v7424_v54  ;;  %v4494_v11 = vmax.f32 %v4462_v27, 0.0 }
 0x2f4   : > { %v4518_v14 = vadd.f32 %v4517_v50, %v4487_v13  ;;  %v4369_v38 = vpop.f32.mrf.mxu1 }
 0x2f5   : > { %v4424_v42 = vadd.f32 %v4369_v38, %v7429_v62  ;;  %v4492_v43 = vmax.f32 %v4460_v17, 0.0  ;;  %v4465_v47 = vadd.f32 %v7458_v30, %v4426_v26 }
 0x2f6   : > { %v4519_v46 = vadd.f32 %v4518_v14, %v4488_v60  ;;  %v5689_v55 = vpop.f32.mrf.mxu1 }
 0x2f7   : > { %v4463_v29 = vadd.f32 %v7458_v30, %v4424_v42  ;;  %v4427_v62 = vadd.f32 %v5689_v55, %v7433_v31  ;;  %v4497_v57 = vmax.f32 %v4465_v47, 0.0 }
 0x2f8   : > { %v4520_v9 = vadd.f32 %v4519_v46, %v4489_v41  ;;  %v4372_v59 = vpop.f32.mrf.mxu1 }
 0x2f9   : > { %v4425_v24 = vadd.f32 %v4372_v59, %v4153_v45  ;;  %v4495_v16 = vmax.f32 %v4463_v29, 0.0  ;;  %v4466_v54 = vadd.f32 %v7458_v30, %v4427_v62 }
 0x2fa   : > { %v4521_v36 = vadd.f32 %v4520_v9, %v4490_v21  ;;  %v5692_v5 = vpop.f32.mrf.mxu1 }
 0x2fb   : > { %v4464_v40 = vadd.f32 %v7458_v30, %v4425_v24  ;;  %v4430_v31 = vadd.f32 %v5692_v5, %v7437_v37  ;;  %v4498_v23 = vmax.f32 %v4466_v54, 0.0 }
 0x2fc   : > { %v4522_v15 = vadd.f32 %v4521_v36, %v4491_v28  ;;  %v4385_v52 = vpop.f32.mrf.mxu1 }
 0x2fd   : > { %v4428_v4 = vadd.f32 %v4385_v52, %v7442_v19  ;;  %v4496_v6 = vmax.f32 %v4464_v40, 0.0  ;;  %v4469_v19 = vadd.f32 %v7458_v30, %v4430_v31 }
 0x2fe   : > { %v4523_v58 = vadd.f32 %v4522_v15, %v4492_v43  ;;  %v5693_v3 = vpop.f32.mrf.mxu1 }
 0x2ff   : > { %v4467_v63 = vadd.f32 %v7458_v30, %v4428_v4  ;;  %v4431_v32 = vadd.f32 %v5693_v3, %v7604_v0  ;;  %v4501_v14 = vmax.f32 %v4469_v19, 0.0 }
 0x300   : > { %v4524_v20 = vadd.f32 %v4523_v58, %v4493_v10  ;;  %v4388_v39 = vpop.f32.mrf.mxu1 }
 0x301   : > { %v4429_v56 = vadd.f32 %v4388_v39, %v4157_v7  ;;  %v4499_v48 = vmax.f32 %v4467_v63, 0.0  ;;  %v4470_v49 = vadd.f32 %v7458_v30, %v4431_v32 }
 0x302   : > { %v4525_v1 = vadd.f32 %v4524_v20, %v4494_v11 }
 0x303   : > { %v4468_v8 = vadd.f32 %v7458_v30, %v4429_v56  ;;  %v4502_v22 = vmax.f32 %v4470_v49, 0.0 }
 0x304   : > { %v4526_v61 = vadd.f32 %v4525_v1, %v4495_v16 }
 0x305   : > { %v4500_v33 = vmax.f32 %v4468_v8, 0.0 }
 0x306   : > { %v4527_v34 = vadd.f32 %v4526_v61, %v4496_v6 }
 0x308   : > { %v4528_v25 = vadd.f32 %v4527_v34, %v4497_v57 }
 0x30a   : > { %v4529_v13 = vadd.f32 %v4528_v25, %v4498_v23 }
 0x30c   : > { %v4530_v50 = vadd.f32 %v4529_v13, %v4499_v48 }
 0x30e   : > { %v4531_v37 = vadd.f32 %v4530_v50, %v4500_v33 }
 0x310   : > { %v4532_v60 = vadd.f32 %v4531_v37, %v4501_v14 }
 0x312   : > { %v4533_v35 = vadd.f32 %v4532_v60, %v4502_v22 }
 0x314   : > { %v4534_v38 = vrot.slane %v4533_v35, 4 }
 0x316   : > { %v4535_v18 = vadd.f32 %v4534_v38, %v4533_v35 }
 0x318   : > { %v4536_v41 = vrot.slane %v4535_v18, 2 }
 0x31a   : > { %v4537_v46 = vadd.f32 %v4536_v41, %v4535_v18 }
 0x31c   : > { %v4538_v44 = vrot.slane %v4537_v46, 1 }
 0x31e   : > { %v4539_v53 = vadd.f32 %v4538_v44, %v4537_v46 }
 0x320   : > { %v4540_v55 = vmul.f32 0.00390625, %v4539_v53 }
 0x322   : > { %4541 = vst [vmem:[%s216_s26] sm:$0x1] %v4540_v55 }
 0x323   : > { %5880 = shalt.err (!%p5877_p3)
}
 0x324   : > { %s5881_s13 = scalar_lea.hbm %s4553_s8, 16  ;;  %s5885_s16 = scalar_lea.hbm %s7572_s5, 32 }
 0x325   : > { %p5882_p4 = scmp.ne.s32.totalorder %s4553_s8, %s5881_s13  ;;  %p5886_p9 = scmp.lt.s32.totalorder %s4553_s8, %s7572_s5 }
 0x326   : > { %p5887_p10 = scmp.lt.s32.totalorder %s5885_s16, %s5881_s13 }
 0x327   : > { %p5883_p7 = pnand %p5882_p4, %p6000_p5 }
 0x328   : > { %p5888_p11 = por %p5887_p10, %p5886_p9 }
 0x329   : > { %p5884_p8 = pneg %p5883_p7 }
 0x32b   : > { %p5889_p12 = pnand %p5888_p11, %p5884_p8 }
 0x32d   : > { %5892 = shalt.err (!%p5889_p12)
}
 0x32e   : > { %5710 = dma.vmem_to_hbm [thread:$0]  (%p6000_p5), %s4556_s30, 16, %s4553_s8, %s4543_s9  }
 0x32f PF: > { %p5716_p13 = scmp.ge.s32.totalorder %s5927_s21, 2  ;;  %s4567_s25 = sand.u32 1, %s5915_s18  }
 0x330   : > { %s4568_s26 = scalar_lea.sflag [#allocation4], %s4567_s25 }
 0x331   : > { %p5713_p0 = pnand %p5716_p13, %p6004_p6 }
 0x333   : > { %p5714_p1 = pneg %p5713_p0 }
 0x335   : > { %5910 = dma.done.wait (%p5714_p1), %s4568_s26, 16  }
 0x336   : > { %5912 = vsyncadd (%p5714_p1), %s4568_s26, 4294967280  ;;  %p15_p2 = scmp.ge.s32.totalorder %s5987_s24, 4   ;;  %s7605_s18 = smov %s5919_s19 }
 0x337   : > { %s7606_s19 = smov %s5923_s20  ;;  %s7607_s20 = smov %s5998_s27 }
 0x338   : > { %s7608_s21 = smov %s5987_s24  ;;  %17 = sbr.rel (!%p15_p2) target bundleno = 3 (0x3), region = 84 }
 0x33d   :  { %4572 = vsyncpa [#allocation4], 1 }
 0x33e   :  { %4574 = vsyncpa [#allocation4 + $0x1], 1 }

</bundles_post_ra>
